<compile_context>
chip_gen: v6e
topology: v6e:2x2x1
jax: 0.10.0
libtpu: 0.0.40
codegen_flags: <defaults>
</compile_context>

<pallas_src>
from functools import partial

import jax
import jax.numpy as jnp
from jax.experimental import pallas as pl
from jax.experimental.pallas import tpu as pltpu

_IN_FEATURES = 10
_LANE = 128
_ROW_WIDTH = _IN_FEATURES * _LANE  # 1280


def _ceil_div(a, b):
    return -(-a // b)


def _affine_mxu_kernel(x_ref, w_ref, b_ref, o_ref):
    """o[r, j] = b + sum_k w_eff[k] * x[r, 10*j + k]  via one MXU matmul.

    x_ref: (tile_rows, 1280)  128 batch elements per row, 10 features each
    w_ref: (1280, 128)        block-diagonal folded weights (resident)
    b_ref: (1, 128)           folded bias, broadcast across lanes
    o_ref: (tile_rows, 128)   lane-dense output tile (batch = r*128 + j)
    """
    o_ref[...] = (
        jnp.dot(
            x_ref[...],
            w_ref[...],
            preferred_element_type=jnp.float32,
            precision=jax.lax.Precision.HIGHEST,
        )
        + b_ref[...]
    )


def _fold_affine(params):
    """Collapse the 5 Linear layers (PyTorch W:(out,in), b:(1,out)) into one."""
    (w_eff, b_eff) = params[0]
    for w, b in params[1:]:
        b_eff = b_eff @ w.T + b            # (1, out_new)
        w_eff = w @ w_eff                  # (out_new, 10)
    return w_eff, b_eff                    # (1, 10), (1, 1)


@partial(jax.jit, static_argnames=("max_tile_rows",))
def neural_network_forward(x, params, *, max_tile_rows=512):
    """x: (B, ...) flattening to (B, 10). Returns logits (B, 1)."""
    assert max_tile_rows % 8 == 0, "max_tile_rows must be a multiple of 8"
    batch = x.shape[0]
    x2d = x.reshape(batch, -1).astype(jnp.float32)       # Flatten(start_dim=1)
    assert x2d.shape[1] == _IN_FEATURES, "flattened feature dim must be 10"

    w_eff, b_eff = _fold_affine(params)

    # Tiling: each slab row holds 128 batch elements (1280 contiguous floats).
    # Pick tile_rows (multiple of 8 sublanes) so padding is minimal and the
    # grid has the fewest steps needed to stay under max_tile_rows per block.
    n_rows = _ceil_div(batch, _LANE)
    grid_steps = max(1, _ceil_div(n_rows, max_tile_rows))
    tile_rows = _ceil_div(_ceil_div(n_rows, grid_steps), 8) * 8
    rows_padded = grid_steps * tile_rows
    b_padded = rows_padded * _LANE

    # Pad only the batch dimension (zero rows -> sliced off at the end), then
    # a FREE row-major reshape to the lane-dense slab.  No transpose.
    if b_padded != batch:
        x2d = jnp.pad(x2d, ((0, b_padded - batch), (0, 0)))
    x_slab = x2d.reshape(rows_padded, _ROW_WIDTH)

    # Block-diagonal weight expansion: W_bd[10*j + k, j] = w_eff[0, k].
    eye = jnp.eye(_LANE, dtype=jnp.float32)                       # (128, 128)
    w_bd = (eye[:, None, :] * w_eff.reshape(1, _IN_FEATURES, 1)).reshape(
        _ROW_WIDTH, _LANE)                                        # (1280, 128)
    b_plane = jnp.broadcast_to(b_eff.reshape(1, 1), (1, _LANE))   # (1, 128)

    out = pl.pallas_call(
        _affine_mxu_kernel,
        out_shape=jax.ShapeDtypeStruct((rows_padded, _LANE), jnp.float32),
        grid=(grid_steps,),
        in_specs=[
            pl.BlockSpec((tile_rows, _ROW_WIDTH), lambda i: (i, 0)),
            pl.BlockSpec((_ROW_WIDTH, _LANE), lambda i: (0, 0)),   # resident
            pl.BlockSpec((1, _LANE), lambda i: (0, 0)),            # resident
        ],
        out_specs=pl.BlockSpec((tile_rows, _LANE), lambda i: (i, 0)),
        compiler_params=pltpu.CompilerParams(
            dimension_semantics=("parallel",)),
    )(x_slab, w_bd, b_plane)

    # Slab element [r, j] is batch index r*128 + j -> free reshape + slice.
    return out.reshape(b_padded, 1)[:batch]


def init_params(key):
    """Deterministic init mimicking nn.Linear default (uniform(-1/sqrt(in), 1/sqrt(in)))."""
    dims = [(10, 8), (8, 6), (6, 4), (4, 2), (2, 1)]
    params = []
    for (fan_in, fan_out) in dims:
        key, kw, kb = jax.random.split(key, 3)
        bound = 1.0 / jnp.sqrt(fan_in)
        w = jax.random.uniform(kw, (fan_out, fan_in), jnp.float32, -bound, bound)
        bvec = jax.random.uniform(kb, (1, fan_out), jnp.float32, -bound, bound)
        params.append((w, bvec))
    return params


def reference_forward(x, params):
    b = x.shape[0]
    h = x.reshape(b, -1).astype(jnp.float32)
    for (w, bias) in params:
        h = h @ w.T + bias
    return h


if __name__ == "__main__":
    key = jax.random.PRNGKey(0)
    key, kx = jax.random.split(key)

    # Input: batch=2, shape (2, 2, 5) -> flattens to (2, 10)
    x = jax.random.normal(kx, (2, 2, 5), jnp.float32)
    params = init_params(key)

    out = jax.block_until_ready(neural_network_forward(x, params))
    ref = reference_forward(x, params)
    assert out.shape == (2, 1), out.shape
    assert jnp.allclose(out, ref, atol=2e-5, rtol=2e-4), (out, ref)

    # Exercise the multi-tile grid path (batch padding + >1 grid step).
    key, kx2 = jax.random.split(key)
    x_big = jax.random.normal(kx2, (2000, 2, 5), jnp.float32)
    out_big = jax.block_until_ready(
        neural_network_forward(x_big, params, max_tile_rows=8))
    ref_big = reference_forward(x_big, params)
    assert out_big.shape == (2000, 1), out_big.shape
    assert jnp.allclose(out_big, ref_big, atol=2e-5, rtol=2e-4)

    print("KERNEL_OK")
</pallas_src>

<mosaic_0001>
module attributes {stable_mosaic.version = 11 : i64} {
  func.func @_affine_mxu_kernel(%arg0: i32, %arg1: memref<8x1280xf32, #tpu.memory_space<vmem>>, %arg2: memref<1280x128xf32, #tpu.memory_space<vmem>>, %arg3: memref<1x128xf32, #tpu.memory_space<vmem>>, %arg4: memref<8x128xf32, #tpu.memory_space<vmem>>) attributes {dimension_semantics = [#tpu.dimension_semantics<parallel>], iteration_bounds = array<i64: 1>, scalar_prefetch = 0 : i64, scratch_operands = 0 : i64, tpu.core_type = #tpu.core_type<tc>, window_params = [{transform_indices = @transform_0, window_bounds = array<i64: 8, 1280>}, {pipeline_mode = #tpu.pipeline_mode<synchronous>, transform_indices = @transform_1, window_bounds = array<i64: 1280, 128>}, {pipeline_mode = #tpu.pipeline_mode<synchronous>, transform_indices = @transform_2, window_bounds = array<i64: 1, 128>}, {transform_indices = @transform_3, window_bounds = array<i64: 8, 128>}]} {
    %c0 = arith.constant 0 : index
    %c0_0 = arith.constant 0 : index
    %0 = vector.load %arg1[%c0, %c0_0] : memref<8x1280xf32, #tpu.memory_space<vmem>>, vector<8x1280xf32>
    %c0_1 = arith.constant 0 : index
    %c0_2 = arith.constant 0 : index
    %1 = vector.load %arg2[%c0_1, %c0_2] : memref<1280x128xf32, #tpu.memory_space<vmem>>, vector<1280x128xf32>
    %cst = arith.constant dense<0.000000e+00> : vector<8x128xf32>
    %2 = tpu.matmul %0, %1, %cst {dimension_numbers = #tpu.dot_dimension_numbers<[1], [0], [0], [1], [0, 0, 1, 1], [], []>, precision = #tpu.contract_precision<fp32>} : vector<8x1280xf32>, vector<1280x128xf32>, vector<8x128xf32> -> vector<8x128xf32>
    %c0_3 = arith.constant 0 : index
    %c0_4 = arith.constant 0 : index
    %3 = vector.load %arg3[%c0_3, %c0_4] : memref<1x128xf32, #tpu.memory_space<vmem>>, vector<1x128xf32>
    %4 = vector.broadcast %3 : vector<1x128xf32> to vector<8x128xf32>
    %5 = arith.addf %2, %4 : vector<8x128xf32>
    %c0_5 = arith.constant 0 : index
    %c0_6 = arith.constant 0 : index
    %6 = vector.load %arg4[%c0_5, %c0_6] : memref<8x128xf32, #tpu.memory_space<vmem>>, vector<8x128xf32>
    tpu.vector_store %arg4[%c0_5, %c0_6], %5 {strides = array<i32>} : memref<8x128xf32, #tpu.memory_space<vmem>>, vector<8x128xf32>,
    return
  }
  func.func @transform_0(%arg0: i32) -> (i32, i32) {
    %c0_i32 = arith.constant 0 : i32
    %c0_i32_0 = arith.constant 0 : i32
    return %arg0, %c0_i32 : i32, i32
  }
  func.func @transform_1(%arg0: i32) -> (i32, i32) {
    %c0_i32 = arith.constant 0 : i32
    %c0_i32_0 = arith.constant 0 : i32
    %c0_i32_1 = arith.constant 0 : i32
    return %c0_i32, %c0_i32_0 : i32, i32
  }
  func.func @transform_2(%arg0: i32) -> (i32, i32) {
    %c0_i32 = arith.constant 0 : i32
    %c0_i32_0 = arith.constant 0 : i32
    %c0_i32_1 = arith.constant 0 : i32
    return %c0_i32, %c0_i32_0 : i32, i32
  }
  func.func @transform_3(%arg0: i32) -> (i32, i32) {
    %c0_i32 = arith.constant 0 : i32
    %c0_i32_0 = arith.constant 0 : i32
    return %arg0, %c0_i32 : i32, i32
  }
}

</mosaic_0001>

<bundles_post_ra>
// kernel: neural_network_forward.1
= control target key start
LH: loop header
LB: loop body
LE: loop exit
PB: predicated region body
PF: predicated region fallthrough
CT: control target
= control target key end

     0   :  { %s8998_s1 = inlined_call_operand.vmem [shape: f32[1280,128], index: 1, kind: input, shape index: {}]   ;;  %s8999_s0 = inlined_call_operand.vmem [shape: f32[8,1280], index: 0, kind: input, shape index: {}]   ;;  %s9000_s2 = inlined_call_operand.vmem [shape: f32[1,128], index: 2, kind: input, shape index: {}]   ;;  %s9001_s3 = inlined_call_operand.vmem [shape: f32[8,128], index: 3, kind: output, shape index: {}]  }
   0x1   :  { %v55_v0 = vld [vmem:[%s8998_s1 + $0xf8] sm:$0xff]  ;;  %v54_v2 = vld [vmem:[%s8998_s1 + $0xf0] sm:$0xff]  ;;  %v53_v7 = vld [vmem:[%s8998_s1 + $0xe8] sm:$0xff] }
   0x2   :  { %v39_v1 = vld [vmem:[%s8998_s1 + $0x78] sm:$0xff]  ;;  %v5586_v3 = vand.u32 4294901760, %v55_v0  ;;  %v5590_v5 = vand.u32 4294901760, %v54_v2  ;;  %v38_v6 = vld [vmem:[%s8998_s1 + $0x70] sm:$0xff]  ;;  %v37_v8 = vld [vmem:[%s8998_s1 + $0x68] sm:$0xff]  ;;  %v5603_v10 = vand.u32 4294901760, %v53_v7 }
   0x3   :  { %v5588_v4 = vand.u32 4294901760, %v39_v1  ;;  %v5601_v9 = vand.u32 4294901760, %v38_v6  ;;  %v5605_v11 = vand.u32 4294901760, %v37_v8  ;;  %v52_v12 = vld [vmem:[%s8998_s1 + $0xe0] sm:$0xff]  ;;  %v51_v14 = vld [vmem:[%s8998_s1 + $0xd8] sm:$0xff]  ;;  %v5634_v20 = vld [vmem:[%s8998_s1 + $0xd0] sm:$0xff] }
   0x4   :  { %v36_v13 = vld [vmem:[%s8998_s1 + $0x60] sm:$0xff]  ;;  %4507 = vmatprep.subr.mxu0 %v5586_v3  ;;  %v5617_v15 = vand.u32 4294901760, %v52_v12  ;;  %v5621_v17 = vand.u32 4294901760, %v51_v14  ;;  %v5624_v18 = vsub.f32 %v55_v0, %v5586_v3  ;;  %v5629_v19 = vld [vmem:[%s8998_s1 + $0x58] sm:$0xff]  ;;  %v5639_v21 = vld [vmem:[%s8998_s1 + $0x50] sm:$0xff]  ;;  %v5649_v24 = vand.u32 4294901760, %v5634_v20 }
   0x5   :  { %v5619_v16 = vand.u32 4294901760, %v36_v13  ;;  %4508 = vmatpush3.msra.mxu0 %v5588_v4  ;;  %v5643_v22 = vand.u32 4294901760, %v5629_v19  ;;  %v5646_v23 = vsub.f32 %v39_v1, %v5588_v4  ;;  %v5652_v25 = vsub.f32 %v54_v2, %v5590_v5  ;;  %v5657_v26 = vld [vmem:[%s8998_s1 + $0xc8] sm:$0xff]  ;;  %v5667_v28 = vld [vmem:[%s8998_s1 + $0xc0] sm:$0xff]  ;;  %v5719_v46 = vld [vmem:[%s8998_s1 + $0xb8] sm:$0xff] }
   0x6   :  { %v5662_v27 = vld [vmem:[%s8998_s1 + $0x48] sm:$0xff]  ;;  %4509 = vmatprep.subr.mxu0 %v5590_v5  ;;  %v9015_v29 = vand.u32 4294901760, %v5624_v18  ;;  %v5672_v30 = vand.u32 4294901760, %v5639_v21  ;;  %v5675_v31 = vsub.f32 %v38_v6, %v5601_v9  ;;  %v5678_v32 = vand.u32 4294901760, %v5657_v26  ;;  %v5692_v37 = vld [vmem:[%s8998_s1 + $0x40] sm:$0xff]  ;;  %v5732_v51 = vld [vmem:[%s8998_s1 + $0x38] sm:$0xff] }
   0x7   :  { %4510 = vmatpush3.msra.mxu0 %v5601_v9  ;;  %v9014_v33 = vand.u32 4294901760, %v5646_v23  ;;  %v9012_v34 = vand.u32 4294901760, %v5652_v25  ;;  %v5684_v35 = vsub.f32 %v53_v7, %v5603_v10  ;;  %v5687_v36 = vand.u32 4294901760, %v5662_v27  ;;  %v5742_v56 = vld [vmem:[%s8998_s1 + $0xb0] sm:$0xff]  ;;  %v5772_v2 = vld [vmem:[%s8998_s1 + $0xa8] sm:$0xff] }
   0x8   :  { %9339 = vst [vmem:[#allocation2_spill] sm:$0xff] %v5672_v30  ;;  %9340 = vst [vmem:[#allocation3_spill] sm:$0xff] %v5678_v32  ;;  %4511 = vmatprep.subr.mxu0 %v5603_v10  ;;  %v419_v38 = vsub.f32 %v5624_v18, %v9015_v29  ;;  %v9011_v39 = vand.u32 4294901760, %v5675_v31  ;;  %v5700_v40 = vsub.f32 %v37_v8, %v5605_v11  ;;  %v5703_v41 = vand.u32 4294901760, %v5667_v28  ;;  %v5757_v61 = vld [vmem:[%s8998_s1 + $0x30] sm:$0xff] }
   0x9   :  { %9341 = vst [vmem:[#allocation4_spill] sm:$0xff] %v5687_v36  ;;  %4512 = vmatpush3.msra.mxu0 %v5605_v11  ;;  %v307_v42 = vsub.f32 %v5646_v23, %v9014_v33  ;;  %v426_v43 = vsub.f32 %v5652_v25, %v9012_v34  ;;  %v9009_v44 = vand.u32 4294901760, %v5684_v35  ;;  %v5714_v45 = vsub.f32 %v52_v12, %v5617_v15  ;;  %v5908_v33 = vld [vmem:[%s8998_s1 + $0x88] sm:$0xff] }
   0xa   :  { %9342 = vst [vmem:[#allocation5_spill] sm:$0xff] %v5703_v41  ;;  %4513 = vmatprep.subr.mxu0 %v5617_v15  ;;  %v420_v47 = vand.u32 4294901760, %v419_v38  ;;  %v314_v48 = vsub.f32 %v5675_v31, %v9011_v39  ;;  %v9007_v49 = vand.u32 4294901760, %v5700_v40  ;;  %v5727_v50 = vand.u32 4294901760, %v5692_v37 }
   0xb   :  { %4514 = vmatpush3.msra.mxu0 %v5619_v16  ;;  %v308_v52 = vand.u32 4294901760, %v307_v42  ;;  %v427_v53 = vand.u32 4294901760, %v426_v43  ;;  %v433_v54 = vsub.f32 %v5684_v35, %v9009_v44  ;;  %v9006_v55 = vand.u32 4294901760, %v5714_v45  ;;  %v5881_v44 = vld [vmem:[%s8998_s1 + $0x90] sm:$0xff] }
   0xc   :  { %9343 = vst [vmem:[#allocation6_spill] sm:$0xff] %v5727_v50  ;;  %4515 = vmatprep.subr.mxu0 %v5621_v17  ;;  %4542 = vmatprep.subr.mxu1 %v420_v47  ;;  %v315_v57 = vand.u32 4294901760, %v314_v48  ;;  %v321_v58 = vsub.f32 %v5700_v40, %v9007_v49  ;;  %v5749_v59 = vsub.f32 %v36_v13, %v5619_v16  ;;  %v5752_v60 = vand.u32 4294901760, %v5719_v46  ;;  %v5786_v13 = vld [vmem:[%s8998_s1 + $0x28] sm:$0xff]  ;;  %v5865_v49 = vld [vmem:[%s8998_s1 + $0x18] sm:$0xff] }
   0xd   :  { %4516 = vmatpush3.msra.mxu0 %v5643_v22  ;;  %4543 = vmatpush3.msra.mxu1 %v308_v52  ;;  %v434_v62 = vand.u32 4294901760, %v433_v54  ;;  %v440_v63 = vsub.f32 %v5714_v45, %v9006_v55  ;;  %v5764_v0 = vsub.f32 %v51_v14, %v5621_v17  ;;  %v5767_v1 = vand.u32 4294901760, %v5732_v51 }
   0xe   :  { %9344 = vst [vmem:[#allocation7_spill] sm:$0xff] %v5752_v60  ;;  %4517 = vmatprep.subr.mxu0 %v5649_v24  ;;  %4544 = vmatprep.subr.mxu1 %v427_v53  ;;  %v322_v6 = vand.u32 4294901760, %v321_v58  ;;  %v9004_v7 = vand.u32 4294901760, %v5749_v59  ;;  %v5778_v8 = vsub.f32 %v5629_v19, %v5643_v22  ;;  %v5781_v12 = vand.u32 4294901760, %v5742_v56 }
   0xf   :  { %9345 = vst [vmem:[#allocation8_spill] sm:$0xff] %v5767_v1  ;;  %4518 = vmatpush3.msra.mxu0 %v5672_v30  ;;  %4545 = vmatpush3.msra.mxu1 %v315_v57  ;;  %v441_v14 = vand.u32 4294901760, %v440_v63  ;;  %v9002_v38 = vand.u32 4294901760, %v5764_v0  ;;  %v5792_v42 = vsub.f32 %v5634_v20, %v5649_v24  ;;  %v5795_v19 = vand.u32 4294901760, %v5757_v61  ;;  %v5812_v20 = vld [vmem:[%s8998_s1 + $0xa0] sm:$0xff] }
  0x10   :  { %9346 = vst [vmem:[#allocation9_spill] sm:$0xff] %v5781_v12  ;;  %4519 = vmatprep.subr.mxu0 %v5678_v32  ;;  %4546 = vmatprep.subr.mxu1 %v434_v62  ;;  %v328_v43 = vsub.f32 %v5749_v59, %v9004_v7  ;;  %v9003_v47 = vand.u32 4294901760, %v5778_v8  ;;  %v5804_v48 = vsub.f32 %v5639_v21, %v5672_v30  ;;  %v5807_v52 = vand.u32 4294901760, %v5772_v2 }
  0x11   :  { %9347 = vst [vmem:[#allocation10_spill] sm:$0xff] %v5795_v19  ;;  %4520 = vmatpush3.msra.mxu0 %v5687_v36  ;;  %4547 = vmatpush3.msra.mxu1 %v322_v6  ;;  %v447_v53 = vsub.f32 %v5764_v0, %v9002_v38  ;;  %v9005_v54 = vand.u32 4294901760, %v5792_v42  ;;  %v5821_v21 = vsub.f32 %v5657_v26, %v5678_v32  ;;  %v5824_v57 = vand.u32 4294901760, %v5786_v13  ;;  %v5838_v26 = vld [vmem:[%s8998_s1 + $0x20] sm:$0xff] }
  0x12   :  { %9348 = vst [vmem:[#allocation11_spill] sm:$0xff] %v5807_v52  ;;  %4521 = vmatprep.subr.mxu0 %v5703_v41  ;;  %4548 = vmatprep.subr.mxu1 %v441_v14  ;;  %v329_v58 = vand.u32 4294901760, %v328_v43  ;;  %v335_v62 = vsub.f32 %v5778_v8, %v9003_v47  ;;  %v9008_v63 = vand.u32 4294901760, %v5804_v48  ;;  %v5833_v6 = vsub.f32 %v5662_v27, %v5687_v36  ;;  %v5851_v27 = vld [vmem:[%s8998_s1 + $0x98] sm:$0xff] }
  0x13   :  { %9349 = vst [vmem:[#allocation12_spill] sm:$0xff] %v5824_v57  ;;  %4522 = vmatpush3.msra.mxu0 %v5727_v50  ;;  %v448_v38 = vand.u32 4294901760, %v447_v53  ;;  %v454_v14 = vsub.f32 %v5792_v42, %v9005_v54  ;;  %v9010_v43 = vand.u32 4294901760, %v5821_v21  ;;  %v5846_v47 = vand.u32 4294901760, %v5812_v20 }
  0x14   :  { %4549 = vmatpush3.msra.mxu1 %v329_v58  ;;  %4523 = vmatprep.subr.mxu0 %v5752_v60  ;;  %v336_v7 = vand.u32 4294901760, %v335_v62  ;;  %v342_v53 = vsub.f32 %v5804_v48, %v9008_v63  ;;  %v9013_v54 = vand.u32 4294901760, %v5833_v6  ;;  %v5860_v55 = vsub.f32 %v5667_v28, %v5703_v41  ;;  %v14_v41 = vld [vmem:[%s8999_s0] sm:$0xff] }
  0x15   :  { %9350 = vst [vmem:[#allocation13_spill] sm:$0xff] %v5846_v47  ;;  %4550 = vmatprep.subr.mxu1 %v448_v38  ;;  %4524 = vmatpush3.msra.mxu0 %v5767_v1  ;;  %v455_v58 = vand.u32 4294901760, %v454_v14  ;;  %v461_v62 = vsub.f32 %v5821_v21, %v9010_v43  ;;  %v5872_v63 = vand.u32 4294901760, %v5838_v26  ;;  %v5876_v28 = vsub.f32 %v5692_v37, %v5727_v50  ;;  %v5894_v37 = vld [vmem:[%s8998_s1 + $0x10] sm:$0xff] }
  0x16   :  { %4551 = vmatpush3.msra.mxu1 %v336_v7  ;;  %4525 = vmatprep.subr.mxu0 %v5781_v12  ;;  %v343_v38 = vand.u32 4294901760, %v342_v53  ;;  %v349_v14 = vsub.f32 %v5833_v6, %v9013_v54  ;;  %v9018_v43 = vand.u32 4294901760, %v5860_v55  ;;  %v5889_v39 = vand.u32 4294901760, %v5851_v27 }
  0x17   :  { %9351 = vst [vmem:[#allocation14_spill] sm:$0xff] %v5872_v63  ;;  %4552 = vmatprep.subr.mxu1 %v455_v58  ;;  %4526 = vmatpush3.msra.mxu0 %v5795_v19  ;;  %v462_v7 = vand.u32 4294901760, %v461_v62  ;;  %v9019_v53 = vand.u32 4294901760, %v5876_v28  ;;  %v5900_v34 = vsub.f32 %v5719_v46, %v5752_v60  ;;  %v5903_v54 = vand.u32 4294901760, %v5865_v49 }
  0x18   :  { %4553 = vmatpush3.msra.mxu1 %v343_v38  ;;  %4527 = vmatprep.subr.mxu0 %v5807_v52  ;;  %v350_v58 = vand.u32 4294901760, %v349_v14  ;;  %v468_v62 = vsub.f32 %v5860_v55, %v9018_v43  ;;  %v5916_v46 = vsub.f32 %v5732_v51, %v5767_v1  ;;  %v5919_v29 = vand.u32 4294901760, %v5881_v44  ;;  %v5936_v51 = vld [vmem:[%s8998_s1 + $0x8] sm:$0xff] }
  0x19   :  { %9352 = vst [vmem:[#allocation15_spill] sm:$0xff] %v5903_v54  ;;  %4554 = vmatprep.subr.mxu1 %v462_v7  ;;  %4528 = vmatpush3.msra.mxu0 %v5824_v57  ;;  %v356_v38 = vsub.f32 %v5876_v28, %v9019_v53  ;;  %v5928_v60 = vsub.f32 %v5742_v56, %v5781_v12  ;;  %v5931_v43 = vand.u32 4294901760, %v5894_v37  ;;  %v5945_v56 = vand.u32 4294901760, %v5908_v33  ;;  %v5950_v12 = vld [vmem:[%s8998_s1 + $0x80] sm:$0xff] }
  0x1a   :  { %9353 = vst [vmem:[#allocation16_spill] sm:$0xff] %v5919_v29  ;;  %4555 = vmatpush3.msra.mxu1 %v350_v58  ;;  %4529 = vmatprep.subr.mxu0 %v5846_v47  ;;  %v469_v7 = vand.u32 4294901760, %v468_v62  ;;  %v5942_v14 = vsub.f32 %v5757_v61, %v5795_v19  ;;  %v9357_v1 = vand.u32 4294901760, %v5900_v34  ;;  %v5959_v61 = vsub.f32 %v5772_v2, %v5807_v52  ;;  %v5976_v2 = vld [vmem:[%s8998_s1] sm:$0xff] }
  0x1b   :  { %9354 = vst [vmem:[#allocation17_spill] sm:$0xff] %v5931_v43  ;;  %9356 = vst [vmem:[#allocation19_spill] sm:$0xff] %v5945_v56  ;;  %4530 = vmatpush3.msra.mxu0 %v5872_v63  ;;  %v357_v58 = vand.u32 4294901760, %v356_v38  ;;  %v9036_v53 = vand.u32 4294901760, %v5928_v60  ;;  %v9359_v19 = vand.u32 4294901760, %v5916_v46  ;;  %v5967_v38 = vand.u32 4294901760, %v5936_v51 }
  0x1c   :  { %9355 = vst [vmem:[#allocation18_spill] sm:$0xff] %v5942_v14  ;;  %v475_v62 = vsub.f32 %v5900_v34, %v9357_v1  ;;  %9358 = vst [vmem:[#allocation20_spill] sm:$0xff] %v5959_v61  ;;  %4556 = vmatprep.subr.mxu1 %v469_v7  ;;  %4531 = vmatprep.subr.mxu0 %v5889_v39  ;;  %v5971_v1 = vsub.f32 %v5786_v13, %v5824_v57  ;;  %v5984_v52 = vand.u32 4294901760, %v5950_v12  ;;  %v15_v13 = vld [vmem:[%s8999_s0 + $0x8] sm:$0xff] }
  0x1d   :  { %v363_v50 = vsub.f32 %v5916_v46, %v9359_v19  ;;  %4557 = vmatpush3.msra.mxu1 %v357_v58  ;;  %4532 = vmatpush3.msra.mxu0 %v5903_v54  ;;  %v482_v19 = vsub.f32 %v5928_v60, %v9036_v53  ;;  %v9360_v58 = vand.u32 4294901760, %v5942_v14  ;;  %v5996_v53 = vsub.f32 %v5812_v20, %v5846_v47 }
  0x1e   :  { %v476_v7 = vand.u32 4294901760, %v475_v62  ;;  %4533 = vmatprep.subr.mxu0 %v5919_v29  ;;  %v6010_v36 = vsub.f32 %v5838_v26, %v5872_v63  ;;  %v6025_v26 = vand.u32 4294901760, %v14_v41 }
  0x1f   :  { %v364_v57 = vand.u32 4294901760, %v363_v50  ;;  %v370_v62 = vsub.f32 %v5942_v14, %v9360_v58  ;;  %v483_v32 = vand.u32 4294901760, %v482_v19  ;;  %4534 = vmatpush3.msra.mxu0 %v5931_v43  ;;  %v9361_v50 = vand.u32 4294901760, %v5959_v61 }
  0x20   :  { %4558 = vmatprep.subr.mxu1 %v476_v7  ;;  %v6006_v58 = vand.u32 4294901760, %v5976_v2  ;;  %4535 = vmatprep.subr.mxu0 %v5945_v56  ;;  %v9362_v7 = vand.u32 4294901760, %v5971_v1  ;;  %v9047_v47 = vand.u32 4294901760, %v5996_v53  ;;  %v6017_v14 = vand.u32 4294901760, %v15_v13  ;;  %9364 = vst [vmem:[#allocation22_spill] sm:$0xff] %v6025_v26 }
  0x21   :  { %v489_v30 = vsub.f32 %v5959_v61, %v9361_v50  ;;  %4559 = vmatpush3.msra.mxu1 %v364_v57  ;;  %v371_v20 = vand.u32 4294901760, %v370_v62  ;;  %4536 = vmatpush3.msra.mxu0 %v5967_v38  ;;  %v9048_v61 = vand.u32 4294901760, %v6010_v36  ;;  %v6023_v57 = vsub.f32 %v5851_v27, %v5889_v39 }
  0x22   :  { %v377_v19 = vsub.f32 %v5971_v1, %v9362_v7  ;;  %9363 = vst [vmem:[#allocation21_spill] sm:$0xff] %v6017_v14  ;;  %4560 = vmatprep.subr.mxu1 %v483_v32  ;;  %4537 = vmatprep.subr.mxu0 %v5984_v52  ;;  %v496_v7 = vsub.f32 %v5996_v53, %v9047_v47 }
  0x23   :  { %v490_v50 = vand.u32 4294901760, %v489_v30  ;;  %4561 = vmatpush3.msra.mxu1 %v371_v20  ;;  %v6032_v30 = vsub.f32 %v15_v13, %v6017_v14  ;;  %v6036_v32 = vsub.f32 %v5865_v49, %v5903_v54  ;;  %4538 = vmatpush3.msra.mxu0 %v6006_v58  ;;  %v384_v27 = vsub.f32 %v6010_v36, %v9048_v61 }
  0x24   :  { %v378_v62 = vand.u32 4294901760, %v377_v19  ;;  %v6044_v19 = vsub.f32 %v14_v41, %v6025_v26  ;;  %v6048_v13 = vsub.f32 %v5881_v44, %v5919_v29  ;;  %v497_v47 = vand.u32 4294901760, %v496_v7  ;;  %4577 = vmatprep.subr.mxu0 %v5624_v18  ;;  %528 = vmatprep.mubr.f32.mxu1 %v6017_v14 }
  0x25   :  { %4562 = vmatprep.subr.mxu1 %v490_v50  ;;  %v9053_v49 = vand.u32 4294901760, %v6032_v30  ;;  %v9056_v50 = vand.u32 4294901760, %v6036_v32  ;;  %v6055_v61 = vsub.f32 %v5894_v37, %v5931_v43  ;;  %v385_v20 = vand.u32 4294901760, %v384_v27 }
  0x26   :  { %4563 = vmatpush3.msra.mxu1 %v378_v62  ;;  %v9365_v41 = vand.u32 4294901760, %v6023_v57  ;;  %v9366_v62 = vand.u32 4294901760, %v6044_v19  ;;  %v9367_v14 = vand.u32 4294901760, %v6048_v13  ;;  %v6082_v43 = vsub.f32 %v5936_v51, %v5967_v38 }
  0x27   :  { %4564 = vmatprep.subr.mxu1 %v497_v47  ;;  %v290_v7 = vsub.f32 %v6032_v30, %v9053_v49  ;;  %v391_v37 = vsub.f32 %v6036_v32, %v9056_v50  ;;  %v9369_v29 = vand.u32 4294901760, %v6055_v61 }
  0x28   :  { %v503_v54 = vsub.f32 %v6023_v57, %v9365_v41  ;;  %v6072_v41 = vsub.f32 %v5908_v33, %v5945_v56  ;;  %4565 = vmatpush3.msra.mxu1 %v385_v20  ;;  %v296_v47 = vsub.f32 %v6044_v19, %v9366_v62  ;;  %v510_v49 = vsub.f32 %v6048_v13, %v9367_v14 }
  0x29   :  { %9368 = vst [vmem:[#allocation23_spill] sm:$0xff] %v6082_v43  ;;  %v291_v50 = vand.u32 4294901760, %v290_v7  ;;  %v392_v27 = vand.u32 4294901760, %v391_v37  ;;  %v398_v33 = vsub.f32 %v6055_v61, %v9369_v29  ;;  %v9063_v62 = vand.u32 4294901760, %v6082_v43 }
  0x2a   :  { %v504_v44 = vand.u32 4294901760, %v503_v54  ;;  %v9064_v54 = vand.u32 4294901760, %v6072_v41  ;;  %v297_v20 = vand.u32 4294901760, %v296_v47  ;;  %v511_v56 = vand.u32 4294901760, %v510_v49 }
  0x2b   :  { %v6091_v14 = vsub.f32 %v5950_v12, %v5984_v52  ;;  %292 = vmatprep.mubr.f32.mxu0 %v291_v50  ;;  %v399_v51 = vand.u32 4294901760, %v398_v33  ;;  %v6098_v29 = vsub.f32 %v5976_v2, %v6006_v58  ;;  %v405_v49 = vsub.f32 %v6082_v43, %v9063_v62  ;;  %v9372_v33 = vld [vmem:[#allocation18_spill] sm:$0xff]  ;;  %v9385_v62 = vld [vmem:[#allocation13_spill] sm:$0xff] }
  0x2c   :  { %4566 = vmatprep.subr.mxu1 %v504_v44  ;;  %v517_v7 = vsub.f32 %v6072_v41, %v9064_v54  ;;  %298 = vmatmul.mubr.f32.vlgmr.msra.gmra.mxu0 %v297_v20  ;;  %v9373_v20 = vld [vmem:[#allocation2_spill] sm:$0xff]  ;;  %v9386_v54 = vand.u32 4294901760, %v5624_v18  ;;  %v9394_v18 = vand.u32 4294901760, %v5684_v35 }
  0x2d   :  { %9370 = vst [vmem:[#allocation24_spill] sm:$0xff] %v6091_v14  ;;  %4567 = vmatpush3.msra.mxu1 %v392_v27  ;;  %9371 = vst [vmem:[#allocation25_spill] sm:$0xff] %v6098_v29  ;;  %v9062_v12 = vand.u32 4294901760, %v6091_v14  ;;  %4578 = vmatpush3.msra.mxu0 %v5646_v23  ;;  %v9061_v44 = vand.u32 4294901760, %v6098_v29  ;;  %v406_v37 = vand.u32 4294901760, %v405_v49  ;;  %v9376_v49 = vld [vmem:[#allocation4_spill] sm:$0xff] }
  0x2e   :  { %4568 = vmatprep.subr.mxu1 %v511_v56  ;;  %v518_v50 = vand.u32 4294901760, %v517_v7  ;;  %4579 = vmatprep.subr.mxu0 %v5652_v25  ;;  %v9375_v7 = vld [vmem:[#allocation3_spill] sm:$0xff] }
  0x2f   :  { %4569 = vmatpush3.msra.mxu1 %v399_v51  ;;  %v524_v2 = vsub.f32 %v6091_v14, %v9062_v12  ;;  %665 = vmatprep.mubr.f32.mxu0 %v6032_v30  ;;  %v412_v56 = vsub.f32 %v6098_v29, %v9061_v44  ;;  %v9374_v51 = vld [vmem:[#allocation20_spill] sm:$0xff]  ;;  %v9383_v44 = vld [vmem:[#allocation11_spill] sm:$0xff] }
  0x30   :  { %4580 = vmatpush3.msra.mxu0 %v5675_v31  ;;  %4570 = vmatprep.subr.mxu1 %v518_v50  ;;  %v9377_v50 = vld [vmem:[#allocation5_spill] sm:$0xff]  ;;  %v9384_v12 = vld [vmem:[#allocation12_spill] sm:$0xff] }
  0x31   :  { %4581 = vmatprep.subr.mxu0 %v5684_v35  ;;  %4571 = vmatpush3.msra.mxu1 %v406_v37  ;;  %v525_v27 = vand.u32 4294901760, %v524_v2  ;;  %v413_v47 = vand.u32 4294901760, %v412_v56  ;;  %v9378_v37 = vld [vmem:[#allocation6_spill] sm:$0xff]  ;;  %v9379_v2 = vld [vmem:[#allocation7_spill] sm:$0xff]  ;;  %v9380_v56 = vld [vmem:[#allocation8_spill] sm:$0xff]  ;;  %v9399_v35 = vand.u32 4294901760, %v6044_v19 }
  0x32   :  { %4582 = vmatpush3.msra.mxu0 %v5700_v40 }
  0x33   :  { %4572 = vmatprep.subr.mxu1 %v525_v27  ;;  %4583 = vmatprep.subr.mxu0 %v5714_v45  ;;  %v9381_v27 = vld [vmem:[#allocation9_spill] sm:$0xff] }
  0x34   :  { %4573 = vmatpush3.msra.mxu1 %v413_v47  ;;  %4584 = vmatpush3.msra.mxu0 %v5749_v59  ;;  %v9382_v47 = vld [vmem:[#allocation10_spill] sm:$0xff] }
  0x35   :  { %530 = vmatmul.mubr.f32.vlgmr.msra.gmra.mxu1 %v6025_v26  ;;  %4585 = vmatprep.subr.mxu0 %v5764_v0  ;;  %v9387_v26 = vld [vmem:[#allocation15_spill] sm:$0xff] }
  0x36   :  { %4612 = vmatprep.subr.mxu1 %v5586_v3  ;;  %4586 = vmatpush3.msra.mxu0 %v5778_v8 }
  0x37   :  { %4613 = vmatpush3.msra.mxu1 %v5588_v4  ;;  %4587 = vmatprep.subr.mxu0 %v5792_v42 }
  0x38   :  { %4614 = vmatprep.subr.mxu1 %v5590_v5  ;;  %4588 = vmatpush3.msra.mxu0 %v5804_v48 }
  0x39   :  { %4615 = vmatpush3.msra.mxu1 %v5601_v9  ;;  %4589 = vmatprep.subr.mxu0 %v5821_v21 }
  0x3a   :  { %4616 = vmatprep.subr.mxu1 %v5603_v10  ;;  %4590 = vmatpush3.msra.mxu0 %v5833_v6 }
  0x3b   :  { %4617 = vmatpush3.msra.mxu1 %v5605_v11  ;;  %4591 = vmatprep.subr.mxu0 %v5860_v55 }
  0x3c   :  { %4618 = vmatprep.subr.mxu1 %v5617_v15  ;;  %4592 = vmatpush3.msra.mxu0 %v5876_v28 }
  0x3d   :  { %4619 = vmatpush3.msra.mxu1 %v5619_v16  ;;  %4593 = vmatprep.subr.mxu0 %v5900_v34 }
  0x3e   :  { %4620 = vmatprep.subr.mxu1 %v5621_v17  ;;  %4594 = vmatpush3.msra.mxu0 %v5916_v46 }
  0x3f   :  { %4621 = vmatpush3.msra.mxu1 %v5643_v22  ;;  %4595 = vmatprep.subr.mxu0 %v5928_v60 }
  0x40   :  { %4622 = vmatprep.subr.mxu1 %v5649_v24  ;;  %4596 = vmatpush3.msra.mxu0 %v9372_v33 }
  0x41   :  { %4623 = vmatpush3.msra.mxu1 %v9373_v20  ;;  %4597 = vmatprep.subr.mxu0 %v9374_v51 }
  0x42   :  { %4624 = vmatprep.subr.mxu1 %v9375_v7  ;;  %4598 = vmatpush3.msra.mxu0 %v5971_v1 }
  0x43   :  { %4625 = vmatpush3.msra.mxu1 %v9376_v49  ;;  %4599 = vmatprep.subr.mxu0 %v5996_v53 }
  0x44   :  { %4626 = vmatprep.subr.mxu1 %v9377_v50  ;;  %4600 = vmatpush3.msra.mxu0 %v6010_v36 }
  0x45   :  { %4627 = vmatpush3.msra.mxu1 %v9378_v37  ;;  %4601 = vmatprep.subr.mxu0 %v6023_v57 }
  0x46   :  { %4628 = vmatprep.subr.mxu1 %v9379_v2  ;;  %4602 = vmatpush3.msra.mxu0 %v6036_v32 }
  0x47   :  { %4629 = vmatpush3.msra.mxu1 %v9380_v56  ;;  %4603 = vmatprep.subr.mxu0 %v6048_v13 }
  0x48   :  { %4630 = vmatprep.subr.mxu1 %v9381_v27  ;;  %4604 = vmatpush3.msra.mxu0 %v6055_v61 }
  0x49   :  { %4631 = vmatpush3.msra.mxu1 %v9382_v47  ;;  %4605 = vmatprep.subr.mxu0 %v6072_v41 }
  0x4a   :  { %4632 = vmatprep.subr.mxu1 %v9383_v44  ;;  %4606 = vmatpush3.msra.mxu0 %v6082_v43  ;;  %v9388_v43 = vand.u32 4294901760, %v5646_v23  ;;  %v9395_v23 = vand.u32 4294901760, %v5700_v40  ;;  %v9401_v40 = vand.u32 4294901760, %v5778_v8  ;;  %v9407_v8 = vand.u32 4294901760, %v5876_v28 }
  0x4b   :  { %4633 = vmatpush3.msra.mxu1 %v9384_v12  ;;  %4607 = vmatprep.subr.mxu0 %v6091_v14  ;;  %v9389_v12 = vld [vmem:[#allocation16_spill] sm:$0xff]  ;;  %v9393_v14 = vld [vmem:[#allocation19_spill] sm:$0xff] }
  0x4c   :  { %4634 = vmatprep.subr.mxu1 %v9385_v62  ;;  %4608 = vmatpush3.msra.mxu0 %v6098_v29  ;;  %v9390_v62 = vand.u32 4294901760, %v5652_v25  ;;  %v9391_v29 = vld [vmem:[#allocation17_spill] sm:$0xff]  ;;  %v9396_v25 = vand.u32 4294901760, %v5714_v45  ;;  %v9402_v45 = vand.u32 4294901760, %v5792_v42 }
  0x4d   :  { %4635 = vmatpush3.msra.mxu1 %v5872_v63  ;;  %668 = vmatmul.mubr.f32.vlgmr.msra.gmra.mxu0 %v6044_v19  ;;  %v9392_v63 = vand.u32 4294901760, %v5675_v31  ;;  %v9397_v31 = vand.u32 4294901760, %v6032_v30  ;;  %v9413_v30 = vand.u32 4294901760, %v9374_v51 }
  0x4e   :  { %4636 = vmatprep.subr.mxu1 %v5889_v39  ;;  %4647 = vmatprep.subr.mxu0 %v9386_v54  ;;  %v9415_v54 = vand.u32 4294901760, %v5971_v1 }
  0x4f   :  { %4637 = vmatpush3.msra.mxu1 %v9387_v26  ;;  %4648 = vmatpush3.msra.mxu0 %v9388_v43  ;;  %v9400_v43 = vand.u32 4294901760, %v5764_v0  ;;  %v9404_v0 = vand.u32 4294901760, %v5821_v21  ;;  %v9409_v21 = vand.u32 4294901760, %v5916_v46 }
  0x50   :  { %4638 = vmatprep.subr.mxu1 %v9389_v12  ;;  %4649 = vmatprep.subr.mxu0 %v9390_v62 }
  0x51   :  { %4639 = vmatpush3.msra.mxu1 %v9391_v29  ;;  %4650 = vmatpush3.msra.mxu0 %v9392_v63  ;;  %v9398_v63 = vand.u32 4294901760, %v5749_v59  ;;  %v9403_v59 = vand.u32 4294901760, %v5804_v48  ;;  %v69_v48 = vld [vmem:[%s8998_s1 + $0x168] sm:$0xff] }
  0x52   :  { %4640 = vmatprep.subr.mxu1 %v9393_v14  ;;  %4651 = vmatprep.subr.mxu0 %v9394_v18  ;;  %v6259_v46 = vand.u32 4294901760, %v69_v48  ;;  %v9419_v18 = vand.u32 4294901760, %v6023_v57 }
  0x53   :  { %4641 = vmatpush3.msra.mxu1 %v5967_v38  ;;  %4652 = vmatpush3.msra.mxu0 %v9395_v23  ;;  %v66_v23 = vld [vmem:[%s8998_s1 + $0x150] sm:$0xff] }
  0x54   :  { %4642 = vmatprep.subr.mxu1 %v5984_v52  ;;  %4653 = vmatprep.subr.mxu0 %v9396_v25  ;;  %9412 = vst [vmem:[#allocation18_spill] sm:$0xff] %v6259_v46  ;;  %v6293_v1 = vsub.f32 %v69_v48, %v6259_v46  ;;  %v9434_v48 = vld [vmem:[#allocation13_spill] sm:$0xff] }
  0x55   :  { %4643 = vmatpush3.msra.mxu1 %v6006_v58  ;;  %772 = vmatprep.mubr.f32.mxu1 %v9397_v31  ;;  %v9420_v31 = vand.u32 4294901760, %v6036_v32 }
  0x56   :  { %4654 = vmatpush3.msra.mxu0 %v9398_v63  ;;  %776 = vmatmul.mubr.f32.vlgmr.msra.gmra.mxu1 %v9399_v35  ;;  %v9422_v35 = vand.u32 4294901760, %v6048_v13  ;;  %v65_v13 = vld [vmem:[%s8998_s1 + $0x148] sm:$0xff] }
  0x57   :  { %4655 = vmatprep.subr.mxu0 %v9400_v43  ;;  %4682 = vmatprep.subr.mxu1 %v5586_v3  ;;  %v9405_v3 = vand.u32 4294901760, %v5833_v6  ;;  %v9411_v6 = vand.u32 4294901760, %v9372_v33  ;;  %v9416_v33 = vand.u32 4294901760, %v5996_v53  ;;  %v83_v53 = vld [vmem:[%s8998_s1 + $0x1d8] sm:$0xff] }
  0x58   :  { %4656 = vmatpush3.msra.mxu0 %v9401_v40  ;;  %4683 = vmatpush3.msra.mxu1 %v5588_v4  ;;  %v87_v4 = vld [vmem:[%s8998_s1 + $0x1f8] sm:$0xff]  ;;  %v6330_v32 = vand.u32 4294901760, %v83_v53 }
  0x59   :  { %4657 = vmatprep.subr.mxu0 %v9402_v45  ;;  %4684 = vmatprep.subr.mxu1 %v5590_v5  ;;  %v71_v5 = vld [vmem:[%s8998_s1 + $0x178] sm:$0xff]  ;;  %v6233_v42 = vand.u32 4294901760, %v87_v4 }
  0x5a   :  { %4658 = vmatpush3.msra.mxu0 %v9403_v59  ;;  %4685 = vmatpush3.msra.mxu1 %v5601_v9  ;;  %v9406_v9 = vand.u32 4294901760, %v5860_v55  ;;  %v6235_v55 = vand.u32 4294901760, %v71_v5  ;;  %9423 = vst [vmem:[#allocation4_spill] sm:$0xff] %v6330_v32  ;;  %v6338_v59 = vand.u32 4294901760, %v66_v23 }
  0x5b   :  { %4659 = vmatprep.subr.mxu0 %v9404_v0  ;;  %4686 = vmatprep.subr.mxu1 %v5603_v10  ;;  %v70_v10 = vld [vmem:[%s8998_s1 + $0x170] sm:$0xff]  ;;  %v6273_v19 = vsub.f32 %v87_v4, %v6233_v42  ;;  %v9427_v0 = vand.u32 4294901760, %v6072_v41  ;;  %v81_v4 = vld [vmem:[%s8998_s1 + $0x1c8] sm:$0xff] }
  0x5c   :  { %4660 = vmatpush3.msra.mxu0 %v9405_v3  ;;  %4687 = vmatpush3.msra.mxu1 %v5605_v11  ;;  %v9408_v11 = vand.u32 4294901760, %v5900_v34  ;;  %v9410_v34 = vand.u32 4294901760, %v5928_v60  ;;  %9426 = vst [vmem:[#allocation6_spill] sm:$0xff] %v6338_v59 }
  0x5d   :  { %4661 = vmatprep.subr.mxu0 %v9406_v9  ;;  %4688 = vmatprep.subr.mxu1 %v5617_v15  ;;  %v86_v15 = vld [vmem:[%s8998_s1 + $0x1f0] sm:$0xff] }
  0x5e   :  { %4662 = vmatpush3.msra.mxu0 %v9407_v8  ;;  %4689 = vmatpush3.msra.mxu1 %v5619_v16  ;;  %v6246_v16 = vand.u32 4294901760, %v70_v10  ;;  %v6257_v28 = vand.u32 4294901760, %v86_v15  ;;  %v9431_v9 = vld [vmem:[#allocation12_spill] sm:$0xff] }
  0x5f   :  { %4663 = vmatprep.subr.mxu0 %v9408_v11  ;;  %4690 = vmatprep.subr.mxu1 %v5621_v17  ;;  %v85_v17 = vld [vmem:[%s8998_s1 + $0x1e8] sm:$0xff]  ;;  %v9432_v11 = vld [vmem:[#allocation24_spill] sm:$0xff] }
  0x60   :  { %4664 = vmatpush3.msra.mxu0 %v9409_v21  ;;  %4691 = vmatpush3.msra.mxu1 %v5643_v22  ;;  %v68_v22 = vld [vmem:[%s8998_s1 + $0x160] sm:$0xff]  ;;  %v6270_v60 = vand.u32 4294901760, %v85_v17  ;;  %v6279_v62 = vsub.f32 %v70_v10, %v6246_v16 }
  0x61   :  { %4665 = vmatprep.subr.mxu0 %v9410_v34  ;;  %4692 = vmatprep.subr.mxu1 %v5649_v24  ;;  %v6268_v24 = vsub.f32 %v71_v5, %v6235_v55  ;;  %v6287_v51 = vand.u32 4294901760, %v68_v22  ;;  %v9429_v5 = vld [vmem:[#allocation23_spill] sm:$0xff]  ;;  %v80_v34 = vld [vmem:[%s8998_s1 + $0x1c0] sm:$0xff] }
  0x62   :  { %4666 = vmatpush3.msra.mxu0 %v9411_v6  ;;  %4693 = vmatpush3.msra.mxu1 %v9373_v20  ;;  %9414 = vst [vmem:[#allocation2_spill] sm:$0xff] %v6270_v60  ;;  %v84_v20 = vld [vmem:[%s8998_s1 + $0x1e0] sm:$0xff]  ;;  %v6313_v25 = vsub.f32 %v85_v17, %v6270_v60  ;;  %v9074_v63 = vand.u32 4294901760, %v6279_v62  ;;  %v6380_v17 = vand.u32 4294901760, %v65_v13 }
  0x63   :  { %4667 = vmatprep.subr.mxu0 %v9413_v30  ;;  %4694 = vmatprep.subr.mxu1 %v9375_v7  ;;  %9417 = vst [vmem:[#allocation20_spill] sm:$0xff] %v6287_v51  ;;  %v9418_v7 = vand.u32 4294901760, %v6010_v36  ;;  %v9077_v36 = vand.u32 4294901760, %v6273_v19  ;;  %v6318_v57 = vand.u32 4294901760, %v84_v20  ;;  %v6328_v43 = vsub.f32 %v68_v22, %v6287_v51  ;;  %v64_v6 = vld [vmem:[%s8998_s1 + $0x140] sm:$0xff] }
  0x64   :  { %4668 = vmatpush3.msra.mxu0 %v9415_v54  ;;  %4695 = vmatpush3.msra.mxu1 %v9376_v49  ;;  %v67_v49 = vld [vmem:[%s8998_s1 + $0x158] sm:$0xff]  ;;  %v9073_v41 = vand.u32 4294901760, %v6313_v25  ;;  %v6369_v10 = vsub.f32 %v6279_v62, %v9074_v63  ;;  %9435 = vst [vmem:[#allocation8_spill] sm:$0xff] %v6380_v17  ;;  %v6390_v30 = vsub.f32 %v83_v53, %v6330_v32 }
  0x65   :  { %4669 = vmatprep.subr.mxu0 %v9416_v33  ;;  %4696 = vmatprep.subr.mxu1 %v9377_v50  ;;  %v6302_v50 = vsub.f32 %v86_v15, %v6257_v28  ;;  %9421 = vst [vmem:[#allocation3_spill] sm:$0xff] %v6318_v57  ;;  %v6332_v40 = vand.u32 4294901760, %v67_v49  ;;  %v6372_v8 = vsub.f32 %v84_v20, %v6318_v57  ;;  %v9433_v15 = vand.u32 4294901760, %v9432_v11  ;;  %v9436_v54 = vld [vmem:[#allocation25_spill] sm:$0xff] }
  0x66   :  { %4670 = vmatpush3.msra.mxu0 %v9418_v7  ;;  %4697 = vmatpush3.msra.mxu1 %v9378_v37  ;;  %v9076_v37 = vand.u32 4294901760, %v6268_v24  ;;  %v9072_v22 = vand.u32 4294901760, %v6328_v43  ;;  %v9437_v33 = vand.u32 4294901760, %v9436_v54  ;;  %v9438_v20 = vld [vmem:[#allocation21_spill] sm:$0xff] }
  0x67   :  { %4671 = vmatprep.subr.mxu0 %v9419_v18  ;;  %4698 = vmatprep.subr.mxu1 %v9379_v2  ;;  %v82_v2 = vld [vmem:[%s8998_s1 + $0x1d0] sm:$0xff]  ;;  %9424 = vst [vmem:[#allocation5_spill] sm:$0xff] %v6332_v40  ;;  %v9075_v45 = vand.u32 4294901760, %v6302_v50  ;;  %v6378_v21 = vsub.f32 %v67_v49, %v6332_v40  ;;  %v6401_v49 = vsub.f32 %v66_v23, %v6338_v59  ;;  %v6403_v18 = vand.u32 4294901760, %v81_v4 }
  0x68   :  { %4672 = vmatpush3.msra.mxu0 %v9420_v31  ;;  %4699 = vmatpush3.msra.mxu1 %v9380_v56  ;;  %v9425_v56 = vand.u32 4294901760, %v6055_v61  ;;  %v6350_v61 = vsub.f32 %v6273_v19, %v9077_v36  ;;  %v6357_v3 = vand.u32 4294901760, %v82_v2  ;;  %v9440_v31 = vld [vmem:[#allocation14_spill] sm:$0xff]  ;;  %v6417_v23 = vsub.f32 %v6313_v25, %v9073_v41  ;;  %v61_v36 = vld [vmem:[%s8998_s1 + $0x128] sm:$0xff] }
  0x69   :  { %4673 = vmatprep.subr.mxu0 %v9422_v35  ;;  %4700 = vmatprep.subr.mxu1 %v9381_v27  ;;  %v9071_v27 = vand.u32 4294901760, %v6293_v1  ;;  %v6398_v7 = vsub.f32 %v6302_v50, %v9075_v45  ;;  %9439 = vst [vmem:[#allocation9_spill] sm:$0xff] %v6403_v18  ;;  %v9441_v35 = vld [vmem:[#allocation22_spill] sm:$0xff]  ;;  %v9078_v11 = vand.u32 4294901760, %v6372_v8  ;;  %v6444_v54 = vsub.f32 %v6328_v43, %v9072_v22  ;;  %v6458_v22 = vld [vmem:[%s8998_s1 + $0x1b0] sm:$0xff] }
  0x6a   :  { %4674 = vmatpush3.msra.mxu0 %v9425_v56  ;;  %4701 = vmatpush3.msra.mxu1 %v9382_v47  ;;  %v6355_v47 = vsub.f32 %v6268_v24, %v9076_v37  ;;  %9428 = vst [vmem:[#allocation7_spill] sm:$0xff] %v6357_v3  ;;  %v9081_v41 = vand.u32 4294901760, %v6401_v49  ;;  %v6462_v63 = vsub.f32 %v81_v4, %v6403_v18 }
  0x6b   :  { %4675 = vmatprep.subr.mxu0 %v9427_v0  ;;  %4702 = vmatprep.subr.mxu1 %v9383_v44  ;;  %v9430_v44 = vand.u32 4294901760, %v9429_v5  ;;  %v6408_v53 = vsub.f32 %v6293_v1, %v9071_v27  ;;  %v6420_v5 = vsub.f32 %v82_v2, %v6357_v3  ;;  %v63_v2 = vld [vmem:[%s8998_s1 + $0x138] sm:$0xff]  ;;  %v62_v27 = vld [vmem:[%s8998_s1 + $0x130] sm:$0xff] }
  0x6c   :  { %4703 = vmatpush3.msra.mxu1 %v9431_v9  ;;  %942 = vmatprep.mubr.f32.mxu0 %v9438_v20  ;;  %v6425_v9 = vand.u32 4294901760, %v80_v34 }
  0x6d   :  { %4676 = vmatpush3.msra.mxu0 %v9430_v44  ;;  %4704 = vmatprep.subr.mxu1 %v9434_v48  ;;  %v79_v48 = vld [vmem:[%s8998_s1 + $0x1b8] sm:$0xff]  ;;  %v9084_v37 = vand.u32 4294901760, %v6420_v5  ;;  %v60_v44 = vld [vmem:[%s8998_s1 + $0x120] sm:$0xff] }
  0x6e   :  { %4677 = vmatprep.subr.mxu0 %v9433_v15  ;;  %4705 = vmatpush3.msra.mxu1 %v9440_v31  ;;  %9442 = vst [vmem:[#allocation10_spill] sm:$0xff] %v6425_v9  ;;  %v6428_v15 = vand.u32 4294901760, %v64_v6  ;;  %v9080_v31 = vand.u32 4294901760, %v6378_v21  ;;  %v6467_v45 = vand.u32 4294901760, %v79_v48 }
  0x6f   :  { %4678 = vmatpush3.msra.mxu0 %v9437_v33  ;;  %4706 = vmatprep.subr.mxu1 %v5889_v39  ;;  %v6439_v39 = vsub.f32 %v65_v13, %v6380_v17  ;;  %v9079_v33 = vand.u32 4294901760, %v6390_v30  ;;  %v6485_v13 = vand.u32 4294901760, %v62_v27  ;;  %v6534_v56 = vsub.f32 %v6420_v5, %v9084_v37 }
  0x70   :  { %944 = vmatmul.mubr.f32.vlgmr.msra.gmra.mxu0 %v9441_v35  ;;  %4717 = vmatprep.subr.mxu0 %v6233_v42  ;;  %9443 = vst [vmem:[#allocation11_spill] sm:$0xff] %v6428_v15  ;;  %9445 = vst [vmem:[#allocation16_spill] sm:$0xff] %v6467_v45  ;;  %v6483_v4 = vsub.f32 %v64_v6, %v6428_v15  ;;  %v6539_v0 = vsub.f32 %v79_v48, %v6467_v45  ;;  %v9454_v37 = vand.u32 4294901760, %v6350_v61 }
  0x71   :  { %4707 = vmatpush3.msra.mxu1 %v9387_v26  ;;  %4718 = vmatpush3.msra.mxu0 %v6235_v55  ;;  %9444 = vst [vmem:[#allocation15_spill] sm:$0xff] %v6439_v39  ;;  %v1289_v26 = vand.u32 4294901760, %v6398_v7  ;;  %v6469_v7 = vand.u32 4294901760, %v63_v2  ;;  %9448 = vst [vmem:[#allocation23_spill] sm:$0xff] %v6485_v13  ;;  %v6499_v6 = vsub.f32 %v6390_v30, %v9079_v33  ;;  %v77_v33 = vld [vmem:[%s8998_s1 + $0x1a8] sm:$0xff] }
  0x72   :  { %4708 = vmatprep.subr.mxu1 %v9389_v12  ;;  %4719 = vmatprep.subr.mxu0 %v6257_v28  ;;  %9447 = vst [vmem:[#allocation19_spill] sm:$0xff] %v6483_v4  ;;  %v6488_v12 = vsub.f32 %v80_v34, %v6425_v9  ;;  %v6504_v34 = vsub.f32 %v6378_v21, %v9080_v31  ;;  %v6520_v31 = vand.u32 4294901760, %v61_v36 }
  0x73   :  { %4709 = vmatpush3.msra.mxu1 %v9391_v29  ;;  %4720 = vmatpush3.msra.mxu0 %v6246_v16  ;;  %9446 = vst [vmem:[#allocation17_spill] sm:$0xff] %v6469_v7  ;;  %v6480_v29 = vsub.f32 %v6372_v8, %v9078_v11  ;;  %v6507_v11 = vand.u32 4294901760, %v6458_v22  ;;  %v1310_v48 = vand.u32 4294901760, %v6499_v6  ;;  %v9457_v6 = vand.u32 4294901760, %v6462_v63 }
  0x74   :  { %4710 = vmatprep.subr.mxu1 %v9393_v14  ;;  %4721 = vmatprep.subr.mxu0 %v6270_v60  ;;  %9449 = vst [vmem:[#allocation12_spill] sm:$0xff] %v6488_v12  ;;  %9451 = vst [vmem:[#allocation13_spill] sm:$0xff] %v6520_v31  ;;  %v6536_v14 = vand.u32 4294901760, %v60_v44 }
  0x75   :  { %4711 = vmatpush3.msra.mxu1 %v5967_v38  ;;  %4722 = vmatpush3.msra.mxu0 %v6259_v46  ;;  %9450 = vst [vmem:[#allocation24_spill] sm:$0xff] %v6507_v11  ;;  %v6514_v38 = vsub.f32 %v6401_v49, %v9081_v41  ;;  %v6529_v41 = vsub.f32 %v63_v2, %v6469_v7  ;;  %v6554_v46 = vand.u32 4294901760, %v77_v33  ;;  %v9458_v2 = vand.u32 4294901760, %v6439_v39 }
  0x76   :  { %4712 = vmatprep.subr.mxu1 %v5984_v52  ;;  %4723 = vmatprep.subr.mxu0 %v6318_v57  ;;  %v76_v52 = vld [vmem:[%s8998_s1 + $0x1a0] sm:$0xff]  ;;  %9452 = vst [vmem:[#allocation25_spill] sm:$0xff] %v6536_v14  ;;  %v6574_v57 = vsub.f32 %v61_v36, %v6520_v31  ;;  %v6590_v36 = vsub.f32 %v60_v44, %v6536_v14 }
  0x77   :  { %4713 = vmatpush3.msra.mxu1 %v6006_v58  ;;  %1046 = vmatprep.mubr.f32.mxu1 %v9438_v20  ;;  %v1303_v58 = vand.u32 4294901760, %v6480_v29  ;;  %v6545_v20 = vsub.f32 %v62_v27, %v6485_v13  ;;  %9455 = vst [vmem:[#allocation14_spill] sm:$0xff] %v6554_v46  ;;  %v59_v27 = vld [vmem:[%s8998_s1 + $0x118] sm:$0xff] }
  0x78   :  { %4724 = vmatpush3.msra.mxu0 %v6287_v51  ;;  %1048 = vmatmul.mubr.f32.vlgmr.msra.gmra.mxu1 %v9441_v35  ;;  %v1198_v51 = vand.u32 4294901760, %v6504_v34  ;;  %v6556_v35 = vand.u32 4294901760, %v76_v52  ;;  %v17_v29 = vld [vmem:[%s8999_s0 + $0x18] sm:$0xff]  ;;  %v6571_v34 = vsub.f32 %v6462_v63, %v9457_v6  ;;  %v1317_v6 = vand.u32 4294901760, %v6534_v56  ;;  %9459 = vst [vmem:[#allocation22_spill] sm:$0xff] %v6590_v36 }
  0x79   :  { %9453 = vst [vmem:[#allocation21_spill] sm:$0xff] %v6545_v20  ;;  %4725 = vmatprep.subr.mxu0 %v6330_v32  ;;  %4752 = vmatprep.subr.mxu1 %v9454_v37  ;;  %v9456_v37 = vand.u32 4294901760, %v6355_v47  ;;  %v6579_v32 = vsub.f32 %v6439_v39, %v9458_v2  ;;  %v58_v47 = vld [vmem:[%s8998_s1 + $0x110] sm:$0xff]  ;;  %v75_v2 = vld [vmem:[%s8998_s1 + $0x198] sm:$0xff]  ;;  %v9461_v56 = vand.u32 4294901760, %v6488_v12  ;;  %v6613_v61 = vand.u32 4294901760, %v59_v27 }
  0x7a   :  { %4726 = vmatpush3.msra.mxu0 %v6332_v40  ;;  %v6598_v40 = vsub.f32 %v6458_v22, %v6507_v11  ;;  %v74_v22 = vld [vmem:[%s8998_s1 + $0x190] sm:$0xff]  ;;  %v1324_v60 = vand.u32 4294901760, %v6571_v34 }
  0x7b   :  { %4753 = vmatpush3.msra.mxu1 %v9456_v37  ;;  %v16_v37 = vld [vmem:[%s8999_s0 + $0x10] sm:$0xff]  ;;  %4727 = vmatprep.subr.mxu0 %v6357_v3  ;;  %v9460_v3 = vand.u32 4294901760, %v6369_v10  ;;  %v6606_v44 = vsub.f32 %v6488_v12, %v9461_v56  ;;  %v6624_v56 = vand.u32 4294901760, %v58_v47  ;;  %v9466_v12 = vand.u32 4294901760, %v6408_v53  ;;  %v57_v53 = vld [vmem:[%s8998_s1 + $0x108] sm:$0xff] }
  0x7c   :  { %4754 = vmatprep.subr.mxu1 %v1289_v26  ;;  %4728 = vmatpush3.msra.mxu0 %v6338_v59  ;;  %v9462_v26 = vand.u32 4294901760, %v6483_v4  ;;  %v6618_v59 = vand.u32 4294901760, %v17_v29 }
  0x7d   :  { %4755 = vmatpush3.msra.mxu1 %v9460_v3  ;;  %4729 = vmatprep.subr.mxu0 %v6403_v18  ;;  %v9464_v3 = vand.u32 4294901760, %v6417_v23  ;;  %v1212_v18 = vand.u32 4294901760, %v6579_v32  ;;  %v6636_v23 = vand.u32 4294901760, %v75_v2  ;;  %v73_v32 = vld [vmem:[%s8998_s1 + $0x188] sm:$0xff]  ;;  %v1331_v34 = vand.u32 4294901760, %v6606_v44 }
  0x7e   :  { %v6611_v39 = vsub.f32 %v6483_v4, %v9462_v26  ;;  %9463 = vst [vmem:[#allocation26_spill] sm:$0xff] %v6618_v59  ;;  %v6627_v26 = vsub.f32 %v77_v33, %v6554_v46  ;;  %v6629_v4 = vand.u32 4294901760, %v16_v37  ;;  %4730 = vmatpush3.msra.mxu0 %v6380_v17  ;;  %v9467_v33 = vand.u32 4294901760, %v6539_v0  ;;  %1390 = vmatprep.mubr.f32.mxu1 %v6618_v59 }
  0x7f   :  { %4756 = vmatprep.subr.mxu1 %v9464_v3  ;;  %4731 = vmatprep.subr.mxu0 %v6425_v9  ;;  %v6645_v17 = vand.u32 4294901760, %v74_v22  ;;  %v6660_v3 = vsub.f32 %v59_v27, %v6613_v61  ;;  %v6666_v9 = vsub.f32 %v17_v29, %v6618_v59  ;;  %v6673_v44 = vsub.f32 %v58_v47, %v6624_v56  ;;  %v72_v27 = vld [vmem:[%s8998_s1 + $0x180] sm:$0xff]  ;;  %v9506_v59 = vld [vmem:[#allocation23_spill] sm:$0xff] }
  0x80   :  { %9465 = vst [vmem:[#allocation27_spill] sm:$0xff] %v6629_v4  ;;  %4757 = vmatpush3.msra.mxu1 %v9466_v12  ;;  %v6643_v10 = vsub.f32 %v6539_v0, %v9467_v33  ;;  %v6652_v12 = vsub.f32 %v76_v52, %v6556_v35  ;;  %4732 = vmatpush3.msra.mxu0 %v6428_v15  ;;  %v1219_v33 = vand.u32 4294901760, %v6611_v39  ;;  %v56_v29 = vld [vmem:[%s8998_s1 + $0x100] sm:$0xff]  ;;  %v9472_v15 = vand.u32 4294901760, %v6598_v40 }
  0x81   :  { %4758 = vmatprep.subr.mxu1 %v1303_v58  ;;  %9468 = vst [vmem:[#allocation28_spill] sm:$0xff] %v6645_v17  ;;  %v9469_v58 = vand.u32 4294901760, %v6444_v54  ;;  %4733 = vmatprep.subr.mxu0 %v6467_v45  ;;  %v9470_v54 = vand.u32 4294901760, %v6529_v41  ;;  %v6693_v45 = vsub.f32 %v75_v2, %v6636_v23  ;;  %v9473_v39 = vand.u32 4294901760, %v6514_v38 }
  0x82   :  { %4734 = vmatpush3.msra.mxu0 %v6469_v7  ;;  %v6700_v7 = vand.u32 4294901760, %v57_v53  ;;  %v6706_v2 = vand.u32 4294901760, %v72_v27  ;;  %v9125_v38 = vand.u32 4294901760, %v6590_v36 }
  0x83   :  { %4759 = vmatpush3.msra.mxu1 %v9469_v58  ;;  %v1225_v52 = vsub.f32 %v6529_v41, %v9470_v54  ;;  %v6683_v58 = vsub.f32 %v16_v37, %v6629_v4  ;;  %v6689_v54 = vand.u32 4294901760, %v73_v32  ;;  %4735 = vmatprep.subr.mxu0 %v6507_v11  ;;  %v1338_v37 = vand.u32 4294901760, %v6643_v10 }
  0x84   :  { %4760 = vmatprep.subr.mxu1 %v1310_v48  ;;  %v9471_v48 = vand.u32 4294901760, %v6545_v20  ;;  %4736 = vmatpush3.msra.mxu0 %v6485_v13  ;;  %v6712_v10 = vsub.f32 %v74_v22, %v6645_v17 }
  0x85   :  { %4761 = vmatpush3.msra.mxu1 %v1198_v51  ;;  %v1344_v51 = vsub.f32 %v6598_v40, %v9472_v15  ;;  %4737 = vmatprep.subr.mxu0 %v6554_v46  ;;  %v1226_v15 = vand.u32 4294901760, %v1225_v52 }
  0x86   :  { %v1232_v47 = vsub.f32 %v6545_v20, %v9471_v48  ;;  %4762 = vmatprep.subr.mxu1 %v1317_v6  ;;  %v6708_v20 = vand.u32 4294901760, %v56_v29  ;;  %v9474_v48 = vand.u32 4294901760, %v6627_v26  ;;  %4738 = vmatpush3.msra.mxu0 %v6520_v31  ;;  %v9475_v6 = vand.u32 4294901760, %v6574_v57 }
  0x87   :  { %4763 = vmatpush3.msra.mxu1 %v9473_v39  ;;  %4739 = vmatprep.subr.mxu0 %v6556_v35  ;;  %v1345_v52 = vand.u32 4294901760, %v1344_v51  ;;  %v9476_v39 = vand.u32 4294901760, %v6652_v12 }
  0x88   :  { %4764 = vmatprep.subr.mxu1 %v1324_v60  ;;  %v1351_v13 = vsub.f32 %v6627_v26, %v9474_v48  ;;  %v1233_v11 = vand.u32 4294901760, %v1232_v47  ;;  %v1239_v22 = vsub.f32 %v6574_v57, %v9475_v6  ;;  %v6726_v60 = vsub.f32 %v73_v32, %v6689_v54  ;;  %4740 = vmatpush3.msra.mxu0 %v6536_v14 }
  0x89   :  { %4765 = vmatpush3.msra.mxu1 %v1212_v18  ;;  %v6730_v48 = vsub.f32 %v57_v53, %v6700_v7  ;;  %v1358_v18 = vsub.f32 %v6652_v12, %v9476_v39  ;;  %v6738_v6 = vsub.f32 %v56_v29, %v6708_v20  ;;  %v9478_v32 = vand.u32 4294901760, %v6666_v9  ;;  %4741 = vmatprep.subr.mxu0 %v6636_v23 }
  0x8a   :  { %4766 = vmatprep.subr.mxu1 %v1331_v34  ;;  %v6745_v53 = vsub.f32 %v72_v27, %v6706_v2  ;;  %v1352_v39 = vand.u32 4294901760, %v1351_v13  ;;  %v9480_v29 = vand.u32 4294901760, %v6683_v58  ;;  %4742 = vmatpush3.msra.mxu0 %v6613_v61  ;;  %v9481_v27 = vand.u32 4294901760, %v6693_v45 }
  0x8b   :  { %4767 = vmatpush3.msra.mxu1 %v1219_v33  ;;  %9477 = vst [vmem:[#allocation29_spill] sm:$0xff] %v6738_v6  ;;  %v1152_v34 = vsub.f32 %v6666_v9, %v9478_v32  ;;  %v1246_v33 = vsub.f32 %v6590_v36, %v9125_v38  ;;  %v1240_v32 = vand.u32 4294901760, %v1239_v22  ;;  %4743 = vmatprep.subr.mxu0 %v6645_v17  ;;  %v9482_v38 = vand.u32 4294901760, %v6660_v3 }
  0x8c   :  { %9479 = vst [vmem:[#allocation30_spill] sm:$0xff] %v6745_v53  ;;  %4768 = vmatprep.subr.mxu1 %v1338_v37  ;;  %v1158_v47 = vsub.f32 %v6683_v58, %v9480_v29  ;;  %v1365_v51 = vsub.f32 %v6693_v45, %v9481_v27  ;;  %v1359_v37 = vand.u32 4294901760, %v1358_v18  ;;  %4744 = vmatpush3.msra.mxu0 %v6624_v56  ;;  %v9483_v22 = vand.u32 4294901760, %v6712_v10 }
  0x8d   :  { %4769 = vmatpush3.msra.mxu1 %v1226_v15  ;;  %v1253_v29 = vsub.f32 %v6660_v3, %v9482_v38  ;;  %v1153_v15 = vand.u32 4294901760, %v1152_v34  ;;  %v9129_v13 = vand.u32 4294901760, %v6745_v53  ;;  %4745 = vmatprep.subr.mxu0 %v6689_v54  ;;  %v9484_v17 = vand.u32 4294901760, %v6673_v44 }
  0x8e   :  { %4770 = vmatprep.subr.mxu1 %v1345_v52  ;;  %v1372_v27 = vsub.f32 %v6712_v10, %v9483_v22  ;;  %v1247_v52 = vand.u32 4294901760, %v1246_v33  ;;  %v1159_v18 = vand.u32 4294901760, %v1158_v47  ;;  %v9128_v46 = vand.u32 4294901760, %v6738_v6  ;;  %4746 = vmatpush3.msra.mxu0 %v6700_v7 }
  0x8f   :  { %4771 = vmatpush3.msra.mxu1 %v1233_v11  ;;  %v1260_v38 = vsub.f32 %v6673_v44, %v9484_v17  ;;  %v1366_v11 = vand.u32 4294901760, %v1365_v51  ;;  %v9485_v34 = vand.u32 4294901760, %v6726_v60  ;;  %4747 = vmatprep.subr.mxu0 %v6706_v2  ;;  %v9486_v47 = vand.u32 4294901760, %v6730_v48 }
  0x90   :  { %4772 = vmatprep.subr.mxu1 %v1352_v39  ;;  %v1254_v39 = vand.u32 4294901760, %v1253_v29  ;;  %4748 = vmatpush3.msra.mxu0 %v6708_v20  ;;  %v1373_v17 = vand.u32 4294901760, %v1372_v27  ;;  %v1386_v51 = vsub.f32 %v6745_v53, %v9129_v13  ;;  %v9504_v13 = vld [vmem:[#allocation17_spill] sm:$0xff] }
  0x91   :  { %4773 = vmatpush3.msra.mxu1 %v1240_v32  ;;  %v1379_v22 = vsub.f32 %v6726_v60, %v9485_v34  ;;  %v1267_v33 = vsub.f32 %v6730_v48, %v9486_v47  ;;  %1154 = vmatprep.mubr.f32.mxu0 %v1153_v15  ;;  %v1261_v32 = vand.u32 4294901760, %v1260_v38  ;;  %v9488_v38 = vld [vmem:[#allocation15_spill] sm:$0xff]  ;;  %v9490_v34 = vld [vmem:[#allocation12_spill] sm:$0xff] }
  0x92   :  { %4774 = vmatprep.subr.mxu1 %v1359_v37  ;;  %1160 = vmatmul.mubr.f32.vlgmr.msra.gmra.mxu0 %v1159_v18  ;;  %v1274_v37 = vsub.f32 %v6738_v6, %v9128_v46  ;;  %v1387_v27 = vand.u32 4294901760, %v1386_v51  ;;  %v9487_v18 = vld [vmem:[#allocation2_spill] sm:$0xff]  ;;  %v9493_v47 = vld [vmem:[#allocation20_spill] sm:$0xff]  ;;  %v9496_v51 = vld [vmem:[#allocation7_spill] sm:$0xff] }
  0x93   :  { %4775 = vmatpush3.msra.mxu1 %v1247_v52  ;;  %4787 = vmatprep.subr.mxu0 %v6273_v19  ;;  %v1380_v29 = vand.u32 4294901760, %v1379_v22  ;;  %v1268_v15 = vand.u32 4294901760, %v1267_v33  ;;  %v9491_v22 = vld [vmem:[#allocation3_spill] sm:$0xff]  ;;  %v9494_v33 = vld [vmem:[#allocation4_spill] sm:$0xff] }
  0x94   :  { %4776 = vmatprep.subr.mxu1 %v1366_v11  ;;  %4788 = vmatpush3.msra.mxu0 %v6268_v24  ;;  %v1275_v52 = vand.u32 4294901760, %v1274_v37  ;;  %v9489_v11 = vld [vmem:[#allocation18_spill] sm:$0xff]  ;;  %v9503_v46 = vld [vmem:[#allocation16_spill] sm:$0xff] }
  0x95   :  { %4777 = vmatpush3.msra.mxu1 %v1254_v39  ;;  %4789 = vmatprep.subr.mxu0 %v6302_v50  ;;  %v9492_v39 = vld [vmem:[#allocation19_spill] sm:$0xff]  ;;  %v9498_v37 = vld [vmem:[#allocation6_spill] sm:$0xff] }
  0x96   :  { %4778 = vmatprep.subr.mxu1 %v1373_v17  ;;  %4790 = vmatpush3.msra.mxu0 %v6279_v62  ;;  %v9495_v17 = vld [vmem:[#allocation5_spill] sm:$0xff] }
  0x97   :  { %4779 = vmatpush3.msra.mxu1 %v1261_v32  ;;  %4791 = vmatprep.subr.mxu0 %v6313_v25  ;;  %v9497_v32 = vld [vmem:[#allocation21_spill] sm:$0xff] }
  0x98   :  { %4780 = vmatprep.subr.mxu1 %v1380_v29  ;;  %4792 = vmatpush3.msra.mxu0 %v6293_v1  ;;  %v9499_v29 = vld [vmem:[#allocation9_spill] sm:$0xff] }
  0x99   :  { %4781 = vmatpush3.msra.mxu1 %v1268_v15  ;;  %4793 = vmatprep.subr.mxu0 %v6372_v8  ;;  %v9500_v15 = vld [vmem:[#allocation8_spill] sm:$0xff] }
  0x9a   :  { %4782 = vmatprep.subr.mxu1 %v1387_v27  ;;  %4794 = vmatpush3.msra.mxu0 %v6328_v43  ;;  %v9501_v27 = vld [vmem:[#allocation10_spill] sm:$0xff] }
  0x9b   :  { %4783 = vmatpush3.msra.mxu1 %v1275_v52  ;;  %4795 = vmatprep.subr.mxu0 %v6390_v30  ;;  %v9502_v52 = vld [vmem:[#allocation11_spill] sm:$0xff] }
  0x9c   :  { %1392 = vmatmul.mubr.f32.vlgmr.msra.gmra.mxu1 %v6629_v4  ;;  %4822 = vmatprep.subr.mxu1 %v6233_v42  ;;  %v9505_v4 = vld [vmem:[#allocation24_spill] sm:$0xff] }
  0x9d   :  { %4796 = vmatpush3.msra.mxu0 %v6378_v21  ;;  %4823 = vmatpush3.msra.mxu1 %v6235_v55 }
  0x9e   :  { %4797 = vmatprep.subr.mxu0 %v6420_v5  ;;  %4824 = vmatprep.subr.mxu1 %v6257_v28 }
  0x9f   :  { %4798 = vmatpush3.msra.mxu0 %v6401_v49  ;;  %4825 = vmatpush3.msra.mxu1 %v6246_v16 }
  0xa0   :  { %4799 = vmatprep.subr.mxu0 %v6462_v63  ;;  %4826 = vmatprep.subr.mxu1 %v9487_v18 }
  0xa1   :  { %4800 = vmatpush3.msra.mxu0 %v9488_v38  ;;  %4827 = vmatpush3.msra.mxu1 %v9489_v11 }
  0xa2   :  { %4801 = vmatprep.subr.mxu0 %v9490_v34  ;;  %4828 = vmatprep.subr.mxu1 %v9491_v22 }
  0xa3   :  { %4802 = vmatpush3.msra.mxu0 %v9492_v39  ;;  %4829 = vmatpush3.msra.mxu1 %v9493_v47 }
  0xa4   :  { %4803 = vmatprep.subr.mxu0 %v6539_v0  ;;  %4830 = vmatprep.subr.mxu1 %v9494_v33 }
  0xa5   :  { %4804 = vmatpush3.msra.mxu0 %v6529_v41  ;;  %4831 = vmatpush3.msra.mxu1 %v9495_v17 }
  0xa6   :  { %4805 = vmatprep.subr.mxu0 %v6598_v40  ;;  %4832 = vmatprep.subr.mxu1 %v9496_v51 }
  0xa7   :  { %4806 = vmatpush3.msra.mxu0 %v9497_v32  ;;  %4833 = vmatpush3.msra.mxu1 %v9498_v37 }
  0xa8   :  { %4807 = vmatprep.subr.mxu0 %v6627_v26  ;;  %4834 = vmatprep.subr.mxu1 %v9499_v29 }
  0xa9   :  { %4808 = vmatpush3.msra.mxu0 %v6574_v57  ;;  %4835 = vmatpush3.msra.mxu1 %v9500_v15 }
  0xaa   :  { %4809 = vmatprep.subr.mxu0 %v6652_v12  ;;  %4836 = vmatprep.subr.mxu1 %v9501_v27 }
  0xab   :  { %4810 = vmatpush3.msra.mxu0 %v6590_v36  ;;  %4837 = vmatpush3.msra.mxu1 %v9502_v52  ;;  %v9507_v36 = vld [vmem:[#allocation14_spill] sm:$0xff] }
  0xac   :  { %4811 = vmatprep.subr.mxu0 %v6693_v45  ;;  %4838 = vmatprep.subr.mxu1 %v9503_v46 }
  0xad   :  { %4812 = vmatpush3.msra.mxu0 %v6660_v3  ;;  %4839 = vmatpush3.msra.mxu1 %v9504_v13 }
  0xae   :  { %4813 = vmatprep.subr.mxu0 %v6712_v10  ;;  %4840 = vmatprep.subr.mxu1 %v9505_v4 }
  0xaf   :  { %4814 = vmatpush3.msra.mxu0 %v6673_v44  ;;  %4841 = vmatpush3.msra.mxu1 %v9506_v59 }
  0xb0   :  { %4815 = vmatprep.subr.mxu0 %v6726_v60  ;;  %4842 = vmatprep.subr.mxu1 %v9507_v36  ;;  %v9508_v36 = vand.u32 4294901760, %v6273_v19  ;;  %v9513_v19 = vand.u32 4294901760, %v6313_v25  ;;  %v9518_v25 = vand.u32 4294901760, %v6683_v58 }
  0xb1   :  { %4816 = vmatpush3.msra.mxu0 %v6730_v48  ;;  %4843 = vmatpush3.msra.mxu1 %v6520_v31  ;;  %v9509_v31 = vand.u32 4294901760, %v6268_v24  ;;  %v9514_v24 = vand.u32 4294901760, %v6293_v1  ;;  %v9520_v1 = vand.u32 4294901760, %v6378_v21 }
  0xb2   :  { %4817 = vmatprep.subr.mxu0 %v6745_v53  ;;  %4844 = vmatprep.subr.mxu1 %v6556_v35  ;;  %v9510_v53 = vld [vmem:[#allocation28_spill] sm:$0xff] }
  0xb3   :  { %4818 = vmatpush3.msra.mxu0 %v6738_v6  ;;  %1527 = vmatprep.mubr.f32.mxu0 %v6666_v9  ;;  %v9511_v6 = vand.u32 4294901760, %v6302_v50  ;;  %v9515_v50 = vand.u32 4294901760, %v6372_v8  ;;  %v9521_v8 = vand.u32 4294901760, %v6420_v5  ;;  %v9527_v5 = vand.u32 4294901760, %v6539_v0 }
  0xb4   :  { %4845 = vmatpush3.msra.mxu1 %v6536_v14  ;;  %1530 = vmatmul.mubr.f32.vlgmr.msra.gmra.mxu0 %v6683_v58  ;;  %v9512_v14 = vand.u32 4294901760, %v6279_v62  ;;  %v9516_v62 = vand.u32 4294901760, %v6666_v9  ;;  %v118_v9 = vld [vmem:[%s8998_s1 + $0x2f0] sm:$0xff]  ;;  %v9529_v0 = vand.u32 4294901760, %v6598_v40  ;;  %v100_v40 = vld [vmem:[%s8998_s1 + $0x260] sm:$0xff] }
  0xb5   :  { %4846 = vmatprep.subr.mxu1 %v6636_v23  ;;  %4857 = vmatprep.subr.mxu0 %v9508_v36  ;;  %v9528_v36 = vand.u32 4294901760, %v6529_v41  ;;  %v101_v41 = vld [vmem:[%s8998_s1 + $0x268] sm:$0xff] }
  0xb6   :  { %4847 = vmatpush3.msra.mxu1 %v6613_v61  ;;  %4858 = vmatpush3.msra.mxu0 %v9509_v31  ;;  %v9517_v31 = vand.u32 4294901760, %v6328_v43  ;;  %v9522_v43 = vand.u32 4294901760, %v6401_v49  ;;  %v102_v49 = vld [vmem:[%s8998_s1 + $0x270] sm:$0xff] }
  0xb7   :  { %4848 = vmatprep.subr.mxu1 %v9510_v53  ;;  %4859 = vmatprep.subr.mxu0 %v9511_v6  ;;  %v117_v6 = vld [vmem:[%s8998_s1 + $0x2e8] sm:$0xff] }
  0xb8   :  { %4849 = vmatpush3.msra.mxu1 %v6624_v56  ;;  %4860 = vmatpush3.msra.mxu0 %v9512_v14  ;;  %v9519_v14 = vand.u32 4294901760, %v6390_v30  ;;  %v9523_v30 = vand.u32 4294901760, %v6462_v63  ;;  %v9526_v63 = vand.u32 4294901760, %v9492_v39  ;;  %v6949_v39 = vand.u32 4294901760, %v117_v6 }
  0xb9   :  { %4850 = vmatprep.subr.mxu1 %v6689_v54  ;;  %4861 = vmatprep.subr.mxu0 %v9513_v19 }
  0xba   :  { %4851 = vmatpush3.msra.mxu1 %v6700_v7  ;;  %4862 = vmatpush3.msra.mxu0 %v9514_v24  ;;  %v9538_v24 = vand.u32 4294901760, %v6693_v45  ;;  %v98_v45 = vld [vmem:[%s8998_s1 + $0x250] sm:$0xff] }
  0xbb   :  { %4852 = vmatprep.subr.mxu1 %v6706_v2  ;;  %4863 = vmatprep.subr.mxu0 %v9515_v50 }
  0xbc   :  { %4853 = vmatpush3.msra.mxu1 %v6708_v20  ;;  %1634 = vmatprep.mubr.f32.mxu1 %v9516_v62  ;;  %v6989_v62 = vsub.f32 %v117_v6, %v6949_v39 }
  0xbd   :  { %4864 = vmatpush3.msra.mxu0 %v9517_v31  ;;  %1638 = vmatmul.mubr.f32.vlgmr.msra.gmra.mxu1 %v9518_v25 }
  0xbe   :  { %4865 = vmatprep.subr.mxu0 %v9519_v14  ;;  %4892 = vmatprep.subr.mxu1 %v6233_v42  ;;  %v103_v42 = vld [vmem:[%s8998_s1 + $0x278] sm:$0xff] }
  0xbf   :  { %4866 = vmatpush3.msra.mxu0 %v9520_v1  ;;  %4893 = vmatpush3.msra.mxu1 %v6235_v55  ;;  %v9524_v55 = vand.u32 4294901760, %v9488_v38  ;;  %v6908_v21 = vand.u32 4294901760, %v103_v42  ;;  %v9530_v38 = vand.u32 4294901760, %v9497_v32 }
  0xc0   :  { %4867 = vmatprep.subr.mxu0 %v9521_v8  ;;  %4894 = vmatprep.subr.mxu1 %v6257_v28  ;;  %v9525_v28 = vand.u32 4294901760, %v9490_v34  ;;  %v6941_v34 = vand.u32 4294901760, %v118_v9 }
  0xc1   :  { %4868 = vmatpush3.msra.mxu0 %v9522_v43  ;;  %4895 = vmatpush3.msra.mxu1 %v6246_v16  ;;  %v119_v16 = vld [vmem:[%s8998_s1 + $0x2f8] sm:$0xff]  ;;  %v9544_v43 = vand.u32 4294901760, %v6673_v44 }
  0xc2   :  { %4869 = vmatprep.subr.mxu0 %v9523_v30  ;;  %4896 = vmatprep.subr.mxu1 %v9487_v18  ;;  %v6922_v58 = vand.u32 4294901760, %v119_v16  ;;  %v6930_v18 = vand.u32 4294901760, %v102_v49  ;;  %v6981_v19 = vsub.f32 %v118_v9, %v6941_v34 }
  0xc3   :  { %4870 = vmatpush3.msra.mxu0 %v9524_v55  ;;  %4897 = vmatpush3.msra.mxu1 %v9489_v11  ;;  %v6939_v11 = vsub.f32 %v103_v42, %v6908_v21  ;;  %v9545_v42 = vand.u32 4294901760, %v6726_v60  ;;  %v9546_v55 = vld [vmem:[#allocation14_spill] sm:$0xff] }
  0xc4   :  { %4871 = vmatprep.subr.mxu0 %v9525_v28  ;;  %4898 = vmatprep.subr.mxu1 %v9491_v22  ;;  %v9531_v22 = vand.u32 4294901760, %v6627_v26  ;;  %v9534_v26 = vand.u32 4294901760, %v6652_v12  ;;  %v6966_v32 = vsub.f32 %v102_v49, %v6930_v18  ;;  %v115_v12 = vld [vmem:[%s8998_s1 + $0x2d8] sm:$0xff]  ;;  %v7032_v28 = vand.u32 4294901760, %v98_v45  ;;  %v96_v60 = vld [vmem:[%s8998_s1 + $0x240] sm:$0xff] }
  0xc5   :  { %4872 = vmatpush3.msra.mxu0 %v9526_v63  ;;  %4899 = vmatpush3.msra.mxu1 %v9493_v47  ;;  %v9532_v47 = vand.u32 4294901760, %v6574_v57  ;;  %v6968_v57 = vand.u32 4294901760, %v100_v40  ;;  %v7012_v1 = vand.u32 4294901760, %v115_v12  ;;  %v9549_v49 = vand.u32 4294901760, %v6730_v48 }
  0xc6   :  { %4873 = vmatprep.subr.mxu0 %v9527_v5  ;;  %4900 = vmatprep.subr.mxu1 %v9494_v33  ;;  %v6954_v33 = vand.u32 4294901760, %v101_v41  ;;  %v9142_v8 = vand.u32 4294901760, %v6966_v32  ;;  %9548 = vst [vmem:[#allocation20_spill] sm:$0xff] %v7032_v28  ;;  %v9550_v5 = vld [vmem:[#allocation13_spill] sm:$0xff] }
  0xc7   :  { %4874 = vmatpush3.msra.mxu0 %v9528_v36  ;;  %4901 = vmatpush3.msra.mxu1 %v9495_v17  ;;  %v116_v17 = vld [vmem:[%s8998_s1 + $0x2e0] sm:$0xff]  ;;  %9535 = vst [vmem:[#allocation15_spill] sm:$0xff] %v6968_v57  ;;  %9543 = vst [vmem:[#allocation3_spill] sm:$0xff] %v7012_v1 }
  0xc8   :  { %4875 = vmatprep.subr.mxu0 %v9529_v0  ;;  %4902 = vmatprep.subr.mxu1 %v9496_v51  ;;  %9533 = vst [vmem:[#allocation2_spill] sm:$0xff] %v6954_v33  ;;  %v6960_v51 = vsub.f32 %v119_v16, %v6922_v58  ;;  %v6986_v50 = vand.u32 4294901760, %v116_v17  ;;  %v6995_v31 = vsub.f32 %v101_v41, %v6954_v33  ;;  %v9141_v16 = vand.u32 4294901760, %v6989_v62  ;;  %v9551_v0 = vld [vmem:[#allocation30_spill] sm:$0xff] }
  0xc9   :  { %4876 = vmatpush3.msra.mxu0 %v9530_v38  ;;  %4903 = vmatpush3.msra.mxu1 %v9498_v37  ;;  %v99_v37 = vld [vmem:[%s8998_s1 + $0x258] sm:$0xff]  ;;  %v9552_v41 = vand.u32 4294901760, %v9551_v0  ;;  %v7062_v48 = vsub.f32 %v6966_v32, %v9142_v8 }
  0xca   :  { %4877 = vmatprep.subr.mxu0 %v9531_v22  ;;  %4904 = vmatprep.subr.mxu1 %v9499_v29  ;;  %v9536_v29 = vld [vmem:[#allocation22_spill] sm:$0xff]  ;;  %9539 = vst [vmem:[#allocation18_spill] sm:$0xff] %v6986_v50  ;;  %v9146_v25 = vand.u32 4294901760, %v6960_v51  ;;  %v6998_v14 = vand.u32 4294901760, %v99_v37  ;;  %v7039_v63 = vsub.f32 %v116_v17, %v6986_v50  ;;  %v9140_v6 = vand.u32 4294901760, %v6995_v31  ;;  %v9554_v17 = vld [vmem:[#allocation29_spill] sm:$0xff] }
  0xcb   :  { %4878 = vmatpush3.msra.mxu0 %v9532_v47  ;;  %4905 = vmatpush3.msra.mxu1 %v9500_v15  ;;  %v9537_v15 = vand.u32 4294901760, %v9536_v29  ;;  %v7071_v47 = vsub.f32 %v115_v12, %v7012_v1  ;;  %v9560_v12 = vld [vmem:[#allocation27_spill] sm:$0xff] }
  0xcc   :  { %4879 = vmatprep.subr.mxu0 %v9534_v26  ;;  %4906 = vmatprep.subr.mxu1 %v9501_v27  ;;  %v9145_v27 = vand.u32 4294901760, %v6939_v11  ;;  %9541 = vst [vmem:[#allocation12_spill] sm:$0xff] %v6998_v14  ;;  %v7050_v9 = vsub.f32 %v6960_v51, %v9146_v25  ;;  %v7053_v36 = vsub.f32 %v99_v37, %v6998_v14  ;;  %v9555_v26 = vand.u32 4294901760, %v9554_v17  ;;  %v111_v17 = vld [vmem:[%s8998_s1 + $0x2b8] sm:$0xff] }
  0xcd   :  { %4880 = vmatpush3.msra.mxu0 %v9537_v15  ;;  %4907 = vmatpush3.msra.mxu1 %v9502_v52  ;;  %v9540_v52 = vand.u32 4294901760, %v6660_v3  ;;  %v9542_v3 = vand.u32 4294901760, %v6712_v10  ;;  %v9144_v10 = vand.u32 4294901760, %v6981_v19  ;;  %v7159_v8 = vand.u32 4294901760, %v111_v17 }
  0xce   :  { %4881 = vmatprep.subr.mxu0 %v9538_v24  ;;  %4908 = vmatprep.subr.mxu1 %v9503_v46  ;;  %v114_v46 = vld [vmem:[%s8998_s1 + $0x2d0] sm:$0xff]  ;;  %v7021_v30 = vsub.f32 %v6939_v11, %v9145_v27  ;;  %v7084_v24 = vand.u32 4294901760, %v96_v60 }
  0xcf   :  { %4882 = vmatpush3.msra.mxu0 %v9540_v52  ;;  %4909 = vmatpush3.msra.mxu1 %v9504_v13  ;;  %v7010_v13 = vsub.f32 %v100_v40, %v6968_v57  ;;  %v7030_v44 = vand.u32 4294901760, %v114_v46  ;;  %v112_v40 = vld [vmem:[%s8998_s1 + $0x2c0] sm:$0xff]  ;;  %v7080_v29 = vsub.f32 %v6981_v19, %v9144_v10  ;;  %v9559_v52 = vld [vmem:[#allocation25_spill] sm:$0xff]  ;;  %9565 = vst [vmem:[#allocation10_spill] sm:$0xff] %v7159_v8  ;;  %v93_v10 = vld [vmem:[%s8998_s1 + $0x228] sm:$0xff] }
  0xd0   :  { %4883 = vmatprep.subr.mxu0 %v9542_v3  ;;  %4910 = vmatprep.subr.mxu1 %v9505_v4  ;;  %v97_v4 = vld [vmem:[%s8998_s1 + $0x248] sm:$0xff]  ;;  %9558 = vst [vmem:[#allocation7_spill] sm:$0xff] %v7084_v24  ;;  %v7089_v3 = vsub.f32 %v98_v45, %v7032_v28  ;;  %v2144_v45 = vand.u32 4294901760, %v7050_v9  ;;  %v7111_v0 = vand.u32 4294901760, %v112_v40 }
  0xd1   :  { %4884 = vmatpush3.msra.mxu0 %v9544_v43  ;;  %4911 = vmatpush3.msra.mxu1 %v9506_v59  ;;  %9547 = vst [vmem:[#allocation19_spill] sm:$0xff] %v7030_v44  ;;  %v113_v59 = vld [vmem:[%s8998_s1 + $0x2c8] sm:$0xff]  ;;  %v7064_v38 = vand.u32 4294901760, %v97_v4  ;;  %v9139_v22 = vand.u32 4294901760, %v7010_v13  ;;  %v7094_v43 = vsub.f32 %v6989_v62, %v9141_v16 }
  0xd2   :  { %4885 = vmatprep.subr.mxu0 %v9545_v42  ;;  %4912 = vmatprep.subr.mxu1 %v9546_v55  ;;  %v7082_v15 = vand.u32 4294901760, %v113_v59  ;;  %v9143_v42 = vand.u32 4294901760, %v7039_v63  ;;  %v95_v55 = vld [vmem:[%s8998_s1 + $0x238] sm:$0xff]  ;;  %9561 = vst [vmem:[#allocation21_spill] sm:$0xff] %v7111_v0  ;;  %v7170_v27 = vsub.f32 %v112_v40, %v7111_v0  ;;  %v7211_v40 = vand.u32 4294901760, %v93_v10 }
  0xd3   :  { %4886 = vmatpush3.msra.mxu0 %v9549_v49  ;;  %4913 = vmatpush3.msra.mxu1 %v9550_v5  ;;  %9553 = vst [vmem:[#allocation4_spill] sm:$0xff] %v7064_v38  ;;  %v7101_v49 = vsub.f32 %v114_v46, %v7030_v44  ;;  %v7109_v5 = vsub.f32 %v6995_v31, %v9140_v6 }
  0xd4   :  { %4887 = vmatprep.subr.mxu0 %v9552_v41  ;;  %4914 = vmatprep.subr.mxu1 %v6556_v35  ;;  %v9556_v35 = vld [vmem:[#allocation26_spill] sm:$0xff]  ;;  %9557 = vst [vmem:[#allocation5_spill] sm:$0xff] %v7082_v15  ;;  %v9147_v41 = vand.u32 4294901760, %v7053_v36  ;;  %v7123_v9 = vsub.f32 %v7010_v13, %v9139_v22  ;;  %v94_v22 = vld [vmem:[%s8998_s1 + $0x230] sm:$0xff]  ;;  %v7141_v6 = vsub.f32 %v113_v59, %v7082_v15  ;;  %v9150_v59 = vand.u32 4294901760, %v7089_v3 }
  0xd5   :  { %4888 = vmatpush3.msra.mxu0 %v9555_v26  ;;  %1804 = vmatprep.mubr.f32.mxu0 %v9556_v35  ;;  %v9148_v26 = vand.u32 4294901760, %v7071_v47  ;;  %v9149_v16 = vand.u32 4294901760, %v7101_v49  ;;  %9566 = vst [vmem:[#allocation11_spill] sm:$0xff] %v7170_v27  ;;  %9570 = vst [vmem:[#allocation23_spill] sm:$0xff] %v7211_v40 }
  0xd6   :  { %4915 = vmatpush3.msra.mxu1 %v9559_v52  ;;  %1806 = vmatmul.mubr.f32.vlgmr.msra.gmra.mxu0 %v9560_v12  ;;  %v7135_v52 = vand.u32 4294901760, %v95_v55 }
  0xd7   :  { %4916 = vmatprep.subr.mxu1 %v6636_v23  ;;  %4927 = vmatprep.subr.mxu0 %v6922_v58  ;;  %v7118_v23 = vsub.f32 %v97_v4, %v7064_v38  ;;  %v7133_v4 = vsub.f32 %v96_v60, %v7084_v24  ;;  %v7149_v60 = vsub.f32 %v7039_v63, %v9143_v42 }
  0xd8   :  { %4917 = vmatpush3.msra.mxu1 %v6613_v61  ;;  %4928 = vmatpush3.msra.mxu0 %v6908_v21  ;;  %v2151_v61 = vand.u32 4294901760, %v7080_v29  ;;  %9564 = vst [vmem:[#allocation8_spill] sm:$0xff] %v7135_v52  ;;  %v110_v29 = vld [vmem:[%s8998_s1 + $0x2b0] sm:$0xff]  ;;  %v7164_v42 = vsub.f32 %v7053_v36, %v9147_v41  ;;  %v7178_v25 = vsub.f32 %v7071_v47, %v9148_v26  ;;  %v7180_v41 = vand.u32 4294901760, %v94_v22 }
  0xd9   :  { %9562 = vst [vmem:[#allocation6_spill] sm:$0xff] %v7118_v23  ;;  %4918 = vmatprep.subr.mxu1 %v9510_v53  ;;  %4929 = vmatprep.subr.mxu0 %v6941_v34  ;;  %9563 = vst [vmem:[#allocation9_spill] sm:$0xff] %v7133_v4  ;;  %v7194_v26 = vand.u32 4294901760, %v110_v29  ;;  %v2165_v37 = vand.u32 4294901760, %v7149_v60 }
  0xda   :  { %4919 = vmatpush3.msra.mxu1 %v6624_v56  ;;  %4930 = vmatpush3.msra.mxu0 %v6930_v18  ;;  %9567 = vst [vmem:[#allocation16_spill] sm:$0xff] %v7180_v41  ;;  %v109_v56 = vld [vmem:[%s8998_s1 + $0x2a8] sm:$0xff]  ;;  %v7227_v53 = vsub.f32 %v94_v22, %v7180_v41  ;;  %v9576_v22 = vand.u32 4294901760, %v7141_v6 }
  0xdb   :  { %4920 = vmatprep.subr.mxu1 %v6689_v54  ;;  %4931 = vmatprep.subr.mxu0 %v6949_v39  ;;  %v7192_v54 = vsub.f32 %v95_v55, %v7135_v52  ;;  %9569 = vst [vmem:[#allocation24_spill] sm:$0xff] %v7194_v26  ;;  %v7209_v55 = vsub.f32 %v7089_v3, %v9150_v59  ;;  %v7219_v60 = vand.u32 4294901760, %v109_v56  ;;  %v2172_v59 = vand.u32 4294901760, %v7178_v25 }
  0xdc   :  { %4921 = vmatpush3.msra.mxu1 %v6700_v7  ;;  %4932 = vmatpush3.msra.mxu0 %v6954_v33  ;;  %v92_v7 = vld [vmem:[%s8998_s1 + $0x220] sm:$0xff]  ;;  %v9575_v25 = vand.u32 4294901760, %v7021_v30  ;;  %v7272_v33 = vsub.f32 %v110_v29, %v7194_v26  ;;  %v90_v29 = vld [vmem:[%s8998_s1 + $0x210] sm:$0xff] }
  0xdd   :  { %4922 = vmatprep.subr.mxu1 %v6706_v2  ;;  %4933 = vmatprep.subr.mxu0 %v6986_v50  ;;  %9568 = vst [vmem:[#allocation17_spill] sm:$0xff] %v7192_v54  ;;  %v7204_v2 = vsub.f32 %v7101_v49, %v9149_v16  ;;  %9571 = vst [vmem:[#allocation28_spill] sm:$0xff] %v7219_v60  ;;  %v7222_v46 = vand.u32 4294901760, %v92_v7  ;;  %v91_v16 = vld [vmem:[%s8998_s1 + $0x218] sm:$0xff] }
  0xde   :  { %4923 = vmatpush3.msra.mxu1 %v6708_v20  ;;  %1908 = vmatprep.mubr.f32.mxu1 %v9556_v35  ;;  %v108_v20 = vld [vmem:[%s8998_s1 + $0x2a0] sm:$0xff]  ;;  %v7235_v35 = vsub.f32 %v111_v17, %v7159_v8 }
  0xdf   :  { %4934 = vmatpush3.msra.mxu0 %v6968_v57  ;;  %1910 = vmatmul.mubr.f32.vlgmr.msra.gmra.mxu1 %v9560_v12  ;;  %9572 = vst [vmem:[#allocation22_spill] sm:$0xff] %v7222_v46  ;;  %v9573_v57 = vand.u32 4294901760, %v7118_v23  ;;  %v7251_v17 = vand.u32 4294901760, %v108_v20  ;;  %v2179_v30 = vand.u32 4294901760, %v7204_v2 }
  0xe0   :  { %4935 = vmatprep.subr.mxu0 %v7012_v1  ;;  %4962 = vmatprep.subr.mxu1 %v2144_v45  ;;  %9574 = vst [vmem:[#allocation14_spill] sm:$0xff] %v7235_v35  ;;  %v19_v45 = vld [vmem:[%s8999_s0 + $0x28] sm:$0xff]  ;;  %v9577_v1 = vand.u32 4294901760, %v7133_v4 }
  0xe1   :  { %v7232_v12 = vsub.f32 %v7118_v23, %v9573_v57  ;;  %4936 = vmatpush3.msra.mxu0 %v6998_v14  ;;  %4963 = vmatpush3.msra.mxu1 %v9575_v25  ;;  %v7249_v57 = vsub.f32 %v7141_v6, %v9576_v22  ;;  %v18_v14 = vld [vmem:[%s8999_s0 + $0x20] sm:$0xff]  ;;  %v2067_v25 = vand.u32 4294901760, %v7209_v55  ;;  %v7266_v22 = vsub.f32 %v93_v10, %v7211_v40 }
  0xe2   :  { %v7256_v50 = vsub.f32 %v7133_v4, %v9577_v1  ;;  %4937 = vmatprep.subr.mxu0 %v7030_v44  ;;  %4964 = vmatprep.subr.mxu1 %v2151_v61  ;;  %v107_v1 = vld [vmem:[%s8998_s1 + $0x298] sm:$0xff]  ;;  %v9578_v4 = vand.u32 4294901760, %v7062_v48  ;;  %v9579_v61 = vand.u32 4294901760, %v7170_v27  ;;  %v7283_v10 = vsub.f32 %v92_v7, %v7222_v46  ;;  %v106_v7 = vld [vmem:[%s8998_s1 + $0x290] sm:$0xff] }
  0xe3   :  { %4938 = vmatpush3.msra.mxu0 %v7032_v28  ;;  %v7285_v55 = vand.u32 4294901760, %v91_v16  ;;  %v7290_v44 = vand.u32 4294901760, %v19_v45  ;;  %v9581_v48 = vand.u32 4294901760, %v7094_v43  ;;  %v7301_v28 = vsub.f32 %v109_v56, %v7219_v60  ;;  %v105_v56 = vld [vmem:[%s8998_s1 + $0x288] sm:$0xff] }
  0xe4   :  { %4965 = vmatpush3.msra.mxu1 %v9578_v4  ;;  %v7280_v2 = vsub.f32 %v7170_v27, %v9579_v61  ;;  %4939 = vmatprep.subr.mxu0 %v7082_v15  ;;  %v2074_v4 = vand.u32 4294901760, %v7232_v12  ;;  %v7303_v27 = vand.u32 4294901760, %v18_v14  ;;  %v9583_v15 = vand.u32 4294901760, %v7109_v5 }
  0xe5   :  { %9580 = vst [vmem:[#allocation13_spill] sm:$0xff] %v7290_v44  ;;  %4966 = vmatprep.subr.mxu1 %v9581_v48  ;;  %4940 = vmatpush3.msra.mxu0 %v7064_v38  ;;  %v2186_v43 = vand.u32 4294901760, %v7249_v57  ;;  %v2081_v12 = vand.u32 4294901760, %v7256_v50  ;;  %v7310_v48 = vand.u32 4294901760, %v107_v1  ;;  %v9584_v61 = vand.u32 4294901760, %v7192_v54  ;;  %v89_v57 = vld [vmem:[%s8998_s1 + $0x208] sm:$0xff] }
  0xe6   :  { %9582 = vst [vmem:[#allocation30_spill] sm:$0xff] %v7303_v27  ;;  %4967 = vmatpush3.msra.mxu1 %v9583_v15  ;;  %4941 = vmatprep.subr.mxu0 %v7111_v0  ;;  %v7322_v5 = vand.u32 4294901760, %v90_v29  ;;  %v9585_v38 = vand.u32 4294901760, %v7123_v9  ;;  %v7336_v15 = vsub.f32 %v91_v16, %v7285_v55  ;;  %v7338_v0 = vand.u32 4294901760, %v106_v7  ;;  %v104_v16 = vld [vmem:[%s8998_s1 + $0x280] sm:$0xff] }
  0xe7   :  { %v7315_v23 = vsub.f32 %v7192_v54, %v9584_v61  ;;  %4968 = vmatprep.subr.mxu1 %v2165_v37  ;;  %v7329_v61 = vsub.f32 %v108_v20, %v7251_v17  ;;  %4942 = vmatpush3.msra.mxu0 %v7084_v24  ;;  %v2193_v37 = vand.u32 4294901760, %v7280_v2  ;;  %v7341_v50 = vsub.f32 %v19_v45, %v7290_v44  ;;  %v88_v9 = vld [vmem:[%s8998_s1 + $0x200] sm:$0xff] }
  0xe8   :  { %4969 = vmatpush3.msra.mxu1 %v9585_v38  ;;  %9586 = vst [vmem:[#allocation29_spill] sm:$0xff] %v7338_v0  ;;  %4943 = vmatprep.subr.mxu0 %v7159_v8  ;;  %v9587_v20 = vand.u32 4294901760, %v7235_v35  ;;  %v7347_v54 = vand.u32 4294901760, %v105_v56  ;;  %v7357_v45 = vsub.f32 %v18_v14, %v7303_v27  ;;  %v7367_v8 = vsub.f32 %v107_v1, %v7310_v48 }
  0xe9   :  { %4970 = vmatprep.subr.mxu1 %v2172_v59  ;;  %4944 = vmatpush3.msra.mxu0 %v7135_v52  ;;  %v9588_v59 = vand.u32 4294901760, %v7164_v42  ;;  %v2088_v2 = vand.u32 4294901760, %v7315_v23  ;;  %v9589_v14 = vand.u32 4294901760, %v7272_v33  ;;  %v7374_v52 = vsub.f32 %v90_v29, %v7322_v5 }
  0xea   :  { %v2199_v24 = vsub.f32 %v7235_v35, %v9587_v20  ;;  %v7363_v20 = vand.u32 4294901760, %v89_v57  ;;  %4945 = vmatprep.subr.mxu0 %v7194_v26  ;;  %v9590_v42 = vand.u32 4294901760, %v7227_v53  ;;  %v7381_v1 = vand.u32 4294901760, %v104_v16  ;;  %2252 = vmatprep.mubr.f32.mxu1 %v7290_v44  ;;  %v9624_v44 = vld [vmem:[#allocation28_spill] sm:$0xff] }
  0xeb   :  { %4971 = vmatpush3.msra.mxu1 %v9588_v59  ;;  %v2206_v35 = vsub.f32 %v7272_v33, %v9589_v14  ;;  %4946 = vmatpush3.msra.mxu0 %v7180_v41  ;;  %v7383_v38 = vand.u32 4294901760, %v88_v9  ;;  %v7387_v14 = vsub.f32 %v106_v7, %v7338_v0  ;;  %v9592_v7 = vand.u32 4294901760, %v7266_v22 }
  0xec   :  { %4972 = vmatprep.subr.mxu1 %v2179_v30  ;;  %v2094_v23 = vsub.f32 %v7227_v53, %v9590_v42  ;;  %4947 = vmatprep.subr.mxu0 %v7219_v60  ;;  %v2200_v29 = vand.u32 4294901760, %v2199_v24  ;;  %v9591_v42 = vand.u32 4294901760, %v7301_v28  ;;  %v7397_v30 = vsub.f32 %v89_v57, %v7363_v20 }
  0xed   :  { %4973 = vmatpush3.msra.mxu1 %v2067_v25  ;;  %4948 = vmatpush3.msra.mxu0 %v7211_v40  ;;  %v2101_v60 = vsub.f32 %v7266_v22, %v9592_v7  ;;  %v9593_v41 = vand.u32 4294901760, %v7329_v61  ;;  %v7413_v7 = vsub.f32 %v88_v9, %v7383_v38  ;;  %v9598_v9 = vand.u32 4294901760, %v7357_v45 }
  0xee   :  { %4974 = vmatprep.subr.mxu1 %v2186_v43  ;;  %v2213_v59 = vsub.f32 %v7301_v28, %v9591_v42  ;;  %v7404_v43 = vsub.f32 %v105_v56, %v7347_v54  ;;  %4949 = vmatprep.subr.mxu0 %v7251_v17  ;;  %v2207_v42 = vand.u32 4294901760, %v2206_v35  ;;  %v2095_v25 = vand.u32 4294901760, %v2094_v23 }
  0xef   :  { %4975 = vmatpush3.msra.mxu1 %v2074_v4  ;;  %v2220_v4 = vsub.f32 %v7329_v61, %v9593_v41  ;;  %4950 = vmatpush3.msra.mxu0 %v7222_v46  ;;  %9594 = vst [vmem:[#allocation26_spill] sm:$0xff] %v7413_v7  ;;  %v9595_v56 = vand.u32 4294901760, %v7341_v50  ;;  %v7420_v35 = vsub.f32 %v104_v16, %v7381_v1  ;;  %v9597_v23 = vand.u32 4294901760, %v7283_v10 }
  0xf0   :  { %4976 = vmatprep.subr.mxu1 %v2193_v37  ;;  %4951 = vmatprep.subr.mxu0 %v7310_v48  ;;  %v2214_v41 = vand.u32 4294901760, %v2213_v59  ;;  %v2020_v57 = vsub.f32 %v7357_v45, %v9598_v9  ;;  %v9599_v16 = vand.u32 4294901760, %v7367_v8  ;;  %v9195_v46 = vand.u32 4294901760, %v7413_v7 }
  0xf1   :  { %4977 = vmatpush3.msra.mxu1 %v2081_v12  ;;  %v2014_v24 = vsub.f32 %v7341_v50, %v9595_v56  ;;  %9596 = vst [vmem:[#allocation25_spill] sm:$0xff] %v7420_v35  ;;  %v2108_v12 = vsub.f32 %v7283_v10, %v9597_v23  ;;  %4952 = vmatpush3.msra.mxu0 %v7285_v55  ;;  %v2102_v56 = vand.u32 4294901760, %v2101_v60  ;;  %v9600_v23 = vand.u32 4294901760, %v7336_v15 }
  0xf2   :  { %4978 = vmatprep.subr.mxu1 %v2200_v29  ;;  %v2227_v37 = vsub.f32 %v7367_v8, %v9599_v16  ;;  %4953 = vmatprep.subr.mxu0 %v7338_v0  ;;  %v2221_v29 = vand.u32 4294901760, %v2220_v4  ;;  %v9196_v59 = vand.u32 4294901760, %v7420_v35  ;;  %v2021_v4 = vand.u32 4294901760, %v2020_v57 }
  0xf3   :  { %4979 = vmatpush3.msra.mxu1 %v2088_v2  ;;  %v2115_v9 = vsub.f32 %v7336_v15, %v9600_v23  ;;  %4954 = vmatpush3.msra.mxu0 %v7322_v5  ;;  %v2015_v60 = vand.u32 4294901760, %v2014_v24  ;;  %v9601_v2 = vand.u32 4294901760, %v7387_v14  ;;  %v9602_v0 = vand.u32 4294901760, %v7374_v52 }
  0xf4   :  { %4980 = vmatprep.subr.mxu1 %v2207_v42  ;;  %4955 = vmatprep.subr.mxu0 %v7347_v54  ;;  %v2109_v42 = vand.u32 4294901760, %v2108_v12  ;;  %v9603_v24 = vand.u32 4294901760, %v7404_v43  ;;  %v9604_v57 = vand.u32 4294901760, %v7397_v30 }
  0xf5   :  { %4981 = vmatpush3.msra.mxu1 %v2095_v25  ;;  %v2234_v16 = vsub.f32 %v7387_v14, %v9601_v2  ;;  %v2122_v23 = vsub.f32 %v7374_v52, %v9602_v0  ;;  %4956 = vmatpush3.msra.mxu0 %v7363_v20  ;;  %v2228_v25 = vand.u32 4294901760, %v2227_v37  ;;  %v2248_v37 = vsub.f32 %v7420_v35, %v9196_v59  ;;  %v9622_v59 = vld [vmem:[#allocation8_spill] sm:$0xff] }
  0xf6   :  { %4982 = vmatprep.subr.mxu1 %v2214_v41  ;;  %v2241_v2 = vsub.f32 %v7404_v43, %v9603_v24  ;;  %4957 = vmatprep.subr.mxu0 %v7381_v1  ;;  %v2116_v41 = vand.u32 4294901760, %v2115_v9  ;;  %v2129_v12 = vsub.f32 %v7397_v30, %v9604_v57  ;;  %v9608_v24 = vld [vmem:[#allocation18_spill] sm:$0xff] }
  0xf7   :  { %4983 = vmatpush3.msra.mxu1 %v2102_v56  ;;  %4958 = vmatpush3.msra.mxu0 %v7383_v38  ;;  %v2235_v0 = vand.u32 4294901760, %v2234_v16  ;;  %v2123_v56 = vand.u32 4294901760, %v2122_v23  ;;  %v2249_v16 = vand.u32 4294901760, %v2248_v37  ;;  %v9606_v23 = vld [vmem:[#allocation2_spill] sm:$0xff]  ;;  %v9614_v37 = vld [vmem:[#allocation12_spill] sm:$0xff] }
  0xf8   :  { %4984 = vmatprep.subr.mxu1 %v2221_v29  ;;  %2016 = vmatprep.mubr.f32.mxu0 %v2015_v60  ;;  %v2136_v29 = vsub.f32 %v7413_v7, %v9195_v46  ;;  %v2242_v9 = vand.u32 4294901760, %v2241_v2  ;;  %v2130_v60 = vand.u32 4294901760, %v2129_v12  ;;  %v9609_v2 = vld [vmem:[#allocation9_spill] sm:$0xff]  ;;  %v9611_v57 = vld [vmem:[#allocation14_spill] sm:$0xff]  ;;  %v9612_v12 = vld [vmem:[#allocation3_spill] sm:$0xff] }
  0xf9   :  { %4985 = vmatpush3.msra.mxu1 %v2109_v42  ;;  %2022 = vmatmul.mubr.f32.vlgmr.msra.gmra.mxu0 %v2021_v4  ;;  %v9605_v4 = vld [vmem:[#allocation6_spill] sm:$0xff] }
  0xfa   :  { %4986 = vmatprep.subr.mxu1 %v2228_v25  ;;  %4997 = vmatprep.subr.mxu0 %v6960_v51  ;;  %v2137_v42 = vand.u32 4294901760, %v2136_v29  ;;  %v9607_v25 = vld [vmem:[#allocation11_spill] sm:$0xff]  ;;  %v9616_v29 = vld [vmem:[#allocation20_spill] sm:$0xff]  ;;  %v9621_v46 = vld [vmem:[#allocation10_spill] sm:$0xff] }
  0xfb   :  { %4987 = vmatpush3.msra.mxu1 %v2116_v41  ;;  %4998 = vmatpush3.msra.mxu0 %v6939_v11  ;;  %v9610_v41 = vld [vmem:[#allocation15_spill] sm:$0xff] }
  0xfc   :  { %4988 = vmatprep.subr.mxu1 %v2235_v0  ;;  %4999 = vmatprep.subr.mxu0 %v6981_v19  ;;  %v9613_v0 = vld [vmem:[#allocation17_spill] sm:$0xff] }
  0xfd   :  { %4989 = vmatpush3.msra.mxu1 %v2123_v56  ;;  %5000 = vmatpush3.msra.mxu0 %v6966_v32  ;;  %v9615_v56 = vld [vmem:[#allocation19_spill] sm:$0xff] }
  0xfe   :  { %4990 = vmatprep.subr.mxu1 %v2242_v9  ;;  %5001 = vmatprep.subr.mxu0 %v6989_v62  ;;  %v9617_v9 = vld [vmem:[#allocation5_spill] sm:$0xff] }
  0xff   :  { %4991 = vmatpush3.msra.mxu1 %v2130_v60  ;;  %5002 = vmatpush3.msra.mxu0 %v6995_v31  ;;  %v9618_v60 = vld [vmem:[#allocation4_spill] sm:$0xff] }
 0x100   :  { %4992 = vmatprep.subr.mxu1 %v2249_v16  ;;  %5003 = vmatprep.subr.mxu0 %v7039_v63  ;;  %v9619_v16 = vld [vmem:[#allocation21_spill] sm:$0xff] }
 0x101   :  { %4993 = vmatpush3.msra.mxu1 %v2137_v42  ;;  %5004 = vmatpush3.msra.mxu0 %v7010_v13  ;;  %v9620_v42 = vld [vmem:[#allocation7_spill] sm:$0xff] }
 0x102   :  { %2254 = vmatmul.mubr.f32.vlgmr.msra.gmra.mxu1 %v7303_v27  ;;  %5005 = vmatprep.subr.mxu0 %v7071_v47  ;;  %v9623_v27 = vld [vmem:[#allocation16_spill] sm:$0xff] }
 0x103   :  { %5032 = vmatprep.subr.mxu1 %v6922_v58  ;;  %5006 = vmatpush3.msra.mxu0 %v7053_v36 }
 0x104   :  { %5033 = vmatpush3.msra.mxu1 %v6908_v21  ;;  %5007 = vmatprep.subr.mxu0 %v7101_v49 }
 0x105   :  { %5034 = vmatprep.subr.mxu1 %v6941_v34  ;;  %5008 = vmatpush3.msra.mxu0 %v7089_v3 }
 0x106   :  { %5035 = vmatpush3.msra.mxu1 %v6930_v18  ;;  %5009 = vmatprep.subr.mxu0 %v7141_v6 }
 0x107   :  { %5036 = vmatprep.subr.mxu1 %v6949_v39  ;;  %5010 = vmatpush3.msra.mxu0 %v9605_v4 }
 0x108   :  { %5037 = vmatpush3.msra.mxu1 %v9606_v23  ;;  %5011 = vmatprep.subr.mxu0 %v9607_v25 }
 0x109   :  { %5038 = vmatprep.subr.mxu1 %v9608_v24  ;;  %5012 = vmatpush3.msra.mxu0 %v9609_v2 }
 0x10a   :  { %5039 = vmatpush3.msra.mxu1 %v9610_v41  ;;  %5013 = vmatprep.subr.mxu0 %v9611_v57 }
 0x10b   :  { %5040 = vmatprep.subr.mxu1 %v9612_v12  ;;  %5014 = vmatpush3.msra.mxu0 %v9613_v0 }
 0x10c   :  { %5041 = vmatpush3.msra.mxu1 %v9614_v37  ;;  %5015 = vmatprep.subr.mxu0 %v7272_v33 }
 0x10d   :  { %5042 = vmatprep.subr.mxu1 %v9615_v56  ;;  %5016 = vmatpush3.msra.mxu0 %v7227_v53 }
 0x10e   :  { %5043 = vmatpush3.msra.mxu1 %v9616_v29  ;;  %5017 = vmatprep.subr.mxu0 %v7301_v28 }
 0x10f   :  { %5044 = vmatprep.subr.mxu1 %v9617_v9  ;;  %5018 = vmatpush3.msra.mxu0 %v7266_v22 }
 0x110   :  { %5045 = vmatpush3.msra.mxu1 %v9618_v60  ;;  %5019 = vmatprep.subr.mxu0 %v7329_v61 }
 0x111   :  { %5046 = vmatprep.subr.mxu1 %v9619_v16  ;;  %5020 = vmatpush3.msra.mxu0 %v7283_v10 }
 0x112   :  { %5047 = vmatpush3.msra.mxu1 %v9620_v42  ;;  %5021 = vmatprep.subr.mxu0 %v7367_v8 }
 0x113   :  { %5048 = vmatprep.subr.mxu1 %v9621_v46  ;;  %5022 = vmatpush3.msra.mxu0 %v7336_v15 }
 0x114   :  { %5049 = vmatpush3.msra.mxu1 %v9622_v59  ;;  %5023 = vmatprep.subr.mxu0 %v7387_v14 }
 0x115   :  { %5050 = vmatprep.subr.mxu1 %v7194_v26  ;;  %5024 = vmatpush3.msra.mxu0 %v7374_v52  ;;  %v9625_v26 = vld [vmem:[#allocation22_spill] sm:$0xff] }
 0x116   :  { %5051 = vmatpush3.msra.mxu1 %v9623_v27  ;;  %5025 = vmatprep.subr.mxu0 %v7404_v43 }
 0x117   :  { %5052 = vmatprep.subr.mxu1 %v9624_v44  ;;  %5026 = vmatpush3.msra.mxu0 %v7397_v30  ;;  %v9626_v44 = vand.u32 4294901760, %v6960_v51  ;;  %v9631_v51 = vand.u32 4294901760, %v6989_v62  ;;  %v9636_v62 = vand.u32 4294901760, %v7357_v45 }
 0x118   :  { %5053 = vmatpush3.msra.mxu1 %v7211_v40  ;;  %5027 = vmatprep.subr.mxu0 %v7420_v35  ;;  %v9627_v40 = vand.u32 4294901760, %v6939_v11  ;;  %v9628_v35 = vld [vmem:[#allocation29_spill] sm:$0xff]  ;;  %v9632_v11 = vand.u32 4294901760, %v6995_v31  ;;  %v9638_v31 = vand.u32 4294901760, %v7053_v36  ;;  %v150_v36 = vld [vmem:[%s8998_s1 + $0x3f0] sm:$0xff] }
 0x119   :  { %5054 = vmatprep.subr.mxu1 %v7251_v17  ;;  %5028 = vmatpush3.msra.mxu0 %v7413_v7  ;;  %v9629_v7 = vand.u32 4294901760, %v6981_v19  ;;  %v9633_v19 = vand.u32 4294901760, %v7039_v63  ;;  %v9639_v63 = vand.u32 4294901760, %v7101_v49  ;;  %v9646_v49 = vand.u32 4294901760, %v9613_v0 }
 0x11a   :  { %2389 = vmatprep.mubr.f32.mxu0 %v7341_v50  ;;  %5055 = vmatpush3.msra.mxu1 %v9625_v26  ;;  %v9630_v26 = vand.u32 4294901760, %v6966_v32  ;;  %v9634_v32 = vand.u32 4294901760, %v7341_v50  ;;  %v134_v50 = vld [vmem:[%s8998_s1 + $0x370] sm:$0xff]  ;;  %v9652_v0 = vand.u32 4294901760, %v7329_v61 }
 0x11b   :  { %2392 = vmatmul.mubr.f32.vlgmr.msra.gmra.mxu0 %v7357_v45  ;;  %5056 = vmatprep.subr.mxu1 %v7310_v48  ;;  %v149_v45 = vld [vmem:[%s8998_s1 + $0x3e8] sm:$0xff] }
 0x11c   :  { %5067 = vmatprep.subr.mxu0 %v9626_v44  ;;  %5057 = vmatpush3.msra.mxu1 %v7285_v55  ;;  %v9635_v44 = vand.u32 4294901760, %v7010_v13  ;;  %v9640_v13 = vand.u32 4294901760, %v7089_v3 }
 0x11d   :  { %5068 = vmatpush3.msra.mxu0 %v9627_v40  ;;  %5058 = vmatprep.subr.mxu1 %v9628_v35 }
 0x11e   :  { %5069 = vmatprep.subr.mxu0 %v9629_v7  ;;  %5059 = vmatpush3.msra.mxu1 %v7322_v5  ;;  %v9647_v7 = vand.u32 4294901760, %v7272_v33  ;;  %v7616_v33 = vand.u32 4294901760, %v134_v50 }
 0x11f   :  { %5070 = vmatpush3.msra.mxu0 %v9630_v26  ;;  %5060 = vmatprep.subr.mxu1 %v7347_v54  ;;  %v9637_v26 = vand.u32 4294901760, %v7071_v47  ;;  %v9641_v47 = vand.u32 4294901760, %v7141_v6  ;;  %v9645_v6 = vand.u32 4294901760, %v9611_v57 }
 0x120   :  { %5071 = vmatprep.subr.mxu0 %v9631_v51  ;;  %5061 = vmatpush3.msra.mxu1 %v7363_v20  ;;  %v9657_v51 = vand.u32 4294901760, %v7367_v8 }
 0x121   :  { %5072 = vmatpush3.msra.mxu0 %v9632_v11  ;;  %5062 = vmatprep.subr.mxu1 %v7381_v1  ;;  %v146_v11 = vld [vmem:[%s8998_s1 + $0x3d0] sm:$0xff] }
 0x122   :  { %5073 = vmatprep.subr.mxu0 %v9633_v19  ;;  %5063 = vmatpush3.msra.mxu1 %v7383_v38 }
 0x123   :  { %2496 = vmatprep.mubr.f32.mxu1 %v9634_v32  ;;  %5074 = vmatpush3.msra.mxu0 %v9635_v44  ;;  %v9658_v32 = vand.u32 4294901760, %v7336_v15  ;;  %v145_v44 = vld [vmem:[%s8998_s1 + $0x3c8] sm:$0xff] }
 0x124   :  { %2500 = vmatmul.mubr.f32.vlgmr.msra.gmra.mxu1 %v9636_v62  ;;  %5075 = vmatprep.subr.mxu0 %v9637_v26  ;;  %v9660_v62 = vand.u32 4294901760, %v7387_v14  ;;  %v9661_v26 = vld [vmem:[#allocation24_spill] sm:$0xff]  ;;  %v7698_v14 = vand.u32 4294901760, %v146_v11 }
 0x125   :  { %5102 = vmatprep.subr.mxu1 %v6922_v58  ;;  %5076 = vmatpush3.msra.mxu0 %v9638_v31  ;;  %v9642_v58 = vand.u32 4294901760, %v9605_v4  ;;  %v7605_v4 = vand.u32 4294901760, %v150_v36 }
 0x126   :  { %5103 = vmatpush3.msra.mxu1 %v6908_v21  ;;  %5077 = vmatprep.subr.mxu0 %v9639_v63  ;;  %v151_v21 = vld [vmem:[%s8998_s1 + $0x3f8] sm:$0xff]  ;;  %9665 = vst [vmem:[#allocation14_spill] sm:$0xff] %v7698_v14 }
 0x127   :  { %5104 = vmatprep.subr.mxu1 %v6941_v34  ;;  %5078 = vmatpush3.msra.mxu0 %v9640_v13  ;;  %v9643_v34 = vand.u32 4294901760, %v9607_v25  ;;  %v7589_v3 = vand.u32 4294901760, %v151_v21  ;;  %v133_v25 = vld [vmem:[%s8998_s1 + $0x368] sm:$0xff]  ;;  %v9664_v13 = vand.u32 4294901760, %v7374_v52 }
 0x128   :  { %5105 = vmatpush3.msra.mxu1 %v6930_v18  ;;  %5079 = vmatprep.subr.mxu0 %v9641_v47  ;;  %v135_v18 = vld [vmem:[%s8998_s1 + $0x378] sm:$0xff] }
 0x129   :  { %5106 = vmatprep.subr.mxu1 %v6949_v39  ;;  %5080 = vmatpush3.msra.mxu0 %v9642_v58  ;;  %v9644_v39 = vand.u32 4294901760, %v9609_v2  ;;  %v7594_v40 = vand.u32 4294901760, %v135_v18  ;;  %v7618_v2 = vand.u32 4294901760, %v149_v45  ;;  %v7627_v57 = vsub.f32 %v151_v21, %v7589_v3 }
 0x12a   :  { %5107 = vmatpush3.msra.mxu1 %v9606_v23  ;;  %5081 = vmatprep.subr.mxu0 %v9643_v34  ;;  %v9648_v23 = vand.u32 4294901760, %v7227_v53  ;;  %v148_v53 = vld [vmem:[%s8998_s1 + $0x3e0] sm:$0xff]  ;;  %v9666_v21 = vand.u32 4294901760, %v7404_v43  ;;  %v9667_v34 = vld [vmem:[#allocation28_spill] sm:$0xff]  ;;  %v9669_v43 = vand.u32 4294901760, %v7397_v30 }
 0x12b   :  { %5108 = vmatprep.subr.mxu1 %v9608_v24  ;;  %5082 = vmatpush3.msra.mxu0 %v9644_v39  ;;  %v9649_v24 = vand.u32 4294901760, %v7301_v28  ;;  %9650 = vst [vmem:[#allocation27_spill] sm:$0xff] %v7618_v2  ;;  %v9651_v28 = vand.u32 4294901760, %v7266_v22  ;;  %v9654_v22 = vand.u32 4294901760, %v7283_v10  ;;  %v7663_v10 = vsub.f32 %v134_v50, %v7616_v33 }
 0x12c   :  { %5109 = vmatpush3.msra.mxu1 %v9610_v41  ;;  %5083 = vmatprep.subr.mxu0 %v9645_v6  ;;  %v132_v41 = vld [vmem:[%s8998_s1 + $0x360] sm:$0xff]  ;;  %v7670_v19 = vsub.f32 %v149_v45, %v7618_v2  ;;  %v9670_v6 = vld [vmem:[#allocation23_spill] sm:$0xff]  ;;  %v9671_v45 = vld [vmem:[#allocation25_spill] sm:$0xff] }
 0x12d   :  { %5110 = vmatprep.subr.mxu1 %v9612_v12  ;;  %5084 = vmatpush3.msra.mxu0 %v9646_v49  ;;  %v7633_v12 = vsub.f32 %v135_v18, %v7594_v40  ;;  %v7651_v61 = vand.u32 4294901760, %v132_v41  ;;  %v7712_v18 = vand.u32 4294901760, %v145_v44 }
 0x12e   :  { %5111 = vmatpush3.msra.mxu1 %v9614_v37  ;;  %5085 = vmatprep.subr.mxu0 %v9647_v7  ;;  %v7638_v37 = vand.u32 4294901760, %v133_v25  ;;  %v9206_v39 = vand.u32 4294901760, %v7670_v19  ;;  %v9672_v7 = vand.u32 4294901760, %v9671_v45 }
 0x12f   :  { %5112 = vmatprep.subr.mxu1 %v9615_v56  ;;  %5086 = vmatpush3.msra.mxu0 %v9648_v23  ;;  %v147_v56 = vld [vmem:[%s8998_s1 + $0x3d8] sm:$0xff]  ;;  %9656 = vst [vmem:[#allocation11_spill] sm:$0xff] %v7651_v61  ;;  %v7696_v47 = vsub.f32 %v132_v41, %v7651_v61  ;;  %9668 = vst [vmem:[#allocation3_spill] sm:$0xff] %v7712_v18  ;;  %v9673_v41 = vld [vmem:[#allocation26_spill] sm:$0xff] }
 0x130   :  { %5113 = vmatpush3.msra.mxu1 %v9616_v29  ;;  %5087 = vmatprep.subr.mxu0 %v9649_v24  ;;  %9653 = vst [vmem:[#allocation6_spill] sm:$0xff] %v7638_v37  ;;  %v7644_v29 = vsub.f32 %v150_v36, %v7605_v4  ;;  %v7675_v8 = vand.u32 4294901760, %v147_v56  ;;  %v7685_v31 = vsub.f32 %v133_v25, %v7638_v37  ;;  %v129_v36 = vld [vmem:[%s8998_s1 + $0x348] sm:$0xff] }
 0x131   :  { %5114 = vmatprep.subr.mxu1 %v9617_v9  ;;  %5088 = vmatpush3.msra.mxu0 %v9651_v28  ;;  %v7649_v9 = vand.u32 4294901760, %v148_v53  ;;  %v9674_v28 = vand.u32 4294901760, %v9673_v41 }
 0x132   :  { %5115 = vmatpush3.msra.mxu1 %v9618_v60  ;;  %5089 = vmatprep.subr.mxu0 %v9652_v0  ;;  %v131_v60 = vld [vmem:[%s8998_s1 + $0x358] sm:$0xff]  ;;  %9659 = vst [vmem:[#allocation18_spill] sm:$0xff] %v7675_v8  ;;  %v7727_v50 = vsub.f32 %v147_v56, %v7675_v8  ;;  %v9205_v24 = vand.u32 4294901760, %v7685_v31  ;;  %v7753_v56 = vand.u32 4294901760, %v129_v36 }
 0x133   :  { %5116 = vmatprep.subr.mxu1 %v9619_v16  ;;  %5090 = vmatpush3.msra.mxu0 %v9654_v22  ;;  %9655 = vst [vmem:[#allocation2_spill] sm:$0xff] %v7649_v9  ;;  %v130_v16 = vld [vmem:[%s8998_s1 + $0x350] sm:$0xff]  ;;  %v7687_v15 = vand.u32 4294901760, %v131_v60  ;;  %v7701_v58 = vsub.f32 %v148_v53, %v7649_v9  ;;  %v144_v53 = vld [vmem:[%s8998_s1 + $0x3c0] sm:$0xff]  ;;  %v9675_v0 = vld [vmem:[#allocation13_spill] sm:$0xff] }
 0x134   :  { %5117 = vmatpush3.msra.mxu1 %v9620_v42  ;;  %5091 = vmatprep.subr.mxu0 %v9657_v51  ;;  %v9212_v42 = vand.u32 4294901760, %v7627_v57  ;;  %v7690_v63 = vand.u32 4294901760, %v130_v16  ;;  %9676 = vst [vmem:[#allocation17_spill] sm:$0xff] %v7753_v56  ;;  %v9677_v51 = vld [vmem:[#allocation22_spill] sm:$0xff]  ;;  %v9213_v45 = vand.u32 4294901760, %v7727_v50 }
 0x135   :  { %5118 = vmatprep.subr.mxu1 %v9621_v46  ;;  %5092 = vmatpush3.msra.mxu0 %v9658_v32  ;;  %v9211_v46 = vand.u32 4294901760, %v7633_v12  ;;  %9662 = vst [vmem:[#allocation9_spill] sm:$0xff] %v7687_v15  ;;  %v7733_v23 = vsub.f32 %v131_v60, %v7687_v15  ;;  %v9207_v22 = vand.u32 4294901760, %v7701_v58  ;;  %v9210_v60 = vand.u32 4294901760, %v7696_v47  ;;  %v9678_v32 = vld [vmem:[#allocation30_spill] sm:$0xff] }
 0x136   :  { %5119 = vmatpush3.msra.mxu1 %v9622_v59  ;;  %5093 = vmatprep.subr.mxu0 %v9660_v62  ;;  %v9209_v59 = vand.u32 4294901760, %v7644_v29  ;;  %9663 = vst [vmem:[#allocation15_spill] sm:$0xff] %v7690_v63  ;;  %v7709_v52 = vsub.f32 %v7627_v57, %v9212_v42  ;;  %v7741_v25 = vsub.f32 %v130_v16, %v7690_v63  ;;  %v21_v62 = vld [vmem:[%s8999_s0 + $0x38] sm:$0xff] }
 0x137   :  { %5120 = vmatprep.subr.mxu1 %v9661_v26  ;;  %5094 = vmatpush3.msra.mxu0 %v9664_v13  ;;  %v7724_v49 = vsub.f32 %v7633_v12, %v9211_v46  ;;  %v7758_v16 = vsub.f32 %v146_v11, %v7698_v14  ;;  %v7771_v13 = vsub.f32 %v7670_v19, %v9206_v39  ;;  %v9214_v41 = vand.u32 4294901760, %v7733_v23 }
 0x138   :  { %5121 = vmatpush3.msra.mxu1 %v9623_v27  ;;  %5095 = vmatprep.subr.mxu0 %v9666_v21  ;;  %v9208_v27 = vand.u32 4294901760, %v7663_v10  ;;  %v7738_v30 = vsub.f32 %v7644_v29, %v9209_v59  ;;  %v7774_v21 = vsub.f32 %v145_v44, %v7712_v18  ;;  %v7793_v44 = vsub.f32 %v7685_v31, %v9205_v24 }
 0x139   :  { %5122 = vmatprep.subr.mxu1 %v9667_v34  ;;  %5096 = vmatpush3.msra.mxu0 %v9669_v43  ;;  %v7779_v34 = vand.u32 4294901760, %v144_v53  ;;  %v7813_v24 = vsub.f32 %v7696_v47, %v9210_v60  ;;  %v9216_v39 = vand.u32 4294901760, %v7758_v16 }
 0x13a   :  { %5123 = vmatpush3.msra.mxu1 %v9670_v6  ;;  %5097 = vmatprep.subr.mxu0 %v9672_v7  ;;  %v7766_v26 = vsub.f32 %v7663_v10, %v9208_v27  ;;  %v143_v6 = vld [vmem:[%s8998_s1 + $0x3b8] sm:$0xff]  ;;  %v9217_v59 = vand.u32 4294901760, %v7774_v21 }
 0x13b   :  { %5124 = vmatprep.subr.mxu1 %v7251_v17  ;;  %v128_v17 = vld [vmem:[%s8998_s1 + $0x340] sm:$0xff]  ;;  %5098 = vmatpush3.msra.mxu0 %v9674_v28  ;;  %9679 = vst [vmem:[#allocation12_spill] sm:$0xff] %v7779_v34  ;;  %v127_v7 = vld [vmem:[%s8998_s1 + $0x338] sm:$0xff]  ;;  %v9215_v28 = vand.u32 4294901760, %v7741_v25  ;;  %v7823_v27 = vand.u32 4294901760, %v143_v6  ;;  %v7845_v42 = vsub.f32 %v144_v53, %v7779_v34 }
 0x13c   :  { %2666 = vmatprep.mubr.f32.mxu0 %v9675_v0  ;;  %5125 = vmatpush3.msra.mxu1 %v9677_v51  ;;  %v7781_v43 = vand.u32 4294901760, %v128_v17  ;;  %v7808_v51 = vsub.f32 %v7701_v58, %v9207_v22  ;;  %v7836_v46 = vand.u32 4294901760, %v127_v7 }
 0x13d   :  { %2668 = vmatmul.mubr.f32.vlgmr.msra.gmra.mxu0 %v9678_v32  ;;  %5126 = vmatprep.subr.mxu1 %v7310_v48  ;;  %9682 = vst [vmem:[#allocation5_spill] sm:$0xff] %v7823_v27  ;;  %9685 = vst [vmem:[#allocation7_spill] sm:$0xff] %v7845_v42  ;;  %v7860_v48 = vsub.f32 %v7741_v25, %v9215_v28  ;;  %v124_v28 = vld [vmem:[%s8998_s1 + $0x320] sm:$0xff] }
 0x13e   :  { %5137 = vmatprep.subr.mxu0 %v7589_v3  ;;  %9680 = vst [vmem:[#allocation19_spill] sm:$0xff] %v7781_v43  ;;  %5127 = vmatpush3.msra.mxu1 %v7285_v55  ;;  %v7803_v55 = vsub.f32 %v129_v36, %v7753_v56  ;;  %v2901_v36 = vand.u32 4294901760, %v7766_v26  ;;  %v7829_v60 = vsub.f32 %v128_v17, %v7781_v43  ;;  %9684 = vst [vmem:[#allocation21_spill] sm:$0xff] %v7836_v46  ;;  %v142_v26 = vld [vmem:[%s8998_s1 + $0x3b0] sm:$0xff] }
 0x13f   :  { %5138 = vmatpush3.msra.mxu0 %v7594_v40  ;;  %5128 = vmatprep.subr.mxu1 %v9628_v35  ;;  %v126_v35 = vld [vmem:[%s8998_s1 + $0x330] sm:$0xff]  ;;  %v2908_v17 = vand.u32 4294901760, %v7793_v44  ;;  %v7869_v44 = vsub.f32 %v7758_v16, %v9216_v39  ;;  %v140_v39 = vld [vmem:[%s8998_s1 + $0x3a0] sm:$0xff]  ;;  %v7930_v11 = vand.u32 4294901760, %v124_v28 }
 0x140   :  { %5139 = vmatprep.subr.mxu0 %v7605_v4  ;;  %9681 = vst [vmem:[#allocation20_spill] sm:$0xff] %v7803_v55  ;;  %5129 = vmatpush3.msra.mxu1 %v7322_v5  ;;  %9683 = vst [vmem:[#allocation4_spill] sm:$0xff] %v7829_v60  ;;  %v7834_v5 = vsub.f32 %v7727_v50, %v9213_v45  ;;  %v7853_v45 = vsub.f32 %v7733_v23, %v9214_v41  ;;  %v7855_v22 = vand.u32 4294901760, %v126_v35  ;;  %v141_v41 = vld [vmem:[%s8998_s1 + $0x3a8] sm:$0xff] }
 0x141   :  { %5140 = vmatpush3.msra.mxu0 %v7616_v33  ;;  %5130 = vmatprep.subr.mxu1 %v7347_v54  ;;  %v125_v54 = vld [vmem:[%s8998_s1 + $0x328] sm:$0xff]  ;;  %9694 = vst [vmem:[#allocation28_spill] sm:$0xff] %v7930_v11 }
 0x142   :  { %5141 = vmatprep.subr.mxu0 %v7618_v2  ;;  %5131 = vmatpush3.msra.mxu1 %v7363_v20  ;;  %9686 = vst [vmem:[#allocation10_spill] sm:$0xff] %v7855_v22  ;;  %v3027_v20 = vand.u32 4294901760, %v7808_v51  ;;  %v7882_v51 = vsub.f32 %v7774_v21, %v9217_v59  ;;  %v7884_v53 = vand.u32 4294901760, %v125_v54  ;;  %v7899_v59 = vsub.f32 %v127_v7, %v7836_v46  ;;  %v123_v7 = vld [vmem:[%s8998_s1 + $0x318] sm:$0xff] }
 0x143   :  { %5142 = vmatpush3.msra.mxu0 %v7638_v37  ;;  %5132 = vmatprep.subr.mxu1 %v7381_v1  ;;  %v7877_v1 = vand.u32 4294901760, %v142_v26  ;;  %v7968_v37 = vand.u32 4294901760, %v21_v62  ;;  %v7984_v2 = vsub.f32 %v124_v28, %v7930_v11  ;;  %v137_v28 = vld [vmem:[%s8998_s1 + $0x388] sm:$0xff] }
 0x144   :  { %5143 = vmatprep.subr.mxu0 %v7649_v9  ;;  %5133 = vmatpush3.msra.mxu1 %v7383_v38  ;;  %9688 = vst [vmem:[#allocation16_spill] sm:$0xff] %v7884_v53  ;;  %v7893_v38 = vsub.f32 %v143_v6, %v7823_v27  ;;  %v9689_v9 = vand.u32 4294901760, %v7709_v52  ;;  %v2922_v6 = vand.u32 4294901760, %v7853_v45  ;;  %v3041_v52 = vand.u32 4294901760, %v7869_v44 }
 0x145   :  { %2770 = vmatprep.mubr.f32.mxu1 %v9675_v0  ;;  %9687 = vst [vmem:[#allocation8_spill] sm:$0xff] %v7877_v1  ;;  %5144 = vmatpush3.msra.mxu0 %v7651_v61  ;;  %v3034_v0 = vand.u32 4294901760, %v7834_v5  ;;  %v7908_v61 = vsub.f32 %v126_v35, %v7855_v22  ;;  %v7911_v5 = vand.u32 4294901760, %v141_v41  ;;  %v9693_v45 = vand.u32 4294901760, %v7803_v55  ;;  %9698 = vst [vmem:[#allocation23_spill] sm:$0xff] %v7968_v37 }
 0x146   :  { %2772 = vmatmul.mubr.f32.vlgmr.msra.gmra.mxu1 %v9678_v32  ;;  %5145 = vmatprep.subr.mxu0 %v7675_v8  ;;  %v7928_v32 = vand.u32 4294901760, %v140_v39  ;;  %v122_v8 = vld [vmem:[%s8998_s1 + $0x310] sm:$0xff]  ;;  %v9695_v44 = vand.u32 4294901760, %v7738_v30  ;;  %v9696_v30 = vand.u32 4294901760, %v7845_v42  ;;  %9701 = vst [vmem:[#allocation26_spill] sm:$0xff] %v7984_v2 }
 0x147   :  { %5172 = vmatprep.subr.mxu1 %v9689_v9  ;;  %9690 = vst [vmem:[#allocation29_spill] sm:$0xff] %v7908_v61  ;;  %9691 = vst [vmem:[#allocation24_spill] sm:$0xff] %v7911_v5  ;;  %5146 = vmatpush3.msra.mxu0 %v7687_v15  ;;  %v9692_v9 = vand.u32 4294901760, %v7724_v49  ;;  %v7926_v35 = vsub.f32 %v7803_v55, %v9693_v45  ;;  %v20_v49 = vld [vmem:[%s8999_s0 + $0x30] sm:$0xff]  ;;  %v7943_v45 = vsub.f32 %v125_v54, %v7884_v53  ;;  %v139_v15 = vld [vmem:[%s8998_s1 + $0x398] sm:$0xff] }
 0x148   :  { %5147 = vmatprep.subr.mxu0 %v7698_v14  ;;  %v7950_v55 = vsub.f32 %v142_v26, %v7877_v1  ;;  %v9697_v54 = vand.u32 4294901760, %v7829_v60  ;;  %v7963_v14 = vand.u32 4294901760, %v123_v7  ;;  %v138_v26 = vld [vmem:[%s8998_s1 + $0x390] sm:$0xff]  ;;  %3114 = vmatprep.mubr.f32.mxu1 %v7968_v37 }
 0x149   :  { %5173 = vmatpush3.msra.mxu1 %v9692_v9  ;;  %5148 = vmatpush3.msra.mxu0 %v7690_v63  ;;  %v7974_v63 = vand.u32 4294901760, %v122_v8 }
 0x14a   :  { %5174 = vmatprep.subr.mxu1 %v9695_v44  ;;  %v7956_v44 = vsub.f32 %v7845_v42, %v9696_v30  ;;  %v7961_v9 = vsub.f32 %v7829_v60, %v9697_v54  ;;  %5149 = vmatprep.subr.mxu0 %v7712_v18  ;;  %v7977_v54 = vsub.f32 %v141_v41, %v7911_v5  ;;  %v7979_v60 = vand.u32 4294901760, %v20_v49 }
 0x14b   :  { %5175 = vmatpush3.msra.mxu1 %v2901_v36  ;;  %v9699_v36 = vand.u32 4294901760, %v7771_v13  ;;  %5150 = vmatpush3.msra.mxu0 %v7753_v56  ;;  %v2936_v42 = vand.u32 4294901760, %v7926_v35  ;;  %v7986_v18 = vand.u32 4294901760, %v139_v15  ;;  %v9702_v41 = vand.u32 4294901760, %v7893_v38 }
 0x14c   :  { %9700 = vst [vmem:[#allocation25_spill] sm:$0xff] %v7979_v60  ;;  %5151 = vmatprep.subr.mxu0 %v7779_v34  ;;  %v7995_v30 = vand.u32 4294901760, %v138_v26  ;;  %v8002_v35 = vsub.f32 %v140_v39, %v7928_v32  ;;  %v3055_v13 = vand.u32 4294901760, %v7956_v44  ;;  %v8010_v34 = vsub.f32 %v123_v7, %v7963_v14 }
 0x14d   :  { %5176 = vmatprep.subr.mxu1 %v9699_v36  ;;  %v7993_v36 = vsub.f32 %v7893_v38, %v9702_v41  ;;  %5152 = vmatpush3.msra.mxu0 %v7781_v43  ;;  %v2943_v41 = vand.u32 4294901760, %v7961_v9  ;;  %v8016_v56 = vsub.f32 %v21_v62, %v7968_v37  ;;  %v9705_v39 = vand.u32 4294901760, %v7899_v59  ;;  %v136_v9 = vld [vmem:[%s8998_s1 + $0x380] sm:$0xff] }
 0x14e   :  { %5177 = vmatpush3.msra.mxu1 %v2908_v17  ;;  %9703 = vst [vmem:[#allocation13_spill] sm:$0xff] %v7995_v30  ;;  %v121_v17 = vld [vmem:[%s8998_s1 + $0x308] sm:$0xff]  ;;  %5153 = vmatprep.subr.mxu0 %v7823_v27  ;;  %v8023_v44 = vsub.f32 %v122_v8, %v7974_v63  ;;  %v120_v62 = vld [vmem:[%s8998_s1 + $0x300] sm:$0xff]  ;;  %v8043_v27 = vsub.f32 %v139_v15, %v7986_v18  ;;  %v9707_v43 = vand.u32 4294901760, %v7950_v55  ;;  %v9708_v7 = vand.u32 4294901760, %v7860_v48 }
 0x14f   :  { %5178 = vmatprep.subr.mxu1 %v3027_v20  ;;  %v9704_v20 = vand.u32 4294901760, %v7813_v24  ;;  %v2949_v24 = vsub.f32 %v7899_v59, %v9705_v39  ;;  %5154 = vmatpush3.msra.mxu0 %v7836_v46  ;;  %v8039_v39 = vand.u32 4294901760, %v137_v28  ;;  %v8050_v46 = vand.u32 4294901760, %v121_v17  ;;  %v9742_v37 = vld [vmem:[#allocation10_spill] sm:$0xff] }
 0x150   :  { %5155 = vmatprep.subr.mxu0 %v7877_v1  ;;  %v8056_v15 = vand.u32 4294901760, %v136_v9  ;;  %v9712_v1 = vand.u32 4294901760, %v8002_v35 }
 0x151   :  { %5179 = vmatpush3.msra.mxu1 %v9704_v20  ;;  %v8033_v20 = vsub.f32 %v20_v49, %v7979_v60  ;;  %v3062_v49 = vand.u32 4294901760, %v7993_v36  ;;  %5156 = vmatpush3.msra.mxu0 %v7855_v22  ;;  %v8062_v36 = vsub.f32 %v138_v26, %v7995_v30  ;;  %v9710_v22 = vand.u32 4294901760, %v7977_v54 }
 0x152   :  { %5180 = vmatprep.subr.mxu1 %v3034_v0  ;;  %v9706_v0 = vand.u32 4294901760, %v7908_v61  ;;  %5157 = vmatprep.subr.mxu0 %v7911_v5  ;;  %v9711_v26 = vand.u32 4294901760, %v7943_v45 }
 0x153   :  { %5181 = vmatpush3.msra.mxu1 %v2922_v6  ;;  %v3068_v6 = vsub.f32 %v7950_v55, %v9707_v43  ;;  %v9709_v43 = vand.u32 4294901760, %v7882_v51  ;;  %v3075_v48 = vsub.f32 %v7977_v54, %v9710_v22  ;;  %5158 = vmatpush3.msra.mxu0 %v7884_v53 }
 0x154   :  { %v2956_v8 = vsub.f32 %v7908_v61, %v9706_v0  ;;  %5182 = vmatprep.subr.mxu1 %v3041_v52  ;;  %v8058_v61 = vand.u32 4294901760, %v120_v62  ;;  %v2950_v0 = vand.u32 4294901760, %v2949_v24  ;;  %v2963_v5 = vsub.f32 %v7943_v45, %v9711_v26  ;;  %5159 = vmatprep.subr.mxu0 %v7928_v32 }
 0x155   :  { %5183 = vmatpush3.msra.mxu1 %v9708_v7  ;;  %v9260_v7 = vand.u32 4294901760, %v7984_v2  ;;  %v8078_v24 = vsub.f32 %v137_v28, %v8039_v39  ;;  %v3069_v22 = vand.u32 4294901760, %v3068_v6  ;;  %5160 = vmatpush3.msra.mxu0 %v7930_v11  ;;  %v9714_v28 = vand.u32 4294901760, %v8016_v56 }
 0x156   :  { %5184 = vmatprep.subr.mxu1 %v9709_v43  ;;  %v2957_v52 = vand.u32 4294901760, %v2956_v8  ;;  %v8082_v43 = vsub.f32 %v121_v17, %v8050_v46  ;;  %v8090_v26 = vsub.f32 %v120_v62, %v8058_v61  ;;  %v8097_v17 = vsub.f32 %v136_v9, %v8056_v15  ;;  %5161 = vmatprep.subr.mxu0 %v7986_v18 }
 0x157   :  { %5185 = vmatpush3.msra.mxu1 %v2936_v42  ;;  %v3082_v42 = vsub.f32 %v8002_v35, %v9712_v1  ;;  %v3076_v1 = vand.u32 4294901760, %v3075_v48  ;;  %v9716_v62 = vand.u32 4294901760, %v8033_v20  ;;  %5162 = vmatpush3.msra.mxu0 %v7963_v14  ;;  %v9717_v9 = vand.u32 4294901760, %v8043_v27 }
 0x158   :  { %5186 = vmatprep.subr.mxu1 %v3055_v13  ;;  %9713 = vst [vmem:[#allocation22_spill] sm:$0xff] %v8090_v26  ;;  %v2876_v13 = vsub.f32 %v8016_v56, %v9714_v28  ;;  %9715 = vst [vmem:[#allocation30_spill] sm:$0xff] %v8097_v17  ;;  %v2964_v28 = vand.u32 4294901760, %v2963_v5  ;;  %5163 = vmatprep.subr.mxu0 %v7995_v30  ;;  %v9720_v30 = vand.u32 4294901760, %v8023_v44  ;;  %v9263_v51 = vand.u32 4294901760, %v8090_v26 }
 0x159   :  { %5187 = vmatpush3.msra.mxu1 %v2943_v41  ;;  %v2970_v41 = vsub.f32 %v7984_v2, %v9260_v7  ;;  %v2882_v8 = vsub.f32 %v8033_v20, %v9716_v62  ;;  %v3089_v6 = vsub.f32 %v8043_v27, %v9717_v9  ;;  %v3083_v48 = vand.u32 4294901760, %v3082_v42  ;;  %5164 = vmatpush3.msra.mxu0 %v7974_v63 }
 0x15a   :  { %5188 = vmatprep.subr.mxu1 %v3062_v49  ;;  %v9718_v7 = vand.u32 4294901760, %v8010_v34  ;;  %v2877_v5 = vand.u32 4294901760, %v2876_v13  ;;  %v9264_v49 = vand.u32 4294901760, %v8097_v17  ;;  %5165 = vmatprep.subr.mxu0 %v8039_v39  ;;  %v9721_v13 = vand.u32 4294901760, %v8078_v24 }
 0x15b   :  { %5189 = vmatpush3.msra.mxu1 %v2950_v0  ;;  %v9719_v0 = vand.u32 4294901760, %v8062_v36  ;;  %v2883_v42 = vand.u32 4294901760, %v2882_v8  ;;  %5166 = vmatpush3.msra.mxu0 %v8050_v46  ;;  %v9722_v8 = vand.u32 4294901760, %v8082_v43 }
 0x15c   :  { %5190 = vmatprep.subr.mxu1 %v3069_v22  ;;  %v2977_v62 = vsub.f32 %v8010_v34, %v9718_v7  ;;  %v2971_v22 = vand.u32 4294901760, %v2970_v41  ;;  %v2984_v7 = vsub.f32 %v8023_v44, %v9720_v30  ;;  %5167 = vmatprep.subr.mxu0 %v8056_v15 }
 0x15d   :  { %5191 = vmatpush3.msra.mxu1 %v2957_v52  ;;  %v3096_v9 = vsub.f32 %v8062_v36, %v9719_v0  ;;  %v3090_v52 = vand.u32 4294901760, %v3089_v6  ;;  %v3103_v0 = vsub.f32 %v8078_v24, %v9721_v13  ;;  %v2991_v41 = vsub.f32 %v8082_v43, %v9722_v8  ;;  %5168 = vmatpush3.msra.mxu0 %v8058_v61  ;;  %v9726_v13 = vld [vmem:[#allocation7_spill] sm:$0xff] }
 0x15e   :  { %5192 = vmatprep.subr.mxu1 %v3076_v1  ;;  %v2978_v1 = vand.u32 4294901760, %v2977_v62  ;;  %2878 = vmatprep.mubr.f32.mxu0 %v2877_v5  ;;  %v3110_v6 = vsub.f32 %v8097_v17, %v9264_v49  ;;  %v9729_v8 = vld [vmem:[#allocation11_spill] sm:$0xff]  ;;  %v9740_v49 = vld [vmem:[#allocation21_spill] sm:$0xff] }
 0x15f   :  { %5193 = vmatpush3.msra.mxu1 %v2964_v28  ;;  %v3097_v30 = vand.u32 4294901760, %v3096_v9  ;;  %2884 = vmatmul.mubr.f32.vlgmr.msra.gmra.mxu0 %v2883_v42  ;;  %v2985_v28 = vand.u32 4294901760, %v2984_v7  ;;  %v3104_v62 = vand.u32 4294901760, %v3103_v0  ;;  %v2992_v5 = vand.u32 4294901760, %v2991_v41  ;;  %v9723_v42 = vld [vmem:[#allocation27_spill] sm:$0xff]  ;;  %v9724_v7 = vld [vmem:[#allocation20_spill] sm:$0xff] }
 0x160   :  { %5194 = vmatprep.subr.mxu1 %v3083_v48  ;;  %v2998_v48 = vsub.f32 %v8090_v26, %v9263_v51  ;;  %5207 = vmatprep.subr.mxu0 %v7627_v57  ;;  %v3111_v9 = vand.u32 4294901760, %v3110_v6  ;;  %v9727_v0 = vld [vmem:[#allocation2_spill] sm:$0xff]  ;;  %v9739_v51 = vld [vmem:[#allocation5_spill] sm:$0xff] }
 0x161   :  { %5195 = vmatpush3.msra.mxu1 %v2971_v22  ;;  %5208 = vmatpush3.msra.mxu0 %v7633_v12  ;;  %v9730_v41 = vld [vmem:[#allocation18_spill] sm:$0xff] }
 0x162   :  { %5196 = vmatprep.subr.mxu1 %v3090_v52  ;;  %5209 = vmatprep.subr.mxu0 %v7644_v29  ;;  %v2999_v22 = vand.u32 4294901760, %v2998_v48  ;;  %v9725_v52 = vld [vmem:[#allocation6_spill] sm:$0xff]  ;;  %v9734_v48 = vld [vmem:[#allocation15_spill] sm:$0xff] }
 0x163   :  { %5197 = vmatpush3.msra.mxu1 %v2978_v1  ;;  %5210 = vmatpush3.msra.mxu0 %v7663_v10  ;;  %v9728_v1 = vld [vmem:[#allocation4_spill] sm:$0xff]  ;;  %v9732_v6 = vld [vmem:[#allocation14_spill] sm:$0xff] }
 0x164   :  { %5198 = vmatprep.subr.mxu1 %v3097_v30  ;;  %5211 = vmatprep.subr.mxu0 %v7670_v19  ;;  %v9731_v30 = vld [vmem:[#allocation9_spill] sm:$0xff] }
 0x165   :  { %5199 = vmatpush3.msra.mxu1 %v2985_v28  ;;  %5212 = vmatpush3.msra.mxu0 %v7685_v31  ;;  %v9733_v28 = vld [vmem:[#allocation29_spill] sm:$0xff] }
 0x166   :  { %5200 = vmatprep.subr.mxu1 %v3104_v62  ;;  %5213 = vmatprep.subr.mxu0 %v7701_v58  ;;  %v9735_v62 = vld [vmem:[#allocation3_spill] sm:$0xff] }
 0x167   :  { %5201 = vmatpush3.msra.mxu1 %v2992_v5  ;;  %5214 = vmatpush3.msra.mxu0 %v7696_v47  ;;  %v9736_v5 = vld [vmem:[#allocation17_spill] sm:$0xff] }
 0x168   :  { %5202 = vmatprep.subr.mxu1 %v3111_v9  ;;  %5215 = vmatprep.subr.mxu0 %v7727_v50  ;;  %v9737_v9 = vld [vmem:[#allocation12_spill] sm:$0xff] }
 0x169   :  { %5203 = vmatpush3.msra.mxu1 %v2999_v22  ;;  %5216 = vmatpush3.msra.mxu0 %v7733_v23  ;;  %v9738_v22 = vld [vmem:[#allocation19_spill] sm:$0xff] }
 0x16a   :  { %3116 = vmatmul.mubr.f32.vlgmr.msra.gmra.mxu1 %v7979_v60  ;;  %5242 = vmatprep.subr.mxu1 %v7589_v3  ;;  %v9741_v60 = vld [vmem:[#allocation8_spill] sm:$0xff] }
 0x16b   :  { %5243 = vmatpush3.msra.mxu1 %v7594_v40  ;;  %5217 = vmatprep.subr.mxu0 %v7758_v16 }
 0x16c   :  { %5244 = vmatprep.subr.mxu1 %v7605_v4  ;;  %5218 = vmatpush3.msra.mxu0 %v7741_v25 }
 0x16d   :  { %5245 = vmatpush3.msra.mxu1 %v7616_v33  ;;  %5219 = vmatprep.subr.mxu0 %v7774_v21 }
 0x16e   :  { %5246 = vmatprep.subr.mxu1 %v9723_v42  ;;  %5220 = vmatpush3.msra.mxu0 %v9724_v7 }
 0x16f   :  { %5247 = vmatpush3.msra.mxu1 %v9725_v52  ;;  %5221 = vmatprep.subr.mxu0 %v9726_v13 }
 0x170   :  { %5248 = vmatprep.subr.mxu1 %v9727_v0  ;;  %5222 = vmatpush3.msra.mxu0 %v9728_v1 }
 0x171   :  { %5249 = vmatpush3.msra.mxu1 %v9729_v8  ;;  %5223 = vmatprep.subr.mxu0 %v7893_v38 }
 0x172   :  { %5250 = vmatprep.subr.mxu1 %v9730_v41  ;;  %5224 = vmatpush3.msra.mxu0 %v7899_v59 }
 0x173   :  { %5251 = vmatpush3.msra.mxu1 %v9731_v30  ;;  %5225 = vmatprep.subr.mxu0 %v7950_v55 }
 0x174   :  { %5252 = vmatprep.subr.mxu1 %v9732_v6  ;;  %5226 = vmatpush3.msra.mxu0 %v9733_v28 }
 0x175   :  { %5253 = vmatpush3.msra.mxu1 %v9734_v48  ;;  %5227 = vmatprep.subr.mxu0 %v7977_v54 }
 0x176   :  { %5254 = vmatprep.subr.mxu1 %v9735_v62  ;;  %5228 = vmatpush3.msra.mxu0 %v7943_v45 }
 0x177   :  { %5255 = vmatpush3.msra.mxu1 %v9736_v5  ;;  %5229 = vmatprep.subr.mxu0 %v8002_v35 }
 0x178   :  { %5256 = vmatprep.subr.mxu1 %v9737_v9  ;;  %5230 = vmatpush3.msra.mxu0 %v7984_v2  ;;  %v9743_v2 = vld [vmem:[#allocation24_spill] sm:$0xff] }
 0x179   :  { %5257 = vmatpush3.msra.mxu1 %v9738_v22  ;;  %5231 = vmatprep.subr.mxu0 %v8043_v27 }
 0x17a   :  { %5258 = vmatprep.subr.mxu1 %v9739_v51  ;;  %5232 = vmatpush3.msra.mxu0 %v8010_v34 }
 0x17b   :  { %5259 = vmatpush3.msra.mxu1 %v9740_v49  ;;  %5233 = vmatprep.subr.mxu0 %v8062_v36 }
 0x17c   :  { %5260 = vmatprep.subr.mxu1 %v9741_v60  ;;  %5234 = vmatpush3.msra.mxu0 %v8023_v44 }
 0x17d   :  { %5261 = vmatpush3.msra.mxu1 %v9742_v37  ;;  %5235 = vmatprep.subr.mxu0 %v8078_v24 }
 0x17e   :  { %5262 = vmatprep.subr.mxu1 %v9743_v2  ;;  %5236 = vmatpush3.msra.mxu0 %v8082_v43  ;;  %v9744_v2 = vand.u32 4294901760, %v7627_v57  ;;  %v9749_v57 = vand.u32 4294901760, %v7670_v19  ;;  %v9754_v19 = vand.u32 4294901760, %v8033_v20 }
 0x17f   :  { %5263 = vmatpush3.msra.mxu1 %v7884_v53  ;;  %5237 = vmatprep.subr.mxu0 %v8097_v17  ;;  %v9745_v53 = vand.u32 4294901760, %v7633_v12  ;;  %v9746_v17 = vld [vmem:[#allocation13_spill] sm:$0xff]  ;;  %v9751_v12 = vand.u32 4294901760, %v7701_v58  ;;  %v9757_v58 = vand.u32 4294901760, %v7758_v16 }
 0x180   :  { %5264 = vmatprep.subr.mxu1 %v7928_v32  ;;  %5238 = vmatpush3.msra.mxu0 %v8090_v26  ;;  %v9747_v26 = vand.u32 4294901760, %v7644_v29  ;;  %v9752_v29 = vand.u32 4294901760, %v8016_v56 }
 0x181   :  { %3251 = vmatprep.mubr.f32.mxu0 %v8016_v56  ;;  %5265 = vmatpush3.msra.mxu1 %v7930_v11  ;;  %v9748_v11 = vand.u32 4294901760, %v7663_v10  ;;  %v9753_v10 = vand.u32 4294901760, %v7696_v47  ;;  %v9758_v47 = vand.u32 4294901760, %v7741_v25  ;;  %v9762_v25 = vand.u32 4294901760, %v9728_v1 }
 0x182   :  { %3254 = vmatmul.mubr.f32.vlgmr.msra.gmra.mxu0 %v8033_v20  ;;  %5266 = vmatprep.subr.mxu1 %v7986_v18  ;;  %v9763_v56 = vand.u32 4294901760, %v7893_v38  ;;  %v166_v20 = vld [vmem:[%s8998_s1 + $0x470] sm:$0xff]  ;;  %v9765_v38 = vand.u32 4294901760, %v7950_v55  ;;  %v165_v55 = vld [vmem:[%s8998_s1 + $0x468] sm:$0xff] }
 0x183   :  { %5277 = vmatprep.subr.mxu0 %v9744_v2  ;;  %5267 = vmatpush3.msra.mxu1 %v7963_v14  ;;  %v9750_v2 = vand.u32 4294901760, %v7685_v31  ;;  %v9756_v31 = vand.u32 4294901760, %v7733_v23  ;;  %v8302_v1 = vand.u32 4294901760, %v166_v20 }
 0x184   :  { %5278 = vmatpush3.msra.mxu0 %v9745_v53  ;;  %5268 = vmatprep.subr.mxu1 %v9746_v17  ;;  %v9764_v53 = vand.u32 4294901760, %v7899_v59  ;;  %v9766_v59 = vand.u32 4294901760, %v9733_v28  ;;  %v8318_v28 = vand.u32 4294901760, %v165_v55 }
 0x185   :  { %5279 = vmatprep.subr.mxu0 %v9747_v26  ;;  %5269 = vmatpush3.msra.mxu1 %v7974_v63  ;;  %v181_v26 = vld [vmem:[%s8998_s1 + $0x4e8] sm:$0xff] }
 0x186   :  { %5280 = vmatpush3.msra.mxu0 %v9748_v11  ;;  %5270 = vmatprep.subr.mxu1 %v8039_v39  ;;  %v9755_v11 = vand.u32 4294901760, %v7727_v50  ;;  %v183_v50 = vld [vmem:[%s8998_s1 + $0x4f8] sm:$0xff]  ;;  %9770 = vst [vmem:[#allocation27_spill] sm:$0xff] %v8318_v28 }
 0x187   :  { %5281 = vmatprep.subr.mxu0 %v9749_v57  ;;  %5271 = vmatpush3.msra.mxu1 %v8050_v46  ;;  %v8257_v23 = vand.u32 4294901760, %v183_v50 }
 0x188   :  { %5282 = vmatpush3.msra.mxu0 %v9750_v2  ;;  %5272 = vmatprep.subr.mxu1 %v8056_v15 }
 0x189   :  { %5283 = vmatprep.subr.mxu0 %v9751_v12  ;;  %5273 = vmatpush3.msra.mxu1 %v8058_v61  ;;  %v9775_v12 = vand.u32 4294901760, %v8043_v27  ;;  %v162_v27 = vld [vmem:[%s8998_s1 + $0x450] sm:$0xff] }
 0x18a   :  { %3358 = vmatprep.mubr.f32.mxu1 %v9752_v29  ;;  %5284 = vmatpush3.msra.mxu0 %v9753_v10  ;;  %v8341_v29 = vsub.f32 %v166_v20, %v8302_v1 }
 0x18b   :  { %3362 = vmatmul.mubr.f32.vlgmr.msra.gmra.mxu1 %v9754_v19  ;;  %5285 = vmatprep.subr.mxu0 %v9755_v11  ;;  %v9777_v19 = vand.u32 4294901760, %v8010_v34 }
 0x18c   :  { %5312 = vmatprep.subr.mxu1 %v7589_v3  ;;  %5286 = vmatpush3.msra.mxu0 %v9756_v31  ;;  %v9759_v3 = vand.u32 4294901760, %v7774_v21  ;;  %v182_v21 = vld [vmem:[%s8998_s1 + $0x4f0] sm:$0xff]  ;;  %v9779_v31 = vand.u32 4294901760, %v8062_v36 }
 0x18d   :  { %5313 = vmatpush3.msra.mxu1 %v7594_v40  ;;  %5287 = vmatprep.subr.mxu0 %v9757_v58  ;;  %v9760_v40 = vand.u32 4294901760, %v9724_v7  ;;  %v8288_v7 = vand.u32 4294901760, %v182_v21  ;;  %v8361_v58 = vsub.f32 %v165_v55, %v8318_v28 }
 0x18e   :  { %5314 = vmatprep.subr.mxu1 %v7605_v4  ;;  %5288 = vmatpush3.msra.mxu0 %v9758_v47  ;;  %v167_v4 = vld [vmem:[%s8998_s1 + $0x478] sm:$0xff] }
 0x18f   :  { %5315 = vmatpush3.msra.mxu1 %v7616_v33  ;;  %5289 = vmatprep.subr.mxu0 %v9759_v3  ;;  %v9761_v33 = vand.u32 4294901760, %v9726_v13  ;;  %v8265_v16 = vand.u32 4294901760, %v167_v4  ;;  %v9767_v13 = vand.u32 4294901760, %v7977_v54  ;;  %v179_v54 = vld [vmem:[%s8998_s1 + $0x4d8] sm:$0xff]  ;;  %v9782_v3 = vand.u32 4294901760, %v8078_v24  ;;  %v161_v24 = vld [vmem:[%s8998_s1 + $0x448] sm:$0xff] }
 0x190   :  { %5316 = vmatprep.subr.mxu1 %v9723_v42  ;;  %5290 = vmatpush3.msra.mxu0 %v9760_v40  ;;  %v8283_v42 = vsub.f32 %v183_v50, %v8257_v23  ;;  %v8343_v10 = vand.u32 4294901760, %v179_v54  ;;  %v9781_v50 = vand.u32 4294901760, %v8023_v44  ;;  %v9783_v40 = vld [vmem:[#allocation24_spill] sm:$0xff]  ;;  %v9277_v44 = vand.u32 4294901760, %v8341_v29 }
 0x191   :  { %5317 = vmatpush3.msra.mxu1 %v9725_v52  ;;  %5291 = vmatprep.subr.mxu0 %v9761_v33  ;;  %v180_v52 = vld [vmem:[%s8998_s1 + $0x4e0] sm:$0xff]  ;;  %v8388_v33 = vand.u32 4294901760, %v162_v27  ;;  %v9275_v55 = vand.u32 4294901760, %v8361_v58 }
 0x192   :  { %5318 = vmatprep.subr.mxu1 %v9727_v0  ;;  %5292 = vmatpush3.msra.mxu0 %v9762_v25  ;;  %v8300_v0 = vsub.f32 %v167_v4, %v8265_v16  ;;  %9776 = vst [vmem:[#allocation7_spill] sm:$0xff] %v8343_v10  ;;  %v8398_v25 = vsub.f32 %v179_v54, %v8343_v10 }
 0x193   :  { %5319 = vmatpush3.msra.mxu1 %v9729_v8  ;;  %5293 = vmatprep.subr.mxu0 %v9763_v56  ;;  %v164_v8 = vld [vmem:[%s8998_s1 + $0x460] sm:$0xff]  ;;  %9784 = vst [vmem:[#allocation11_spill] sm:$0xff] %v8388_v33  ;;  %v9785_v56 = vand.u32 4294901760, %v8082_v43 }
 0x194   :  { %5320 = vmatprep.subr.mxu1 %v9730_v41  ;;  %5294 = vmatpush3.msra.mxu0 %v9764_v53  ;;  %v9768_v41 = vand.u32 4294901760, %v7943_v45  ;;  %v9284_v45 = vand.u32 4294901760, %v8283_v42  ;;  %v8329_v2 = vand.u32 4294901760, %v164_v8  ;;  %v176_v43 = vld [vmem:[%s8998_s1 + $0x4c0] sm:$0xff] }
 0x195   :  { %5321 = vmatpush3.msra.mxu1 %v9731_v30  ;;  %5295 = vmatprep.subr.mxu0 %v9765_v38  ;;  %v8310_v30 = vand.u32 4294901760, %v181_v26  ;;  %v9787_v38 = vld [vmem:[#allocation30_spill] sm:$0xff] }
 0x196   :  { %5322 = vmatprep.subr.mxu1 %v9732_v6  ;;  %5296 = vmatpush3.msra.mxu0 %v9766_v59  ;;  %v9769_v6 = vand.u32 4294901760, %v8002_v35  ;;  %9774 = vst [vmem:[#allocation6_spill] sm:$0xff] %v8329_v2  ;;  %v178_v35 = vld [vmem:[%s8998_s1 + $0x4d0] sm:$0xff]  ;;  %v8366_v34 = vsub.f32 %v8283_v42, %v9284_v45  ;;  %v156_v45 = vld [vmem:[%s8998_s1 + $0x420] sm:$0xff] }
 0x197   :  { %5323 = vmatpush3.msra.mxu1 %v9734_v48  ;;  %5297 = vmatprep.subr.mxu0 %v9767_v13  ;;  %v8320_v48 = vand.u32 4294901760, %v180_v52  ;;  %v160_v13 = vld [vmem:[%s8998_s1 + $0x440] sm:$0xff] }
 0x198   :  { %5324 = vmatprep.subr.mxu1 %v9735_v62  ;;  %5298 = vmatpush3.msra.mxu0 %v9768_v41  ;;  %v163_v62 = vld [vmem:[%s8998_s1 + $0x458] sm:$0xff]  ;;  %v3868_v59 = vand.u32 4294901760, %v8366_v34  ;;  %v9789_v41 = vld [vmem:[#allocation22_spill] sm:$0xff] }
 0x199   :  { %5325 = vmatpush3.msra.mxu1 %v9736_v5  ;;  %5299 = vmatprep.subr.mxu0 %v9769_v6  ;;  %9771 = vst [vmem:[#allocation20_spill] sm:$0xff] %v8320_v48  ;;  %v9772_v5 = vld [vmem:[#allocation26_spill] sm:$0xff]  ;;  %v8349_v11 = vand.u32 4294901760, %v163_v62  ;;  %v8371_v47 = vsub.f32 %v180_v52, %v8320_v48  ;;  %v9790_v54 = vand.u32 4294901760, %v9789_v41 }
 0x19a   :  { %5326 = vmatprep.subr.mxu1 %v9737_v9  ;;  %v9773_v57 = vand.u32 4294901760, %v9772_v5  ;;  %v8335_v9 = vsub.f32 %v182_v21, %v8288_v7  ;;  %v9786_v21 = vld [vmem:[#allocation16_spill] sm:$0xff]  ;;  %v8432_v5 = vand.u32 4294901760, %v161_v24 }
 0x19b   :  { %5327 = vmatpush3.msra.mxu1 %v9738_v22  ;;  %v9283_v22 = vand.u32 4294901760, %v8300_v0  ;;  %9778 = vst [vmem:[#allocation2_spill] sm:$0xff] %v8349_v11  ;;  %v8404_v53 = vsub.f32 %v163_v62, %v8349_v11  ;;  %v9276_v52 = vand.u32 4294901760, %v8371_v47 }
 0x19c   :  { %5300 = vmatpush3.msra.mxu0 %v9773_v57  ;;  %5328 = vmatprep.subr.mxu1 %v9739_v51  ;;  %v8355_v51 = vsub.f32 %v181_v26, %v8310_v30  ;;  %v9280_v36 = vand.u32 4294901760, %v8335_v9  ;;  %v9788_v26 = vand.u32 4294901760, %v9787_v38  ;;  %9793 = vst [vmem:[#allocation9_spill] sm:$0xff] %v8432_v5  ;;  %v159_v38 = vld [vmem:[%s8998_s1 + $0x438] sm:$0xff] }
 0x19d   :  { %5301 = vmatprep.subr.mxu0 %v9775_v12  ;;  %5329 = vmatpush3.msra.mxu1 %v9740_v49  ;;  %v8368_v49 = vand.u32 4294901760, %v178_v35  ;;  %v8386_v4 = vsub.f32 %v8300_v0, %v9283_v22  ;;  %v9794_v12 = vld [vmem:[#allocation28_spill] sm:$0xff]  ;;  %v8475_v41 = vsub.f32 %v8371_v47, %v9276_v52 }
 0x19e   :  { %5302 = vmatpush3.msra.mxu0 %v9777_v19  ;;  %5330 = vmatprep.subr.mxu1 %v9741_v60  ;;  %v8377_v60 = vsub.f32 %v164_v8, %v8329_v2  ;;  %v9274_v20 = vand.u32 4294901760, %v8355_v51  ;;  %v8428_v6 = vsub.f32 %v8335_v9, %v9280_v36  ;;  %v9795_v19 = vld [vmem:[#allocation25_spill] sm:$0xff]  ;;  %v158_v52 = vld [vmem:[%s8998_s1 + $0x430] sm:$0xff] }
 0x19f   :  { %5303 = vmatprep.subr.mxu0 %v9779_v31  ;;  %9780 = vst [vmem:[#allocation4_spill] sm:$0xff] %v8368_v49  ;;  %5331 = vmatpush3.msra.mxu1 %v9742_v37  ;;  %v177_v37 = vld [vmem:[%s8998_s1 + $0x4c8] sm:$0xff]  ;;  %v8420_v8 = vsub.f32 %v178_v35, %v8368_v49  ;;  %v175_v35 = vld [vmem:[%s8998_s1 + $0x4b8] sm:$0xff]  ;;  %v9808_v22 = vand.u32 4294901760, %v8386_v4 }
 0x1a0   :  { %5304 = vmatpush3.msra.mxu0 %v9781_v50  ;;  %5332 = vmatprep.subr.mxu1 %v9783_v40  ;;  %v8430_v62 = vand.u32 4294901760, %v177_v37  ;;  %v9278_v57 = vand.u32 4294901760, %v8377_v60  ;;  %v8442_v50 = vsub.f32 %v162_v27, %v8388_v33  ;;  %v9279_v40 = vand.u32 4294901760, %v8398_v25 }
 0x1a1   :  { %5305 = vmatprep.subr.mxu0 %v9782_v3  ;;  %5333 = vmatpush3.msra.mxu1 %v9786_v21  ;;  %v8447_v3 = vsub.f32 %v8341_v29, %v9277_v44  ;;  %v8457_v21 = vand.u32 4294901760, %v176_v43  ;;  %v8459_v27 = vand.u32 4294901760, %v160_v13 }
 0x1a2   :  { %5306 = vmatpush3.msra.mxu0 %v9785_v56  ;;  %5334 = vmatprep.subr.mxu1 %v7928_v32  ;;  %v9791_v32 = vld [vmem:[#allocation23_spill] sm:$0xff]  ;;  %9792 = vst [vmem:[#allocation18_spill] sm:$0xff] %v8430_v62  ;;  %v8455_v56 = vsub.f32 %v8355_v51, %v9274_v20  ;;  %v8484_v20 = vsub.f32 %v161_v24, %v8432_v5 }
 0x1a3   :  { %5307 = vmatprep.subr.mxu0 %v9788_v26  ;;  %3528 = vmatprep.mubr.f32.mxu0 %v9791_v32  ;;  %9796 = vst [vmem:[#allocation14_spill] sm:$0xff] %v8457_v21  ;;  %9797 = vst [vmem:[#allocation29_spill] sm:$0xff] %v8459_v27  ;;  %v9281_v26 = vand.u32 4294901760, %v8404_v53  ;;  %v8495_v44 = vsub.f32 %v177_v37, %v8430_v62  ;;  %v8503_v24 = vsub.f32 %v8398_v25, %v9279_v40  ;;  %v174_v40 = vld [vmem:[%s8998_s1 + $0x4b0] sm:$0xff] }
 0x1a4   :  { %5308 = vmatpush3.msra.mxu0 %v9790_v54  ;;  %5335 = vmatpush3.msra.mxu1 %v9794_v12  ;;  %v8477_v54 = vand.u32 4294901760, %v175_v35  ;;  %v9282_v12 = vand.u32 4294901760, %v8420_v8  ;;  %9799 = vst [vmem:[#allocation3_spill] sm:$0xff] %v8484_v20  ;;  %v3882_v37 = vand.u32 4294901760, %v8455_v56  ;;  %v8523_v36 = vsub.f32 %v176_v43, %v8457_v21 }
 0x1a5   :  { %3530 = vmatmul.mubr.f32.vlgmr.msra.gmra.mxu0 %v9795_v19  ;;  %5336 = vmatprep.subr.mxu1 %v7986_v18  ;;  %v8470_v18 = vsub.f32 %v8361_v58, %v9275_v55  ;;  %v8489_v55 = vsub.f32 %v8377_v60, %v9278_v57  ;;  %v9285_v57 = vand.u32 4294901760, %v8442_v50  ;;  %v8533_v56 = vand.u32 4294901760, %v158_v52 }
 0x1a6   :  { %5347 = vmatprep.subr.mxu0 %v8257_v23  ;;  %5337 = vmatpush3.msra.mxu1 %v7963_v14  ;;  %9798 = vst [vmem:[#allocation15_spill] sm:$0xff] %v8477_v54  ;;  %v3875_v14 = vand.u32 4294901760, %v8428_v6  ;;  %v8505_v6 = vand.u32 4294901760, %v159_v38  ;;  %9802 = vst [vmem:[#allocation19_spill] sm:$0xff] %v8523_v36  ;;  %v8539_v43 = vsub.f32 %v175_v35, %v8477_v54  ;;  %v9809_v34 = vand.u32 4294901760, %v8495_v44 }
 0x1a7   :  { %5348 = vmatpush3.msra.mxu0 %v8265_v16  ;;  %5338 = vmatprep.subr.mxu1 %v9746_v17  ;;  %v3763_v17 = vand.u32 4294901760, %v8447_v3  ;;  %v8517_v3 = vsub.f32 %v8404_v53, %v9281_v26  ;;  %v157_v26 = vld [vmem:[%s8998_s1 + $0x428] sm:$0xff] }
 0x1a8   :  { %5349 = vmatprep.subr.mxu0 %v8288_v7  ;;  %5339 = vmatpush3.msra.mxu1 %v7974_v63  ;;  %9800 = vst [vmem:[#allocation17_spill] sm:$0xff] %v8505_v6  ;;  %v8512_v63 = vsub.f32 %v160_v13, %v8459_v27  ;;  %v8531_v13 = vsub.f32 %v8420_v8, %v9282_v12  ;;  %9803 = vst [vmem:[#allocation5_spill] sm:$0xff] %v8539_v43  ;;  %v173_v12 = vld [vmem:[%s8998_s1 + $0x4a8] sm:$0xff] }
 0x1a9   :  { %5350 = vmatpush3.msra.mxu0 %v8302_v1  ;;  %5340 = vmatprep.subr.mxu1 %v8039_v39  ;;  %v3770_v39 = vand.u32 4294901760, %v8470_v18  ;;  %v8554_v35 = vsub.f32 %v159_v38, %v8505_v6  ;;  %v8561_v18 = vsub.f32 %v8442_v50, %v9285_v57  ;;  %v8572_v38 = vand.u32 4294901760, %v157_v26  ;;  %v172_v57 = vld [vmem:[%s8998_s1 + $0x4a0] sm:$0xff] }
 0x1aa   :  { %5351 = vmatprep.subr.mxu0 %v8310_v30  ;;  %9801 = vst [vmem:[#allocation12_spill] sm:$0xff] %v8512_v63  ;;  %5341 = vmatpush3.msra.mxu1 %v8050_v46  ;;  %v3889_v46 = vand.u32 4294901760, %v8475_v41  ;;  %v8556_v41 = vand.u32 4294901760, %v174_v40 }
 0x1ab   :  { %5352 = vmatpush3.msra.mxu0 %v8318_v28  ;;  %5342 = vmatprep.subr.mxu1 %v8056_v15  ;;  %9804 = vst [vmem:[#allocation21_spill] sm:$0xff] %v8554_v35  ;;  %9806 = vst [vmem:[#allocation10_spill] sm:$0xff] %v8572_v38  ;;  %v23_v15 = vld [vmem:[%s8999_s0 + $0x48] sm:$0xff]  ;;  %v3791_v4 = vand.u32 4294901760, %v8561_v18  ;;  %v8625_v28 = vsub.f32 %v157_v26, %v8572_v38  ;;  %v9815_v26 = vand.u32 4294901760, %v8539_v43 }
 0x1ac   :  { %5353 = vmatprep.subr.mxu0 %v8320_v48  ;;  %5343 = vmatpush3.msra.mxu1 %v8058_v61  ;;  %9805 = vst [vmem:[#allocation8_spill] sm:$0xff] %v8556_v41  ;;  %v155_v61 = vld [vmem:[%s8998_s1 + $0x418] sm:$0xff]  ;;  %v8621_v48 = vsub.f32 %v174_v40, %v8556_v41 }
 0x1ad   :  { %3632 = vmatprep.mubr.f32.mxu1 %v9791_v32  ;;  %5354 = vmatpush3.msra.mxu0 %v8329_v2  ;;  %v8586_v32 = vand.u32 4294901760, %v173_v12  ;;  %v8605_v2 = vand.u32 4294901760, %v156_v45 }
 0x1ae   :  { %3634 = vmatmul.mubr.f32.vlgmr.msra.gmra.mxu1 %v9795_v19  ;;  %5355 = vmatprep.subr.mxu0 %v8343_v10  ;;  %v8584_v19 = vsub.f32 %v158_v52, %v8533_v56  ;;  %v9810_v52 = vand.u32 4294901760, %v8484_v20  ;;  %v171_v10 = vld [vmem:[%s8998_s1 + $0x498] sm:$0xff] }
 0x1af   :  { %5382 = vmatprep.subr.mxu1 %v3868_v59  ;;  %9807 = vst [vmem:[#allocation13_spill] sm:$0xff] %v8586_v32  ;;  %5356 = vmatpush3.msra.mxu0 %v8349_v11  ;;  %v8598_v59 = vsub.f32 %v8495_v44, %v9809_v34  ;;  %9811 = vst [vmem:[#allocation26_spill] sm:$0xff] %v8605_v2  ;;  %v8610_v11 = vand.u32 4294901760, %v155_v61  ;;  %v8617_v34 = vand.u32 4294901760, %v172_v57  ;;  %v8640_v40 = vand.u32 4294901760, %v171_v10 }
 0x1b0   :  { %5383 = vmatpush3.msra.mxu1 %v9808_v22  ;;  %v8603_v31 = vsub.f32 %v8484_v20, %v9810_v52  ;;  %v22_v22 = vld [vmem:[%s8999_s0 + $0x40] sm:$0xff]  ;;  %5357 = vmatprep.subr.mxu0 %v8368_v49  ;;  %v9812_v20 = vand.u32 4294901760, %v8523_v36  ;;  %v8637_v52 = vand.u32 4294901760, %v23_v15 }
 0x1b1   :  { %5384 = vmatprep.subr.mxu1 %v3875_v14  ;;  %5358 = vmatpush3.msra.mxu0 %v8388_v33  ;;  %v9813_v14 = vand.u32 4294901760, %v8512_v63  ;;  %v8651_v33 = vsub.f32 %v173_v12, %v8586_v32  ;;  %v154_v12 = vld [vmem:[%s8998_s1 + $0x410] sm:$0xff] }
 0x1b2   :  { %5385 = vmatpush3.msra.mxu1 %v3763_v17  ;;  %v8630_v49 = vsub.f32 %v8523_v36, %v9812_v20  ;;  %9814 = vst [vmem:[#allocation24_spill] sm:$0xff] %v8637_v52  ;;  %5359 = vmatprep.subr.mxu0 %v8430_v62  ;;  %v8645_v17 = vsub.f32 %v8539_v43, %v9815_v26  ;;  %v170_v20 = vld [vmem:[%s8998_s1 + $0x490] sm:$0xff]  ;;  %v3798_v62 = vand.u32 4294901760, %v8603_v31  ;;  %v9820_v43 = vand.u32 4294901760, %v8503_v24 }
 0x1b3   :  { %v8635_v18 = vsub.f32 %v8512_v63, %v9813_v14  ;;  %5386 = vmatprep.subr.mxu1 %v3882_v37  ;;  %v8653_v14 = vand.u32 4294901760, %v22_v22  ;;  %5360 = vmatpush3.msra.mxu0 %v8432_v5  ;;  %v3910_v37 = vand.u32 4294901760, %v8598_v59  ;;  %v8659_v63 = vsub.f32 %v156_v45, %v8605_v2  ;;  %v153_v59 = vld [vmem:[%s8998_s1 + $0x408] sm:$0xff] }
 0x1b4   :  { %5387 = vmatpush3.msra.mxu1 %v3770_v39  ;;  %v8662_v26 = vsub.f32 %v155_v61, %v8610_v11  ;;  %5361 = vmatprep.subr.mxu0 %v8457_v21  ;;  %v9817_v5 = vand.u32 4294901760, %v8554_v35  ;;  %v169_v61 = vld [vmem:[%s8998_s1 + $0x488] sm:$0xff]  ;;  %v8682_v21 = vsub.f32 %v172_v57, %v8617_v34  ;;  %v8689_v31 = vand.u32 4294901760, %v170_v20 }
 0x1b5   :  { %9816 = vst [vmem:[#allocation16_spill] sm:$0xff] %v8653_v14  ;;  %5388 = vmatprep.subr.mxu1 %v3889_v46  ;;  %5362 = vmatpush3.msra.mxu0 %v8459_v27  ;;  %v3917_v46 = vand.u32 4294901760, %v8630_v49  ;;  %v3805_v45 = vand.u32 4294901760, %v8635_v18  ;;  %v3924_v57 = vand.u32 4294901760, %v8645_v17  ;;  %v8698_v27 = vand.u32 4294901760, %v154_v12  ;;  %v168_v49 = vld [vmem:[%s8998_s1 + $0x480] sm:$0xff] }
 0x1b6   :  { %v8671_v39 = vsub.f32 %v8554_v35, %v9817_v5  ;;  %v9818_v5 = vand.u32 4294901760, %v8489_v55  ;;  %9819 = vst [vmem:[#allocation30_spill] sm:$0xff] %v8689_v31  ;;  %v8692_v35 = vsub.f32 %v23_v15, %v8637_v52  ;;  %5363 = vmatprep.subr.mxu0 %v8477_v54  ;;  %v152_v15 = vld [vmem:[%s8998_s1 + $0x400] sm:$0xff]  ;;  %v8708_v18 = vsub.f32 %v22_v22, %v8653_v14 }
 0x1b7   :  { %5364 = vmatpush3.msra.mxu0 %v8505_v6  ;;  %v9821_v24 = vand.u32 4294901760, %v8517_v3  ;;  %v8715_v17 = vand.u32 4294901760, %v153_v59  ;;  %v8719_v55 = vsub.f32 %v171_v10, %v8640_v40  ;;  %v9822_v54 = vand.u32 4294901760, %v8531_v13  ;;  %3976 = vmatprep.mubr.f32.mxu1 %v8637_v52  ;;  %v9858_v52 = vld [vmem:[#allocation13_spill] sm:$0xff] }
 0x1b8   :  { %5389 = vmatpush3.msra.mxu1 %v9818_v5  ;;  %5365 = vmatprep.subr.mxu0 %v8556_v41  ;;  %v3812_v22 = vand.u32 4294901760, %v8671_v39  ;;  %v9823_v6 = vand.u32 4294901760, %v8621_v48  ;;  %v8733_v10 = vand.u32 4294901760, %v168_v49  ;;  %v8735_v41 = vand.u32 4294901760, %v152_v15 }
 0x1b9   :  { %5390 = vmatprep.subr.mxu1 %v9820_v43  ;;  %v8713_v43 = vand.u32 4294901760, %v169_v61  ;;  %5366 = vmatpush3.msra.mxu0 %v8533_v56  ;;  %v8739_v13 = vsub.f32 %v170_v20, %v8689_v31  ;;  %v9825_v39 = vand.u32 4294901760, %v8651_v33  ;;  %v8752_v20 = vsub.f32 %v153_v59, %v8715_v17 }
 0x1ba   :  { %5391 = vmatpush3.msra.mxu1 %v9821_v24  ;;  %v3930_v3 = vsub.f32 %v8621_v48, %v9823_v6  ;;  %v9824_v24 = vand.u32 4294901760, %v8584_v19  ;;  %5367 = vmatprep.subr.mxu0 %v8586_v32  ;;  %v8743_v6 = vsub.f32 %v154_v12, %v8698_v27 }
 0x1bb   :  { %5392 = vmatprep.subr.mxu1 %v9822_v54  ;;  %5368 = vmatpush3.msra.mxu0 %v8572_v38  ;;  %v9826_v54 = vand.u32 4294901760, %v8625_v28  ;;  %v8759_v32 = vsub.f32 %v169_v61, %v8713_v43  ;;  %v9829_v61 = vand.u32 4294901760, %v8692_v35 }
 0x1bc   :  { %v3818_v36 = vsub.f32 %v8584_v19, %v9824_v24  ;;  %5393 = vmatpush3.msra.mxu1 %v3791_v4  ;;  %v3937_v24 = vsub.f32 %v8651_v33, %v9825_v39  ;;  %5369 = vmatprep.subr.mxu0 %v8617_v34  ;;  %v3931_v39 = vand.u32 4294901760, %v3930_v3  ;;  %v9827_v4 = vand.u32 4294901760, %v8682_v21 }
 0x1bd   :  { %5394 = vmatprep.subr.mxu1 %v3910_v37  ;;  %v3825_v37 = vsub.f32 %v8625_v28, %v9826_v54  ;;  %5370 = vmatpush3.msra.mxu0 %v8605_v2  ;;  %v8768_v54 = vsub.f32 %v152_v15, %v8735_v41  ;;  %v3738_v12 = vsub.f32 %v8692_v35, %v9829_v61  ;;  %v9832_v15 = vand.u32 4294901760, %v8708_v18 }
 0x1be   :  { %5395 = vmatpush3.msra.mxu1 %v3798_v62  ;;  %v3819_v5 = vand.u32 4294901760, %v3818_v36  ;;  %v3944_v62 = vsub.f32 %v8682_v21, %v9827_v4  ;;  %v8775_v36 = vsub.f32 %v168_v49, %v8733_v10  ;;  %5371 = vmatprep.subr.mxu0 %v8640_v40  ;;  %v3938_v3 = vand.u32 4294901760, %v3937_v24 }
 0x1bf   :  { %5396 = vmatprep.subr.mxu1 %v3917_v46  ;;  %9828 = vst [vmem:[#allocation22_spill] sm:$0xff] %v8768_v54  ;;  %v9831_v4 = vand.u32 4294901760, %v8659_v63  ;;  %v3744_v59 = vsub.f32 %v8708_v18, %v9832_v15  ;;  %5372 = vmatpush3.msra.mxu0 %v8610_v11  ;;  %v3826_v61 = vand.u32 4294901760, %v3825_v37  ;;  %v9833_v49 = vand.u32 4294901760, %v8719_v55 }
 0x1c0   :  { %5397 = vmatpush3.msra.mxu1 %v3805_v45  ;;  %9830 = vst [vmem:[#allocation23_spill] sm:$0xff] %v8775_v36  ;;  %5373 = vmatprep.subr.mxu0 %v8689_v31  ;;  %v3945_v24 = vand.u32 4294901760, %v3944_v62  ;;  %v9835_v37 = vand.u32 4294901760, %v8739_v13  ;;  %v9836_v31 = vand.u32 4294901760, %v8743_v6  ;;  %v9330_v2 = vand.u32 4294901760, %v8768_v54 }
 0x1c1   :  { %5398 = vmatprep.subr.mxu1 %v3924_v57  ;;  %v3832_v45 = vsub.f32 %v8659_v63, %v9831_v4  ;;  %v3951_v46 = vsub.f32 %v8719_v55, %v9833_v49  ;;  %v9834_v4 = vand.u32 4294901760, %v8662_v26  ;;  %5374 = vmatpush3.msra.mxu0 %v8698_v27  ;;  %v9331_v57 = vand.u32 4294901760, %v8775_v36 }
 0x1c2   :  { %5399 = vmatpush3.msra.mxu1 %v3812_v22  ;;  %v3739_v22 = vand.u32 4294901760, %v3738_v12  ;;  %v3958_v49 = vsub.f32 %v8739_v13, %v9835_v37  ;;  %5375 = vmatprep.subr.mxu0 %v8713_v43  ;;  %v3745_v62 = vand.u32 4294901760, %v3744_v59  ;;  %v9837_v12 = vand.u32 4294901760, %v8759_v32 }
 0x1c3   :  { %5400 = vmatprep.subr.mxu1 %v3931_v39  ;;  %v3839_v15 = vsub.f32 %v8662_v26, %v9834_v4  ;;  %v3833_v39 = vand.u32 4294901760, %v3832_v45  ;;  %v3846_v4 = vsub.f32 %v8743_v6, %v9836_v31  ;;  %5376 = vmatpush3.msra.mxu0 %v8715_v17  ;;  %v9838_v59 = vand.u32 4294901760, %v8752_v20 }
 0x1c4   :  { %5401 = vmatpush3.msra.mxu1 %v3819_v5  ;;  %v3952_v5 = vand.u32 4294901760, %v3951_v46  ;;  %v3965_v37 = vsub.f32 %v8759_v32, %v9837_v12  ;;  %5377 = vmatprep.subr.mxu0 %v8733_v10  ;;  %v3959_v31 = vand.u32 4294901760, %v3958_v49  ;;  %v3972_v46 = vsub.f32 %v8775_v36, %v9331_v57  ;;  %v9842_v12 = vld [vmem:[#allocation20_spill] sm:$0xff]  ;;  %v9856_v57 = vld [vmem:[#allocation17_spill] sm:$0xff] }
 0x1c5   :  { %5402 = vmatprep.subr.mxu1 %v3938_v3  ;;  %v3840_v3 = vand.u32 4294901760, %v3839_v15  ;;  %v3853_v45 = vsub.f32 %v8752_v20, %v9838_v59  ;;  %5378 = vmatpush3.msra.mxu0 %v8735_v41  ;;  %v9845_v59 = vld [vmem:[#allocation5_spill] sm:$0xff] }
 0x1c6   :  { %5403 = vmatpush3.msra.mxu1 %v3826_v61  ;;  %3740 = vmatprep.mubr.f32.mxu0 %v3739_v22  ;;  %v3847_v61 = vand.u32 4294901760, %v3846_v4  ;;  %v3966_v15 = vand.u32 4294901760, %v3965_v37  ;;  %v3973_v49 = vand.u32 4294901760, %v3972_v46  ;;  %v9840_v4 = vld [vmem:[#allocation27_spill] sm:$0xff]  ;;  %v9843_v37 = vld [vmem:[#allocation12_spill] sm:$0xff]  ;;  %v9848_v46 = vld [vmem:[#allocation2_spill] sm:$0xff] }
 0x1c7   :  { %5404 = vmatprep.subr.mxu1 %v3945_v24  ;;  %3746 = vmatmul.mubr.f32.vlgmr.msra.gmra.mxu0 %v3745_v62  ;;  %v3860_v24 = vsub.f32 %v8768_v54, %v9330_v2  ;;  %v3854_v22 = vand.u32 4294901760, %v3853_v45  ;;  %v9839_v62 = vld [vmem:[#allocation3_spill] sm:$0xff] }
 0x1c8   :  { %5405 = vmatpush3.msra.mxu1 %v3833_v39  ;;  %5417 = vmatprep.subr.mxu0 %v8283_v42  ;;  %v9846_v45 = vld [vmem:[#allocation7_spill] sm:$0xff] }
 0x1c9   :  { %5406 = vmatprep.subr.mxu1 %v3952_v5  ;;  %5418 = vmatpush3.msra.mxu0 %v8300_v0  ;;  %v3861_v39 = vand.u32 4294901760, %v3860_v24  ;;  %v9841_v5 = vld [vmem:[#allocation19_spill] sm:$0xff] }
 0x1ca   :  { %5407 = vmatpush3.msra.mxu1 %v3840_v3  ;;  %5419 = vmatprep.subr.mxu0 %v8335_v9  ;;  %v9844_v3 = vld [vmem:[#allocation6_spill] sm:$0xff]  ;;  %v9850_v24 = vld [vmem:[#allocation11_spill] sm:$0xff] }
 0x1cb   :  { %5408 = vmatprep.subr.mxu1 %v3959_v31  ;;  %5420 = vmatpush3.msra.mxu0 %v8341_v29  ;;  %v9847_v31 = vld [vmem:[#allocation21_spill] sm:$0xff]  ;;  %v9855_v2 = vld [vmem:[#allocation15_spill] sm:$0xff] }
 0x1cc   :  { %5409 = vmatpush3.msra.mxu1 %v3847_v61  ;;  %5421 = vmatprep.subr.mxu0 %v8355_v51  ;;  %v9849_v61 = vld [vmem:[#allocation4_spill] sm:$0xff] }
 0x1cd   :  { %5410 = vmatprep.subr.mxu1 %v3966_v15  ;;  %5422 = vmatpush3.msra.mxu0 %v8361_v58  ;;  %v9851_v15 = vld [vmem:[#allocation18_spill] sm:$0xff] }
 0x1ce   :  { %5411 = vmatpush3.msra.mxu1 %v3854_v22  ;;  %5423 = vmatprep.subr.mxu0 %v8371_v47  ;;  %v9852_v22 = vld [vmem:[#allocation9_spill] sm:$0xff] }
 0x1cf   :  { %5412 = vmatprep.subr.mxu1 %v3973_v49  ;;  %5424 = vmatpush3.msra.mxu0 %v8377_v60  ;;  %v9853_v49 = vld [vmem:[#allocation14_spill] sm:$0xff] }
 0x1d0   :  { %5413 = vmatpush3.msra.mxu1 %v3861_v39  ;;  %5425 = vmatprep.subr.mxu0 %v8398_v25  ;;  %v9854_v39 = vld [vmem:[#allocation29_spill] sm:$0xff] }
 0x1d1   :  { %3978 = vmatmul.mubr.f32.vlgmr.msra.gmra.mxu1 %v8653_v14  ;;  %5452 = vmatprep.subr.mxu1 %v8257_v23  ;;  %v9857_v14 = vld [vmem:[#allocation8_spill] sm:$0xff] }
 0x1d2   :  { %5426 = vmatpush3.msra.mxu0 %v8404_v53  ;;  %5453 = vmatpush3.msra.mxu1 %v8265_v16 }
 0x1d3   :  { %5427 = vmatprep.subr.mxu0 %v8420_v8  ;;  %5454 = vmatprep.subr.mxu1 %v8288_v7 }
 0x1d4   :  { %5428 = vmatpush3.msra.mxu0 %v8442_v50  ;;  %5455 = vmatpush3.msra.mxu1 %v8302_v1 }
 0x1d5   :  { %5429 = vmatprep.subr.mxu0 %v8495_v44  ;;  %5456 = vmatprep.subr.mxu1 %v8310_v30 }
 0x1d6   :  { %5430 = vmatpush3.msra.mxu0 %v9839_v62  ;;  %5457 = vmatpush3.msra.mxu1 %v9840_v4 }
 0x1d7   :  { %5431 = vmatprep.subr.mxu0 %v9841_v5  ;;  %5458 = vmatprep.subr.mxu1 %v9842_v12 }
 0x1d8   :  { %5432 = vmatpush3.msra.mxu0 %v9843_v37  ;;  %5459 = vmatpush3.msra.mxu1 %v9844_v3 }
 0x1d9   :  { %5433 = vmatprep.subr.mxu0 %v9845_v59  ;;  %5460 = vmatprep.subr.mxu1 %v9846_v45 }
 0x1da   :  { %5434 = vmatpush3.msra.mxu0 %v9847_v31  ;;  %5461 = vmatpush3.msra.mxu1 %v9848_v46 }
 0x1db   :  { %5435 = vmatprep.subr.mxu0 %v8621_v48  ;;  %5462 = vmatprep.subr.mxu1 %v9849_v61 }
 0x1dc   :  { %5436 = vmatpush3.msra.mxu0 %v8584_v19  ;;  %5463 = vmatpush3.msra.mxu1 %v9850_v24 }
 0x1dd   :  { %5437 = vmatprep.subr.mxu0 %v8651_v33  ;;  %5464 = vmatprep.subr.mxu1 %v9851_v15 }
 0x1de   :  { %5438 = vmatpush3.msra.mxu0 %v8625_v28  ;;  %5465 = vmatpush3.msra.mxu1 %v9852_v22 }
 0x1df   :  { %5439 = vmatprep.subr.mxu0 %v8682_v21  ;;  %5466 = vmatprep.subr.mxu1 %v9853_v49 }
 0x1e0   :  { %5440 = vmatpush3.msra.mxu0 %v8659_v63  ;;  %5467 = vmatpush3.msra.mxu1 %v9854_v39 }
 0x1e1   :  { %5441 = vmatprep.subr.mxu0 %v8719_v55  ;;  %5468 = vmatprep.subr.mxu1 %v9855_v2 }
 0x1e2   :  { %5442 = vmatpush3.msra.mxu0 %v8662_v26  ;;  %5469 = vmatpush3.msra.mxu1 %v9856_v57 }
 0x1e3   :  { %5443 = vmatprep.subr.mxu0 %v8739_v13  ;;  %5470 = vmatprep.subr.mxu1 %v9857_v14  ;;  %v9859_v14 = vld [vmem:[#allocation26_spill] sm:$0xff] }
 0x1e4   :  { %5444 = vmatpush3.msra.mxu0 %v8743_v6  ;;  %5471 = vmatpush3.msra.mxu1 %v8533_v56 }
 0x1e5   :  { %5445 = vmatprep.subr.mxu0 %v8759_v32  ;;  %5472 = vmatprep.subr.mxu1 %v9858_v52  ;;  %v9860_v52 = vand.u32 4294901760, %v8283_v42  ;;  %v9865_v42 = vand.u32 4294901760, %v8355_v51  ;;  %v9870_v51 = vand.u32 4294901760, %v8708_v18 }
 0x1e6   :  { %5446 = vmatpush3.msra.mxu0 %v8752_v20  ;;  %5473 = vmatpush3.msra.mxu1 %v8572_v38  ;;  %v9861_v38 = vand.u32 4294901760, %v8300_v0  ;;  %v9866_v0 = vand.u32 4294901760, %v8361_v58  ;;  %v9872_v58 = vand.u32 4294901760, %v8404_v53  ;;  %v9882_v53 = vand.u32 4294901760, %v8584_v19  ;;  %v9890_v19 = vld [vmem:[#allocation8_spill] sm:$0xff] }
 0x1e7   :  { %5447 = vmatprep.subr.mxu0 %v8775_v36  ;;  %5474 = vmatprep.subr.mxu1 %v8617_v34  ;;  %v9862_v36 = vld [vmem:[#allocation30_spill] sm:$0xff] }
 0x1e8   :  { %5448 = vmatpush3.msra.mxu0 %v8768_v54  ;;  %4113 = vmatprep.mubr.f32.mxu0 %v8692_v35  ;;  %v9863_v54 = vand.u32 4294901760, %v8335_v9  ;;  %v9867_v9 = vand.u32 4294901760, %v8371_v47  ;;  %v9873_v47 = vand.u32 4294901760, %v8420_v8  ;;  %v9883_v8 = vand.u32 4294901760, %v8651_v33 }
 0x1e9   :  { %5475 = vmatpush3.msra.mxu1 %v9859_v14  ;;  %4116 = vmatmul.mubr.f32.vlgmr.msra.gmra.mxu0 %v8708_v18  ;;  %v9864_v14 = vand.u32 4294901760, %v8341_v29  ;;  %v9868_v29 = vand.u32 4294901760, %v8692_v35  ;;  %v9886_v35 = vand.u32 4294901760, %v8659_v63  ;;  %v9887_v33 = vand.u32 4294901760, %v8719_v55  ;;  %v9893_v55 = vld [vmem:[#allocation13_spill] sm:$0xff]  ;;  %v9896_v18 = vld [vmem:[#allocation23_spill] sm:$0xff] }
 0x1ea   :  { %5476 = vmatprep.subr.mxu1 %v8640_v40  ;;  %5487 = vmatprep.subr.mxu0 %v9860_v52  ;;  %v9871_v52 = vand.u32 4294901760, %v8398_v25  ;;  %v9875_v25 = vand.u32 4294901760, %v8495_v44  ;;  %v9881_v44 = vand.u32 4294901760, %v8621_v48  ;;  %v9885_v48 = vand.u32 4294901760, %v8682_v21 }
 0x1eb   :  { %5477 = vmatpush3.msra.mxu1 %v8610_v11  ;;  %5488 = vmatpush3.msra.mxu0 %v9861_v38  ;;  %v9869_v38 = vand.u32 4294901760, %v8377_v60  ;;  %v9874_v60 = vand.u32 4294901760, %v8442_v50  ;;  %v9884_v50 = vand.u32 4294901760, %v8625_v28  ;;  %v9888_v28 = vand.u32 4294901760, %v8662_v26  ;;  %v9895_v26 = vld [vmem:[#allocation10_spill] sm:$0xff] }
 0x1ec   :  { %5478 = vmatprep.subr.mxu1 %v9862_v36  ;;  %5489 = vmatprep.subr.mxu0 %v9863_v54  ;;  %v9889_v21 = vand.u32 4294901760, %v8739_v13  ;;  %v9891_v63 = vand.u32 4294901760, %v8743_v6  ;;  %v9897_v13 = vand.u32 4294901760, %v9896_v18  ;;  %v9898_v54 = vld [vmem:[#allocation22_spill] sm:$0xff] }
 0x1ed   :  { %5479 = vmatpush3.msra.mxu1 %v8698_v27  ;;  %5490 = vmatpush3.msra.mxu0 %v9864_v14  ;;  %v9892_v14 = vand.u32 4294901760, %v8759_v32  ;;  %v9899_v6 = vand.u32 4294901760, %v9898_v54  ;;  %v9902_v32 = vld [vmem:[#allocation16_spill] sm:$0xff] }
 0x1ee   :  { %5480 = vmatprep.subr.mxu1 %v8713_v43  ;;  %5491 = vmatprep.subr.mxu0 %v9865_v42 }
 0x1ef   :  { %5481 = vmatpush3.msra.mxu1 %v8715_v17  ;;  %5492 = vmatpush3.msra.mxu0 %v9866_v0 }
 0x1f0   :  { %5482 = vmatprep.subr.mxu1 %v8733_v10  ;;  %5493 = vmatprep.subr.mxu0 %v9867_v9 }
 0x1f1   :  { %5483 = vmatpush3.msra.mxu1 %v8735_v41  ;;  %4220 = vmatprep.mubr.f32.mxu1 %v9868_v29 }
 0x1f2   :  { %5494 = vmatpush3.msra.mxu0 %v9869_v38  ;;  %4224 = vmatmul.mubr.f32.vlgmr.msra.gmra.mxu1 %v9870_v51 }
 0x1f3   :  { %5495 = vmatprep.subr.mxu0 %v9871_v52  ;;  %5522 = vmatprep.subr.mxu1 %v8257_v23  ;;  %v9876_v23 = vand.u32 4294901760, %v9839_v62 }
 0x1f4   :  { %5496 = vmatpush3.msra.mxu0 %v9872_v58  ;;  %5523 = vmatpush3.msra.mxu1 %v8265_v16  ;;  %v9877_v16 = vand.u32 4294901760, %v9841_v5 }
 0x1f5   :  { %5497 = vmatprep.subr.mxu0 %v9873_v47  ;;  %5524 = vmatprep.subr.mxu1 %v8288_v7  ;;  %v9878_v7 = vand.u32 4294901760, %v9843_v37 }
 0x1f6   :  { %5498 = vmatpush3.msra.mxu0 %v9874_v60  ;;  %5525 = vmatpush3.msra.mxu1 %v8302_v1  ;;  %v9879_v1 = vand.u32 4294901760, %v9845_v59 }
 0x1f7   :  { %5499 = vmatprep.subr.mxu0 %v9875_v25  ;;  %5526 = vmatprep.subr.mxu1 %v8310_v30  ;;  %v9880_v30 = vand.u32 4294901760, %v9847_v31 }
 0x1f8   :  { %5500 = vmatpush3.msra.mxu0 %v9876_v23  ;;  %5527 = vmatpush3.msra.mxu1 %v9840_v4 }
 0x1f9   :  { %5501 = vmatprep.subr.mxu0 %v9877_v16  ;;  %5528 = vmatprep.subr.mxu1 %v9842_v12 }
 0x1fa   :  { %5502 = vmatpush3.msra.mxu0 %v9878_v7  ;;  %5529 = vmatpush3.msra.mxu1 %v9844_v3 }
 0x1fb   :  { %5503 = vmatprep.subr.mxu0 %v9879_v1  ;;  %5530 = vmatprep.subr.mxu1 %v9846_v45 }
 0x1fc   :  { %5504 = vmatpush3.msra.mxu0 %v9880_v30  ;;  %5531 = vmatpush3.msra.mxu1 %v9848_v46 }
 0x1fd   :  { %5505 = vmatprep.subr.mxu0 %v9881_v44  ;;  %5532 = vmatprep.subr.mxu1 %v9849_v61 }
 0x1fe   :  { %5506 = vmatpush3.msra.mxu0 %v9882_v53  ;;  %5533 = vmatpush3.msra.mxu1 %v9850_v24 }
 0x1ff   :  { %5507 = vmatprep.subr.mxu0 %v9883_v8  ;;  %5534 = vmatprep.subr.mxu1 %v9851_v15  ;;  %v4506_v15 = vld [vmem:[%s9000_s2] ss:$0 sm:$0xff] }
 0x200   :  { %5508 = vmatpush3.msra.mxu0 %v9884_v50  ;;  %5535 = vmatpush3.msra.mxu1 %v9852_v22 }
 0x201   :  { %5509 = vmatprep.subr.mxu0 %v9885_v48  ;;  %5536 = vmatprep.subr.mxu1 %v9853_v49 }
 0x202   :  { %5510 = vmatpush3.msra.mxu0 %v9886_v35  ;;  %5537 = vmatpush3.msra.mxu1 %v9854_v39 }
 0x203   :  { %5511 = vmatprep.subr.mxu0 %v9887_v33  ;;  %5538 = vmatprep.subr.mxu1 %v9855_v2  ;;  %v9894_v2 = vand.u32 4294901760, %v8752_v20  ;;  %v4574_v20 = vpop.f32.mrf.mxu1 }
 0x204   :  { %5512 = vmatpush3.msra.mxu0 %v9888_v28  ;;  %5539 = vmatpush3.msra.mxu1 %v9856_v57  ;;  %v9900_v57 = vld [vmem:[#allocation24_spill] sm:$0xff] }
 0x205   :  { %5513 = vmatprep.subr.mxu0 %v9889_v21  ;;  %5540 = vmatprep.subr.mxu1 %v9890_v19  ;;  %v4575_v4 = vpop.f32.mrf.mxu1 }
 0x206   :  { %5514 = vmatpush3.msra.mxu0 %v9891_v63  ;;  %5541 = vmatpush3.msra.mxu1 %v8533_v56  ;;  %v9901_v56 = vld [vmem:[#allocation26_spill] sm:$0xff]  ;;  %v4576_v0 = vadd.f32 %v4575_v4, %v4574_v20 }
 0x207   :  { %5515 = vmatprep.subr.mxu0 %v9892_v14  ;;  %5542 = vmatprep.subr.mxu1 %v9893_v55  ;;  %v4644_v5 = vpop.f32.mrf.mxu1 }
 0x208   :  { %5516 = vmatpush3.msra.mxu0 %v9894_v2  ;;  %5543 = vmatpush3.msra.mxu1 %v9895_v26 }
 0x209   :  { %5517 = vmatprep.subr.mxu0 %v9897_v13  ;;  %5544 = vmatprep.subr.mxu1 %v8617_v34  ;;  %v4539_v34 = vpop.f32.mrf.mxu0  ;;  %v4645_v12 = vpop.f32.mrf.mxu1 }
 0x20a   :  { %5518 = vmatpush3.msra.mxu0 %v9899_v6  ;;  %4390 = vmatprep.mubr.f32.mxu0 %v9900_v57  ;;  %v4646_v58 = vadd.f32 %v4645_v12, %v4644_v5 }
 0x20b   :  { %5545 = vmatpush3.msra.mxu1 %v9901_v56  ;;  %4392 = vmatmul.mubr.f32.vlgmr.msra.gmra.mxu0 %v9902_v32  ;;  %v4714_v37 = vpop.f32.mrf.mxu1 }
 0x20c   :  { %5546 = vmatprep.subr.mxu1 %v8640_v40  ;;  %4494 = vmatprep.mubr.f32.mxu1 %v9900_v57  ;;  %v4540_v40 = vpop.f32.mrf.mxu0 }
 0x20d   :  { %5547 = vmatpush3.msra.mxu1 %v8610_v11  ;;  %v4715_v3 = vpop.f32.mrf.mxu1  ;;  %v4541_v24 = vadd.f32 %v4540_v40, %v4539_v34 }
 0x20e   :  { %5548 = vmatprep.subr.mxu1 %v9862_v36  ;;  %v4609_v62 = vpop.f32.mrf.mxu0  ;;  %v4716_v7 = vadd.f32 %v4715_v3, %v4714_v37 }
 0x20f   :  { %5549 = vmatpush3.msra.mxu1 %v8698_v27  ;;  %v4784_v59 = vpop.f32.mrf.mxu1  ;;  %v300_v42 = vadd.f32 %v4541_v24, %v4506_v15 }
 0x210   :  { %5550 = vmatprep.subr.mxu1 %v8713_v43  ;;  %v4610_v11 = vpop.f32.mrf.mxu0 }
 0x211   :  { %5551 = vmatpush3.msra.mxu1 %v8715_v17  ;;  %v4785_v45 = vpop.f32.mrf.mxu1  ;;  %v4611_v29 = vadd.f32 %v4610_v11, %v4609_v62  ;;  %v532_v52 = vadd.f32 %v4576_v0, %v300_v42 }
 0x212   :  { %5552 = vmatprep.subr.mxu1 %v8733_v10  ;;  %v4679_v36 = vpop.f32.mrf.mxu0  ;;  %v4786_v48 = vadd.f32 %v4785_v45, %v4784_v59 }
 0x213   :  { %5553 = vmatpush3.msra.mxu1 %v8735_v41  ;;  %v4854_v31 = vpop.f32.mrf.mxu1  ;;  %v670_v60 = vadd.f32 %v4611_v29, %v532_v52 }
 0x214   :  { %4496 = vmatmul.mubr.f32.vlgmr.msra.gmra.mxu1 %v9902_v32  ;;  %v4680_v27 = vpop.f32.mrf.mxu0 }
 0x215   :  { %v4855_v61 = vpop.f32.mrf.mxu1  ;;  %v4681_v25 = vadd.f32 %v4680_v27, %v4679_v36  ;;  %v778_v16 = vadd.f32 %v4646_v58, %v670_v60 }
 0x216   :  { %v4749_v43 = vpop.f32.mrf.mxu0  ;;  %v4856_v14 = vadd.f32 %v4855_v61, %v4854_v31 }
 0x217   :  { %v4924_v49 = vpop.f32.mrf.mxu1  ;;  %v946_v44 = vadd.f32 %v4681_v25, %v778_v16 }
 0x218   :  { %v4750_v17 = vpop.f32.mrf.mxu0 }
 0x219   :  { %v4925_v9 = vpop.f32.mrf.mxu1  ;;  %v4751_v53 = vadd.f32 %v4750_v17, %v4749_v43  ;;  %v1050_v50 = vadd.f32 %v4716_v7, %v946_v44 }
 0x21a   :  { %v4819_v10 = vpop.f32.mrf.mxu0  ;;  %v4926_v54 = vadd.f32 %v4925_v9, %v4924_v49 }
 0x21b   :  { %v4994_v51 = vpop.f32.mrf.mxu1  ;;  %v1162_v33 = vadd.f32 %v4751_v53, %v1050_v50 }
 0x21c   :  { %v4820_v41 = vpop.f32.mrf.mxu0 }
 0x21d   :  { %v4995_v23 = vpop.f32.mrf.mxu1  ;;  %v4821_v28 = vadd.f32 %v4820_v41, %v4819_v10  ;;  %v1394_v63 = vadd.f32 %v4786_v48, %v1162_v33 }
 0x21e   :  { %v4889_v46 = vpop.f32.mrf.mxu0  ;;  %v4996_v20 = vadd.f32 %v4995_v23, %v4994_v51 }
 0x21f   :  { %v5064_v30 = vpop.f32.mrf.mxu1  ;;  %v1532_v2 = vadd.f32 %v4821_v28, %v1394_v63 }
 0x220   :  { %v4890_v22 = vpop.f32.mrf.mxu0 }
 0x221   :  { %v5065_v35 = vpop.f32.mrf.mxu1  ;;  %v4891_v26 = vadd.f32 %v4890_v22, %v4889_v46  ;;  %v1640_v13 = vadd.f32 %v4856_v14, %v1532_v2 }
 0x222   :  { %v4959_v39 = vpop.f32.mrf.mxu0  ;;  %v5066_v27 = vadd.f32 %v5065_v35, %v5064_v30 }
 0x223   :  { %v5134_v19 = vpop.f32.mrf.mxu1  ;;  %v1808_v56 = vadd.f32 %v4891_v26, %v1640_v13 }
 0x224   :  { %v4960_v38 = vpop.f32.mrf.mxu0 }
 0x225   :  { %v5135_v18 = vpop.f32.mrf.mxu1  ;;  %v4961_v32 = vadd.f32 %v4960_v38, %v4959_v39  ;;  %v1912_v40 = vadd.f32 %v4926_v54, %v1808_v56 }
 0x226   :  { %v5029_v47 = vpop.f32.mrf.mxu0  ;;  %v5136_v10 = vadd.f32 %v5135_v18, %v5134_v19 }
 0x227   :  { %v2024_v4 = vadd.f32 %v4961_v32, %v1912_v40 }
 0x228   :  { %v5030_v1 = vpop.f32.mrf.mxu0 }
 0x229   :  { %v5031_v11 = vadd.f32 %v5030_v1, %v5029_v47  ;;  %v2256_v12 = vadd.f32 %v4996_v20, %v2024_v4 }
 0x22a   :  { %v5099_v8 = vpop.f32.mrf.mxu0  ;;  %v5204_v57 = vpop.f32.mrf.mxu1 }
 0x22b   :  { %v2394_v43 = vadd.f32 %v5031_v11, %v2256_v12 }
 0x22c   :  { %v5100_v21 = vpop.f32.mrf.mxu0  ;;  %v5205_v62 = vpop.f32.mrf.mxu1 }
 0x22d   :  { %v5101_v3 = vadd.f32 %v5100_v21, %v5099_v8  ;;  %v2502_v59 = vadd.f32 %v5066_v27, %v2394_v43  ;;  %v5206_v15 = vadd.f32 %v5205_v62, %v5204_v57 }
 0x22e   :  { %v5169_v55 = vpop.f32.mrf.mxu0 }
 0x22f   :  { %v2670_v31 = vadd.f32 %v5101_v3, %v2502_v59 }
 0x230   :  { %v5170_v6 = vpop.f32.mrf.mxu0 }
 0x231   :  { %v5171_v46 = vadd.f32 %v5170_v6, %v5169_v55  ;;  %v2774_v24 = vadd.f32 %v5136_v10, %v2670_v31 }
 0x233   :  { %v2886_v49 = vadd.f32 %v5171_v46, %v2774_v24 }
 0x235   :  { %v3118_v9 = vadd.f32 %v5206_v15, %v2886_v49 }
 0x242   :  { %v5239_v34 = vpop.f32.mrf.mxu0 }
 0x244   :  { %v5240_v5 = vpop.f32.mrf.mxu0 }
 0x245   :  { %v5241_v39 = vadd.f32 %v5240_v5, %v5239_v34 }
 0x247   :  { %v3256_v51 = vadd.f32 %v5241_v39, %v3118_v9 }
 0x24b   :  { %v5274_v36 = vpop.f32.mrf.mxu1 }
 0x24d   :  { %v5275_v17 = vpop.f32.mrf.mxu1 }
 0x24e   :  { %v5276_v29 = vadd.f32 %v5275_v17, %v5274_v36 }
 0x250   :  { %v3364_v47 = vadd.f32 %v5276_v29, %v3256_v51 }
 0x265   :  { %v5309_v37 = vpop.f32.mrf.mxu0 }
 0x267   :  { %v5310_v45 = vpop.f32.mrf.mxu0 }
 0x268   :  { %v5311_v52 = vadd.f32 %v5310_v45, %v5309_v37 }
 0x26a   :  { %v3532_v16 = vadd.f32 %v5311_v52, %v3364_v47 }
 0x26e   :  { %v5344_v41 = vpop.f32.mrf.mxu1 }
 0x270   :  { %v5345_v22 = vpop.f32.mrf.mxu1 }
 0x271   :  { %v5346_v60 = vadd.f32 %v5345_v22, %v5344_v41 }
 0x273   :  { %v3636_v30 = vadd.f32 %v5346_v60, %v3532_v16 }
 0x287   :  { %v5379_v61 = vpop.f32.mrf.mxu0 }
 0x289   :  { %v5380_v42 = vpop.f32.mrf.mxu0 }
 0x28a   :  { %v5381_v7 = vadd.f32 %v5380_v42, %v5379_v61 }
 0x28c   :  { %v3748_v8 = vadd.f32 %v5381_v7, %v3636_v30 }
 0x291   :  { %v5414_v0 = vpop.f32.mrf.mxu1 }
 0x293   :  { %v5415_v58 = vpop.f32.mrf.mxu1 }
 0x294   :  { %v5416_v44 = vadd.f32 %v5415_v58, %v5414_v0 }
 0x296   :  { %v3980_v35 = vadd.f32 %v5416_v44, %v3748_v8 }
 0x2a9   :  { %v5449_v38 = vpop.f32.mrf.mxu0 }
 0x2ab   :  { %v5450_v25 = vpop.f32.mrf.mxu0 }
 0x2ac   :  { %v5451_v50 = vadd.f32 %v5450_v25, %v5449_v38 }
 0x2ae   :  { %v4118_v28 = vadd.f32 %v5451_v50, %v3980_v35 }
 0x2b2   :  { %v5484_v23 = vpop.f32.mrf.mxu1 }
 0x2b4   :  { %v5485_v53 = vpop.f32.mrf.mxu1 }
 0x2b5   :  { %v5486_v33 = vadd.f32 %v5485_v53, %v5484_v23 }
 0x2b7   :  { %v4226_v63 = vadd.f32 %v5486_v33, %v4118_v28 }
 0x2cb   :  { %v5519_v1 = vpop.f32.mrf.mxu0 }
 0x2cd   :  { %v5520_v48 = vpop.f32.mrf.mxu0 }
 0x2ce   :  { %v5521_v21 = vadd.f32 %v5520_v48, %v5519_v1 }
 0x2d0   :  { %v4394_v55 = vadd.f32 %v5521_v21, %v4226_v63 }
 0x2d4   :  { %v5554_v19 = vpop.f32.mrf.mxu1 }
 0x2d6   :  { %v5555_v14 = vpop.f32.mrf.mxu1 }
 0x2d7   :  { %v5556_v2 = vadd.f32 %v5555_v14, %v5554_v19 }
 0x2d9   :  { %v4498_v26 = vadd.f32 %v5556_v2, %v4394_v55 }
 0x2db   :  { %4501 = vst [vmem:[%s9001_s3] sm:$0xff] %v4498_v26 }

</bundles_post_ra>
